<compile_context>
chip_gen: v5e
topology: v5e:2x2
jax: 0.10.0
libtpu: 0.0.40
codegen_flags: <defaults>
</compile_context>

<pallas_src>
import functools

import jax
import jax.numpy as jnp
from jax.experimental import pallas as pl
from jax.experimental.pallas import tpu as pltpu

POSTERIOR_MU_INIT = 0.0
POSTERIOR_RHO_INIT = -3.0
PRIOR_MU = 0.0
PRIOR_SIGMA = 1.0

N_LEVEL = 5
M_RAW = 2 ** N_LEVEL - 1          # 31 design points per input dimension
M_PAD = 32                        # padded -> feature width 64*32 = 2048 (16*128)
W_HIDDEN = 64                     # w0 = w1 = 64 in the reference module
NUM_CLASSES_PAD = 128             # fc2 output padded 10 -> 128 for lane-dense store
NEG_BIG = -1.0e30                 # pad-class bias: excluded from the softmax


# ----------------------------- fused Pallas kernel --------------------------

def _fused_kernel(x_ref, rep_ref, w0_ref, b0_ref,
                  u1_ref, w1_ref, b1_ref,
                  u2_ref, w2_ref, b2_ref, o_ref, *, inv_ell):
    # fc0:  (bt, in_dim) @ (in_dim, 64) + b0
    h0 = jnp.dot(x_ref[...], w0_ref[...],
                 preferred_element_type=jnp.float32) + b0_ref[...]        # (bt, 64)

    # Replicate the 64 per-dim values across the 32 (padded) design points:
    # lane l = p*64 + d  ->  h0[:, d].  Done with a 0/1 matmul so every op stays
    # lane-dense and no minor-dim reshape/concat is needed inside the kernel.
    h0r = jnp.dot(h0, rep_ref[...], preferred_element_type=jnp.float32)  # (bt, 2048)
    # Laplace (Markov) kernel features; R^{-1} whitening is folded into w1.
    phi1 = jnp.exp(-jnp.abs(h0r - u1_ref[...]) * inv_ell)                # (bt, 2048)

    # fc1 with block-diag(R^{-1}) pre-multiplied into the (permuted, padded) weight
    h1 = jnp.dot(phi1, w1_ref[...],
                 preferred_element_type=jnp.float32) + b1_ref[...]        # (bt, 64)

    h1r = jnp.dot(h1, rep_ref[...], preferred_element_type=jnp.float32)  # (bt, 2048)
    phi2 = jnp.exp(-jnp.abs(h1r - u2_ref[...]) * inv_ell)                # (bt, 2048)

    # fc2 (folded + padded to 128 classes) fused with log_softmax.
    logits = jnp.dot(phi2, w2_ref[...],
                     preferred_element_type=jnp.float32) + b2_ref[...]    # (bt, 128)
    m = jnp.max(logits, axis=-1, keepdims=True)
    lse = jnp.log(jnp.sum(jnp.exp(logits - m), axis=-1, keepdims=True)) + m
    o_ref[...] = logits - lse


def _round_up(x, m):
    return ((x + m - 1) // m) * m


def _fused_call(fp, x_flat, *, lengthscale=1.0, batch_tile=128):
    B, in_dim = x_flat.shape
    # batch tile is always a multiple of 8 (sublane) so the (8,128) constraint
    # holds for every grid size, including the tiny demo batch.
    bt = min(batch_tile, _round_up(B, 8))
    b_pad = _round_up(B, bt)
    if b_pad != B:
        x_flat = jnp.pad(x_flat, ((0, b_pad - B), (0, 0)))
    dm = W_HIDDEN * M_PAD

    kern = functools.partial(_fused_kernel, inv_ell=float(1.0 / lengthscale))

    def pinned(shape):
        return pl.BlockSpec(shape, lambda i: (0, 0))

    out = pl.pallas_call(
        kern,
        out_shape=jax.ShapeDtypeStruct((b_pad, NUM_CLASSES_PAD), jnp.float32),
        grid=(b_pad // bt,),
        in_specs=[
            pl.BlockSpec((bt, in_dim), lambda i: (i, 0)),   # x (batch-tiled)
            pinned((W_HIDDEN, dm)),                         # replication matrix
            pinned((in_dim, W_HIDDEN)),                     # fc0 weight (in, out)
            pinned((1, W_HIDDEN)),                          # fc0 bias
            pinned((1, dm)),                                # expanded design points 1
            pinned((dm, W_HIDDEN)),                         # fc1 weight (whitening folded)
            pinned((1, W_HIDDEN)),                          # fc1 bias
            pinned((1, dm)),                                # expanded design points 2
            pinned((dm, NUM_CLASSES_PAD)),                  # fc2 weight (folded + padded)
            pinned((1, NUM_CLASSES_PAD)),                   # fc2 bias (pads = -1e30)
        ],
        out_specs=pl.BlockSpec((bt, NUM_CLASSES_PAD), lambda i: (i, 0)),
        compiler_params=pltpu.CompilerParams(
            dimension_semantics=("parallel",),
            vmem_limit_bytes=32 * 1024 * 1024),
    )(x_flat, fp["rep"], fp["w0t"], fp["b0"],
      fp["u1_exp"], fp["w1_fold"], fp["b1"],
      fp["u2_exp"], fp["w2_fold"], fp["b2_pad"])
    return out[:B]


# ----------------------------- parameter setup ------------------------------

def _softplus(x):
    return jnp.log1p(jnp.exp(x))


def _kl_gauss(mu_q, sigma_q):
    # KL( N(mu_q, sigma_q^2) || N(PRIOR_MU, PRIOR_SIGMA^2) ), summed
    return jnp.sum(
        jnp.log(PRIOR_SIGMA) - jnp.log(sigma_q) - 0.5
        + (sigma_q ** 2 + (mu_q - PRIOR_MU) ** 2) / (2.0 * PRIOR_SIGMA ** 2))


def init_bayes_linear(key, in_f, out_f):
    """LinearReparameterization: sample W = mu + softplus(rho) * eps."""
    k1, k2, k3, k4, k5, k6 = jax.random.split(key, 6)
    mu_w = POSTERIOR_MU_INIT + 0.1 * jax.random.normal(k1, (out_f, in_f), jnp.float32)
    rho_w = POSTERIOR_RHO_INIT + 0.1 * jax.random.normal(k2, (out_f, in_f), jnp.float32)
    mu_b = POSTERIOR_MU_INIT + 0.1 * jax.random.normal(k3, (out_f,), jnp.float32)
    rho_b = POSTERIOR_RHO_INIT + 0.1 * jax.random.normal(k4, (out_f,), jnp.float32)
    sigma_w = _softplus(rho_w)
    sigma_b = _softplus(rho_b)
    w = mu_w + sigma_w * jax.random.normal(k5, (out_f, in_f), jnp.float32)
    b = mu_b + sigma_b * jax.random.normal(k6, (out_f,), jnp.float32)
    kl = _kl_gauss(mu_w, sigma_w) + _kl_gauss(mu_b, sigma_b)
    return w.T.astype(jnp.float32), b.astype(jnp.float32), kl   # (in,out), (out,)


def init_amgp(n_level, lengthscale=1.0, lb=-2.0, ub=2.0):
    # TODO(synk): AMGP / design_class / kernel sources were not provided with the
    # module; this follows the dtmgp reference (dyadic design points, Laplace
    # product (Markov) kernel, inverse upper-Cholesky whitening).
    m = 2 ** n_level - 1
    idx = jnp.arange(1, m + 1, dtype=jnp.float32)
    u = lb + (ub - lb) * idx / (2.0 ** n_level)                      # (m,)
    K = jnp.exp(-jnp.abs(u[:, None] - u[None, :]) / lengthscale)
    L = jnp.linalg.cholesky(K + 1e-6 * jnp.eye(m, dtype=jnp.float32))
    rinv = jnp.linalg.inv(L.T)                                       # upper-tri
    return u.astype(jnp.float32), rinv.astype(jnp.float32), m


def build_raw_params(key, input_dim, output_dim, lengthscale=1.0):
    kf0, kf1, kf2 = jax.random.split(key, 3)
    w0t, b0, kl0 = init_bayes_linear(kf0, input_dim, W_HIDDEN)
    u1, rinv1, m = init_amgp(N_LEVEL, lengthscale)
    w1t, b1, kl1 = init_bayes_linear(kf1, W_HIDDEN * m, W_HIDDEN)
    u2, rinv2, _ = init_amgp(N_LEVEL, lengthscale)
    w2t, b2, kl2 = init_bayes_linear(kf2, W_HIDDEN * m, output_dim)
    return dict(w0t=w0t, b0=b0, u1=u1, rinv1=rinv1, w1t=w1t, b1=b1,
                u2=u2, rinv2=rinv2, w2t=w2t, b2=b2, m=m,
                kl_sum=kl0 + kl1 + kl2)


def _fold_whiten(w_t, rinv, d, m, m_pad):
    # phi @ W == exp_feat @ (block_diag(Rinv) @ W): fold the whitening into the
    # downstream weight.  Output row index is p*d + dd (p = padded feature idx).
    out_f = w_t.shape[1]
    w3 = w_t.reshape(d, m, out_f)                                    # [dd, m', o]
    wf = jnp.einsum('pm,dmo->pdo', rinv, w3)                         # (m, d, out)
    wf = jnp.pad(wf, ((0, m_pad - m), (0, 0), (0, 0)))               # zero pad row
    return wf.reshape(m_pad * d, out_f)


def _expand_u(u, d, m_pad):
    u_pad = jnp.pad(u, (0, m_pad - u.shape[0]))                      # dummy point
    return jnp.repeat(u_pad, d)[None, :]                             # (1, m_pad*d)


def prepare_fused_params(raw, output_dim):
    d = W_HIDDEN
    m = raw["m"]
    rep = jnp.tile(jnp.eye(d, dtype=jnp.float32), (1, M_PAD))        # (64, 2048)
    w1f = _fold_whiten(raw["w1t"], raw["rinv1"], d, m, M_PAD)        # (2048, 64)
    w2f = _fold_whiten(raw["w2t"], raw["rinv2"], d, m, M_PAD)        # (2048, 10)
    w2f = jnp.pad(w2f, ((0, 0), (0, NUM_CLASSES_PAD - output_dim)))  # (2048, 128)
    b2p = jnp.full((1, NUM_CLASSES_PAD), NEG_BIG, jnp.float32)
    b2p = b2p.at[0, :output_dim].set(raw["b2"])
    return dict(rep=rep,
                w0t=raw["w0t"], b0=raw["b0"][None, :],
                u1_exp=_expand_u(raw["u1"], d, M_PAD), w1_fold=w1f,
                b1=raw["b1"][None, :],
                u2_exp=_expand_u(raw["u2"], d, M_PAD), w2_fold=w2f,
                b2_pad=b2p, kl_sum=raw["kl_sum"])


# ----------------------------- forward --------------------------------------

def damgp_mnist_forward(fused_params, x, *, num_classes=10,
                        lengthscale=1.0, batch_tile=128):
    B = x.shape[0]
    h = x.reshape(B, -1).astype(jnp.float32)           # torch.flatten(x, 1)
    out_pad = _fused_call(fused_params, h,
                          lengthscale=lengthscale, batch_tile=batch_tile)
    return out_pad[:, :num_classes], fused_params["kl_sum"]


# ----------------------------- plain-JAX reference --------------------------

def _amgp_ref(h, u, rinv, inv_ell):
    b, d = h.shape
    feat = jnp.exp(-jnp.abs(h[:, :, None] - u[None, None, :]) * inv_ell)
    phi = jnp.einsum('bdm,mk->bdk', feat, rinv,
                     precision=jax.lax.Precision.HIGHEST)
    return phi.reshape(b, d * u.shape[0])


def reference_forward(raw, x, lengthscale=1.0):
    hp = jax.lax.Precision.HIGHEST
    inv_ell = 1.0 / lengthscale
    B = x.shape[0]
    h = x.reshape(B, -1).astype(jnp.float32)
    h = jnp.dot(h, raw["w0t"], precision=hp) + raw["b0"]
    h = _amgp_ref(h, raw["u1"], raw["rinv1"], inv_ell)
    h = jnp.dot(h, raw["w1t"], precision=hp) + raw["b1"]
    h = _amgp_ref(h, raw["u2"], raw["rinv2"], inv_ell)
    logits = jnp.dot(h, raw["w2t"], precision=hp) + raw["b2"]
    return jax.nn.log_softmax(logits, axis=-1), raw["kl_sum"]


# ----------------------------- demo ------------------------------------------

if __name__ == "__main__":
    key = jax.random.PRNGKey(0)
    kx, kp = jax.random.split(key)

    # small NCHW input consistent with the module: input_dim = C*H*W = 1024
    B, C, H, W = 2, 4, 16, 16
    x = jax.random.normal(kx, (B, C, H, W), dtype=jnp.float32)

    input_dim = C * H * W
    output_dim = 10

    raw = build_raw_params(kp, input_dim, output_dim)
    fused = prepare_fused_params(raw, output_dim)

    fwd = jax.jit(functools.partial(damgp_mnist_forward, num_classes=output_dim))
    out, kl = fwd(fused, x)
    out = jax.block_until_ready(out)
    kl = jax.block_until_ready(kl)

    assert out.shape == (B, output_dim)
    assert bool(jnp.all(jnp.isfinite(out)))
    # log_softmax rows should sum to ~1 in prob space (pads contribute exactly 0)
    assert bool(jnp.allclose(jnp.sum(jnp.exp(out), axis=1), 1.0, atol=1e-4))

    # Compare against the straightforward (unfused, unfolded) plain-JAX forward.
    # The kernel's MXU matmuls run at default (bf16-pass) precision while the
    # reference uses HIGHEST, so only a loose tolerance on log-probs is meaningful.
    ref_out, ref_kl = reference_forward(raw, x)
    max_diff = float(jnp.max(jnp.abs(out - ref_out)))
    assert max_diff < 5e-1, f"mismatch vs reference: {max_diff}"
    assert bool(jnp.allclose(jnp.exp(out), jnp.exp(ref_out), atol=5e-2))
    assert bool(jnp.allclose(kl, ref_kl))

    print("KERNEL_OK")
</pallas_src>

<mosaic_0001>
module attributes {stable_mosaic.version = 11 : i64} {
  func.func @_fused_kernel(%arg0: i32, %arg1: memref<8x1024xf32, #tpu.memory_space<vmem>>, %arg2: memref<64x2048xf32, #tpu.memory_space<vmem>>, %arg3: memref<1024x64xf32, #tpu.memory_space<vmem>>, %arg4: memref<1x64xf32, #tpu.memory_space<vmem>>, %arg5: memref<1x2048xf32, #tpu.memory_space<vmem>>, %arg6: memref<2048x64xf32, #tpu.memory_space<vmem>>, %arg7: memref<1x64xf32, #tpu.memory_space<vmem>>, %arg8: memref<1x2048xf32, #tpu.memory_space<vmem>>, %arg9: memref<2048x128xf32, #tpu.memory_space<vmem>>, %arg10: memref<1x128xf32, #tpu.memory_space<vmem>>, %arg11: memref<8x128xf32, #tpu.memory_space<vmem>>) attributes {dimension_semantics = [#tpu.dimension_semantics<parallel>], iteration_bounds = array<i64: 1>, scalar_prefetch = 0 : i64, scratch_operands = 0 : i64, tpu.core_type = #tpu.core_type<tc>, window_params = [{transform_indices = @transform_0, window_bounds = array<i64: 8, 1024>}, {pipeline_mode = #tpu.pipeline_mode<synchronous>, transform_indices = @transform_1, window_bounds = array<i64: 64, 2048>}, {pipeline_mode = #tpu.pipeline_mode<synchronous>, transform_indices = @transform_2, window_bounds = array<i64: 1024, 64>}, {pipeline_mode = #tpu.pipeline_mode<synchronous>, transform_indices = @transform_3, window_bounds = array<i64: 1, 64>}, {pipeline_mode = #tpu.pipeline_mode<synchronous>, transform_indices = @transform_4, window_bounds = array<i64: 1, 2048>}, {pipeline_mode = #tpu.pipeline_mode<synchronous>, transform_indices = @transform_5, window_bounds = array<i64: 2048, 64>}, {pipeline_mode = #tpu.pipeline_mode<synchronous>, transform_indices = @transform_6, window_bounds = array<i64: 1, 64>}, {pipeline_mode = #tpu.pipeline_mode<synchronous>, transform_indices = @transform_7, window_bounds = array<i64: 1, 2048>}, {pipeline_mode = #tpu.pipeline_mode<synchronous>, transform_indices = @transform_8, window_bounds = array<i64: 2048, 128>}, {pipeline_mode = #tpu.pipeline_mode<synchronous>, transform_indices = @transform_9, window_bounds = array<i64: 1, 128>}, {transform_indices = @transform_10, window_bounds = array<i64: 8, 128>}]} {
    %c0 = arith.constant 0 : index
    %c0_0 = arith.constant 0 : index
    %0 = vector.load %arg1[%c0, %c0_0] : memref<8x1024xf32, #tpu.memory_space<vmem>>, vector<8x1024xf32>
    %c0_1 = arith.constant 0 : index
    %c0_2 = arith.constant 0 : index
    %1 = vector.load %arg3[%c0_1, %c0_2] : memref<1024x64xf32, #tpu.memory_space<vmem>>, vector<1024x64xf32>
    %cst = arith.constant dense<0.000000e+00> : vector<8x64xf32>
    %2 = tpu.matmul %0, %1, %cst {dimension_numbers = #tpu.dot_dimension_numbers<[1], [0], [0], [1], [0, 0, 1, 1], [], []>} : vector<8x1024xf32>, vector<1024x64xf32>, vector<8x64xf32> -> vector<8x64xf32>
    %c0_3 = arith.constant 0 : index
    %c0_4 = arith.constant 0 : index
    %3 = vector.load %arg4[%c0_3, %c0_4] : memref<1x64xf32, #tpu.memory_space<vmem>>, vector<1x64xf32>
    %4 = vector.broadcast %3 : vector<1x64xf32> to vector<8x64xf32>
    %5 = arith.addf %2, %4 : vector<8x64xf32>
    %c0_5 = arith.constant 0 : index
    %c0_6 = arith.constant 0 : index
    %6 = vector.load %arg2[%c0_5, %c0_6] : memref<64x2048xf32, #tpu.memory_space<vmem>>, vector<64x2048xf32>
    %cst_7 = arith.constant dense<0.000000e+00> : vector<8x2048xf32>
    %7 = tpu.matmul %5, %6, %cst_7 {dimension_numbers = #tpu.dot_dimension_numbers<[1], [0], [0], [1], [0, 0, 1, 1], [], []>} : vector<8x64xf32>, vector<64x2048xf32>, vector<8x2048xf32> -> vector<8x2048xf32>
    %c0_8 = arith.constant 0 : index
    %c0_9 = arith.constant 0 : index
    %8 = vector.load %arg5[%c0_8, %c0_9] : memref<1x2048xf32, #tpu.memory_space<vmem>>, vector<1x2048xf32>
    %9 = vector.broadcast %8 : vector<1x2048xf32> to vector<8x2048xf32>
    %10 = arith.subf %7, %9 : vector<8x2048xf32>
    %11 = math.absf %10 : vector<8x2048xf32>
    %cst_10 = arith.constant 0.000000e+00 : f32
    %12 = vector.broadcast %cst_10 : f32 to vector<8x2048xf32>
    %13 = arith.subf %12, %11 : vector<8x2048xf32>
    %cst_11 = arith.constant 1.000000e+00 : f32
    %14 = vector.broadcast %cst_11 : f32 to vector<8x2048xf32>
    %15 = arith.mulf %13, %14 : vector<8x2048xf32>
    %16 = math.exp %15 : vector<8x2048xf32>
    %c0_12 = arith.constant 0 : index
    %c0_13 = arith.constant 0 : index
    %17 = vector.load %arg6[%c0_12, %c0_13] : memref<2048x64xf32, #tpu.memory_space<vmem>>, vector<2048x64xf32>
    %cst_14 = arith.constant dense<0.000000e+00> : vector<8x64xf32>
    %18 = tpu.matmul %16, %17, %cst_14 {dimension_numbers = #tpu.dot_dimension_numbers<[1], [0], [0], [1], [0, 0, 1, 1], [], []>} : vector<8x2048xf32>, vector<2048x64xf32>, vector<8x64xf32> -> vector<8x64xf32>
    %c0_15 = arith.constant 0 : index
    %c0_16 = arith.constant 0 : index
    %19 = vector.load %arg7[%c0_15, %c0_16] : memref<1x64xf32, #tpu.memory_space<vmem>>, vector<1x64xf32>
    %20 = vector.broadcast %19 : vector<1x64xf32> to vector<8x64xf32>
    %21 = arith.addf %18, %20 : vector<8x64xf32>
    %c0_17 = arith.constant 0 : index
    %c0_18 = arith.constant 0 : index
    %22 = vector.load %arg2[%c0_17, %c0_18] : memref<64x2048xf32, #tpu.memory_space<vmem>>, vector<64x2048xf32>
    %cst_19 = arith.constant dense<0.000000e+00> : vector<8x2048xf32>
    %23 = tpu.matmul %21, %22, %cst_19 {dimension_numbers = #tpu.dot_dimension_numbers<[1], [0], [0], [1], [0, 0, 1, 1], [], []>} : vector<8x64xf32>, vector<64x2048xf32>, vector<8x2048xf32> -> vector<8x2048xf32>
    %c0_20 = arith.constant 0 : index
    %c0_21 = arith.constant 0 : index
    %24 = vector.load %arg8[%c0_20, %c0_21] : memref<1x2048xf32, #tpu.memory_space<vmem>>, vector<1x2048xf32>
    %25 = vector.broadcast %24 : vector<1x2048xf32> to vector<8x2048xf32>
    %26 = arith.subf %23, %25 : vector<8x2048xf32>
    %27 = math.absf %26 : vector<8x2048xf32>
    %cst_22 = arith.constant 0.000000e+00 : f32
    %28 = vector.broadcast %cst_22 : f32 to vector<8x2048xf32>
    %29 = arith.subf %28, %27 : vector<8x2048xf32>
    %cst_23 = arith.constant 1.000000e+00 : f32
    %30 = vector.broadcast %cst_23 : f32 to vector<8x2048xf32>
    %31 = arith.mulf %29, %30 : vector<8x2048xf32>
    %32 = math.exp %31 : vector<8x2048xf32>
    %c0_24 = arith.constant 0 : index
    %c0_25 = arith.constant 0 : index
    %33 = vector.load %arg9[%c0_24, %c0_25] : memref<2048x128xf32, #tpu.memory_space<vmem>>, vector<2048x128xf32>
    %cst_26 = arith.constant dense<0.000000e+00> : vector<8x128xf32>
    %34 = tpu.matmul %32, %33, %cst_26 {dimension_numbers = #tpu.dot_dimension_numbers<[1], [0], [0], [1], [0, 0, 1, 1], [], []>} : vector<8x2048xf32>, vector<2048x128xf32>, vector<8x128xf32> -> vector<8x128xf32>
    %c0_27 = arith.constant 0 : index
    %c0_28 = arith.constant 0 : index
    %35 = vector.load %arg10[%c0_27, %c0_28] : memref<1x128xf32, #tpu.memory_space<vmem>>, vector<1x128xf32>
    %36 = vector.broadcast %35 : vector<1x128xf32> to vector<8x128xf32>
    %37 = arith.addf %34, %36 : vector<8x128xf32>
    %cst_29 = arith.constant dense<0xFF800000> : vector<8xf32>
    %38 = vector.multi_reduction <maximumf>, %37, %cst_29 [1] : vector<8x128xf32> to vector<8xf32>
    %39 = vector.shape_cast %38 : vector<8xf32> to vector<8x1xf32>
    %40 = vector.broadcast %39 : vector<8x1xf32> to vector<8x128xf32>
    %41 = arith.subf %37, %40 : vector<8x128xf32>
    %42 = math.exp %41 : vector<8x128xf32>
    %cst_30 = arith.constant dense<0.000000e+00> : vector<8xf32>
    %43 = vector.multi_reduction <add>, %42, %cst_30 [1] : vector<8x128xf32> to vector<8xf32>
    %44 = vector.shape_cast %43 : vector<8xf32> to vector<8x1xf32>
    %45 = math.log %44 : vector<8x1xf32>
    %46 = arith.addf %45, %39 : vector<8x1xf32>
    %47 = vector.broadcast %46 : vector<8x1xf32> to vector<8x128xf32>
    %48 = arith.subf %37, %47 : vector<8x128xf32>
    %c0_31 = arith.constant 0 : index
    %c0_32 = arith.constant 0 : index
    %49 = vector.load %arg11[%c0_31, %c0_32] : memref<8x128xf32, #tpu.memory_space<vmem>>, vector<8x128xf32>
    tpu.vector_store %arg11[%c0_31, %c0_32], %48 {strides = array<i32>} : memref<8x128xf32, #tpu.memory_space<vmem>>, vector<8x128xf32>,
    return
  }
  func.func @transform_0(%arg0: i32) -> (i32, i32) {
    %c0_i32 = arith.constant 0 : i32
    %c0_i32_0 = arith.constant 0 : i32
    return %arg0, %c0_i32 : i32, i32
  }
  func.func @transform_1(%arg0: i32) -> (i32, i32) {
    %c0_i32 = arith.constant 0 : i32
    %c0_i32_0 = arith.constant 0 : i32
    %c0_i32_1 = arith.constant 0 : i32
    return %c0_i32, %c0_i32_0 : i32, i32
  }
  func.func @transform_2(%arg0: i32) -> (i32, i32) {
    %c0_i32 = arith.constant 0 : i32
    %c0_i32_0 = arith.constant 0 : i32
    %c0_i32_1 = arith.constant 0 : i32
    return %c0_i32, %c0_i32_0 : i32, i32
  }
  func.func @transform_3(%arg0: i32) -> (i32, i32) {
    %c0_i32 = arith.constant 0 : i32
    %c0_i32_0 = arith.constant 0 : i32
    %c0_i32_1 = arith.constant 0 : i32
    return %c0_i32, %c0_i32_0 : i32, i32
  }
  func.func @transform_4(%arg0: i32) -> (i32, i32) {
    %c0_i32 = arith.constant 0 : i32
    %c0_i32_0 = arith.constant 0 : i32
    %c0_i32_1 = arith.constant 0 : i32
    return %c0_i32, %c0_i32_0 : i32, i32
  }
  func.func @transform_5(%arg0: i32) -> (i32, i32) {
    %c0_i32 = arith.constant 0 : i32
    %c0_i32_0 = arith.constant 0 : i32
    %c0_i32_1 = arith.constant 0 : i32
    return %c0_i32, %c0_i32_0 : i32, i32
  }
  func.func @transform_6(%arg0: i32) -> (i32, i32) {
    %c0_i32 = arith.constant 0 : i32
    %c0_i32_0 = arith.constant 0 : i32
    %c0_i32_1 = arith.constant 0 : i32
    return %c0_i32, %c0_i32_0 : i32, i32
  }
  func.func @transform_7(%arg0: i32) -> (i32, i32) {
    %c0_i32 = arith.constant 0 : i32
    %c0_i32_0 = arith.constant 0 : i32
    %c0_i32_1 = arith.constant 0 : i32
    return %c0_i32, %c0_i32_0 : i32, i32
  }
  func.func @transform_8(%arg0: i32) -> (i32, i32) {
    %c0_i32 = arith.constant 0 : i32
    %c0_i32_0 = arith.constant 0 : i32
    %c0_i32_1 = arith.constant 0 : i32
    return %c0_i32, %c0_i32_0 : i32, i32
  }
  func.func @transform_9(%arg0: i32) -> (i32, i32) {
    %c0_i32 = arith.constant 0 : i32
    %c0_i32_0 = arith.constant 0 : i32
    %c0_i32_1 = arith.constant 0 : i32
    return %c0_i32, %c0_i32_0 : i32, i32
  }
  func.func @transform_10(%arg0: i32) -> (i32, i32) {
    %c0_i32 = arith.constant 0 : i32
    %c0_i32_0 = arith.constant 0 : i32
    return %arg0, %c0_i32 : i32, i32
  }
}

</mosaic_0001>

<bundles_post_ra>
// kernel: damgp_mnist_forward.1
= control target key start
LH: loop header
LB: loop body
LE: loop exit
PB: predicated region body
PF: predicated region fallthrough
CT: control target
= control target key end

     0   :  { %vm463_vm0 = vcmask 523264   ;;  %s5648_s2 = inlined_call_operand.vmem [shape: f32[1024,64], index: 2, kind: input, shape index: {}]   ;;  %s5649_s0 = inlined_call_operand.vmem [shape: f32[8,1024], index: 0, kind: input, shape index: {}]   ;;  %s5650_s3 = inlined_call_operand.vmem [shape: f32[1,64], index: 3, kind: input, shape index: {}]   ;;  %s5651_s1 = inlined_call_operand.vmem [shape: f32[64,2048], index: 1, kind: input, shape index: {}]   ;;  %s5652_s5 = inlined_call_operand.vmem [shape: f32[2048,64], index: 5, kind: input, shape index: {}]   ;;  %s5653_s6 = inlined_call_operand.vmem [shape: f32[1,64], index: 6, kind: input, shape index: {}]   ;;  %s5654_s4 = inlined_call_operand.vmem [shape: f32[1,2048], index: 4, kind: input, shape index: {}]   ;;  %s5655_s8 = inlined_call_operand.vmem [shape: f32[2048,128], index: 8, kind: input, shape index: {}]   ;;  %s5656_s9 = inlined_call_operand.vmem [shape: f32[1,128], index: 9, kind: input, shape index: {}]   ;;  %s5657_s7 = inlined_call_operand.vmem [shape: f32[1,2048], index: 7, kind: input, shape index: {}]   ;;  %s5658_s10 = inlined_call_operand.vmem [shape: f32[8,128], index: 10, kind: output, shape index: {}]  }
   0x1   :  { %v90_v0 = vld [vmem:[%s5648_s2 + $0x178] sm:$0xff]  ;;  %v89_v2 = vld [vmem:[%s5648_s2 + $0x170] sm:$0xff]  ;;  %v88_v6 = vld [vmem:[%s5648_s2 + $0x168] sm:$0xff] }
   0x2   :  { %v58_v1 = vld [vmem:[%s5648_s2 + $0x78] sm:$0xff]  ;;  %215 = vmatpush.msra.mxu2 %v90_v0  ;;  %v57_v4 = vld [vmem:[%s5648_s2 + $0x70] sm:$0xff]  ;;  %v56_v8 = vld [vmem:[%s5648_s2 + $0x68] sm:$0xff] }
   0x3   :  { %175 = vmatpush.msra.mxu0 %v58_v1  ;;  %v106_v3 = vld [vmem:[%s5648_s2 + $0x1f8] sm:$0xff]  ;;  %v105_v7 = vld [vmem:[%s5648_s2 + $0x1f0] sm:$0xff]  ;;  %v104_v10 = vld [vmem:[%s5648_s2 + $0x1e8] sm:$0xff] }
   0x4   :  { %v74_v5 = vld [vmem:[%s5648_s2 + $0xf8] sm:$0xff]  ;;  %235 = vmatpush.msra.mxu3 %v106_v3  ;;  %216 = vmatpush.msra.mxu2 %v89_v2  ;;  %v73_v9 = vld [vmem:[%s5648_s2 + $0xf0] sm:$0xff]  ;;  %v87_v11 = vld [vmem:[%s5648_s2 + $0x160] sm:$0xff] }
   0x5   :  { %195 = vmatpush.msra.mxu1 %v74_v5  ;;  %176 = vmatpush.msra.mxu0 %v57_v4  ;;  %v55_v12 = vld [vmem:[%s5648_s2 + $0x60] sm:$0xff]  ;;  %v72_v13 = vld [vmem:[%s5648_s2 + $0xe8] sm:$0xff]  ;;  %v86_v16 = vld [vmem:[%s5648_s2 + $0x158] sm:$0xff] }
   0x6   :  { %236 = vmatpush.msra.mxu3 %v105_v7  ;;  %217 = vmatpush.msra.mxu2 %v88_v6  ;;  %v103_v14 = vld [vmem:[%s5648_s2 + $0x1e0] sm:$0xff]  ;;  %v54_v17 = vld [vmem:[%s5648_s2 + $0x58] sm:$0xff]  ;;  %v85_v20 = vld [vmem:[%s5648_s2 + $0x150] sm:$0xff] }
   0x7   :  { %196 = vmatpush.msra.mxu1 %v73_v9  ;;  %177 = vmatpush.msra.mxu0 %v56_v8  ;;  %v71_v15 = vld [vmem:[%s5648_s2 + $0xe0] sm:$0xff]  ;;  %v102_v18 = vld [vmem:[%s5648_s2 + $0x1d8] sm:$0xff]  ;;  %v53_v21 = vld [vmem:[%s5648_s2 + $0x50] sm:$0xff] }
   0x8   :  { %237 = vmatpush.msra.mxu3 %v104_v10  ;;  %218 = vmatpush.msra.mxu2 %v87_v11  ;;  %v70_v19 = vld [vmem:[%s5648_s2 + $0xd8] sm:$0xff]  ;;  %v101_v22 = vld [vmem:[%s5648_s2 + $0x1d0] sm:$0xff]  ;;  %v84_v24 = vld [vmem:[%s5648_s2 + $0x148] sm:$0xff] }
   0x9   :  { %197 = vmatpush.msra.mxu1 %v72_v13  ;;  %178 = vmatpush.msra.mxu0 %v55_v12  ;;  %v69_v23 = vld [vmem:[%s5648_s2 + $0xd0] sm:$0xff]  ;;  %v52_v25 = vld [vmem:[%s5648_s2 + $0x48] sm:$0xff]  ;;  %v83_v28 = vld [vmem:[%s5648_s2 + $0x140] sm:$0xff] }
   0xa   :  { %238 = vmatpush.msra.mxu3 %v103_v14  ;;  %219 = vmatpush.msra.mxu2 %v86_v16  ;;  %v100_v26 = vld [vmem:[%s5648_s2 + $0x1c8] sm:$0xff]  ;;  %v51_v29 = vld [vmem:[%s5648_s2 + $0x40] sm:$0xff]  ;;  %v82_v32 = vld [vmem:[%s5648_s2 + $0x138] sm:$0xff] }
   0xb   :  { %198 = vmatpush.msra.mxu1 %v71_v15  ;;  %179 = vmatpush.msra.mxu0 %v54_v17  ;;  %v68_v27 = vld [vmem:[%s5648_s2 + $0xc8] sm:$0xff]  ;;  %v99_v30 = vld [vmem:[%s5648_s2 + $0x1c0] sm:$0xff]  ;;  %v50_v33 = vld [vmem:[%s5648_s2 + $0x38] sm:$0xff] }
   0xc   :  { %239 = vmatpush.msra.mxu3 %v102_v18  ;;  %220 = vmatpush.msra.mxu2 %v85_v20  ;;  %v67_v31 = vld [vmem:[%s5648_s2 + $0xc0] sm:$0xff]  ;;  %v98_v34 = vld [vmem:[%s5648_s2 + $0x1b8] sm:$0xff]  ;;  %v81_v36 = vld [vmem:[%s5648_s2 + $0x130] sm:$0xff] }
   0xd   :  { %199 = vmatpush.msra.mxu1 %v70_v19  ;;  %180 = vmatpush.msra.mxu0 %v53_v21  ;;  %v66_v35 = vld [vmem:[%s5648_s2 + $0xb8] sm:$0xff]  ;;  %v49_v37 = vld [vmem:[%s5648_s2 + $0x30] sm:$0xff]  ;;  %v80_v40 = vld [vmem:[%s5648_s2 + $0x128] sm:$0xff] }
   0xe   :  { %240 = vmatpush.msra.mxu3 %v101_v22  ;;  %221 = vmatpush.msra.mxu2 %v84_v24  ;;  %v97_v38 = vld [vmem:[%s5648_s2 + $0x1b0] sm:$0xff]  ;;  %v48_v41 = vld [vmem:[%s5648_s2 + $0x28] sm:$0xff]  ;;  %v79_v44 = vld [vmem:[%s5648_s2 + $0x120] sm:$0xff] }
   0xf   :  { %200 = vmatpush.msra.mxu1 %v69_v23  ;;  %181 = vmatpush.msra.mxu0 %v52_v25  ;;  %v65_v39 = vld [vmem:[%s5648_s2 + $0xb0] sm:$0xff]  ;;  %v96_v42 = vld [vmem:[%s5648_s2 + $0x1a8] sm:$0xff]  ;;  %v47_v45 = vld [vmem:[%s5648_s2 + $0x20] sm:$0xff] }
  0x10   :  { %241 = vmatpush.msra.mxu3 %v100_v26  ;;  %222 = vmatpush.msra.mxu2 %v83_v28  ;;  %v64_v43 = vld [vmem:[%s5648_s2 + $0xa8] sm:$0xff]  ;;  %v95_v46 = vld [vmem:[%s5648_s2 + $0x1a0] sm:$0xff]  ;;  %v78_v48 = vld [vmem:[%s5648_s2 + $0x118] sm:$0xff] }
  0x11   :  { %201 = vmatpush.msra.mxu1 %v68_v27  ;;  %182 = vmatpush.msra.mxu0 %v51_v29  ;;  %v63_v47 = vld [vmem:[%s5648_s2 + $0xa0] sm:$0xff]  ;;  %v46_v49 = vld [vmem:[%s5648_s2 + $0x18] sm:$0xff]  ;;  %v77_v52 = vld [vmem:[%s5648_s2 + $0x110] sm:$0xff] }
  0x12   :  { %242 = vmatpush.msra.mxu3 %v99_v30  ;;  %223 = vmatpush.msra.mxu2 %v82_v32  ;;  %v94_v50 = vld [vmem:[%s5648_s2 + $0x198] sm:$0xff]  ;;  %v45_v53 = vld [vmem:[%s5648_s2 + $0x10] sm:$0xff]  ;;  %v76_v56 = vld [vmem:[%s5648_s2 + $0x108] sm:$0xff] }
  0x13   :  { %202 = vmatpush.msra.mxu1 %v67_v31  ;;  %183 = vmatpush.msra.mxu0 %v50_v33  ;;  %v62_v51 = vld [vmem:[%s5648_s2 + $0x98] sm:$0xff]  ;;  %v93_v54 = vld [vmem:[%s5648_s2 + $0x190] sm:$0xff]  ;;  %v44_v57 = vld [vmem:[%s5648_s2 + $0x8] sm:$0xff] }
  0x14   :  { %243 = vmatpush.msra.mxu3 %v98_v34  ;;  %224 = vmatpush.msra.mxu2 %v81_v36  ;;  %v61_v55 = vld [vmem:[%s5648_s2 + $0x90] sm:$0xff]  ;;  %v92_v58 = vld [vmem:[%s5648_s2 + $0x188] sm:$0xff]  ;;  %v75_v60 = vld [vmem:[%s5648_s2 + $0x100] sm:$0xff] }
  0x15   :  { %203 = vmatpush.msra.mxu1 %v66_v35  ;;  %184 = vmatpush.msra.mxu0 %v49_v37  ;;  %v60_v59 = vld [vmem:[%s5648_s2 + $0x88] sm:$0xff]  ;;  %v43_v61 = vld [vmem:[%s5648_s2] sm:$0xff]  ;;  %v154_v62 = vld [vmem:[%s5648_s2 + $0x378] sm:$0xff] }
  0x16   :  { %244 = vmatpush.msra.mxu3 %v97_v38  ;;  %225 = vmatpush.msra.mxu2 %v80_v40  ;;  %v91_v63 = vld [vmem:[%s5648_s2 + $0x180] sm:$0xff]  ;;  %v122_v0 = vld [vmem:[%s5648_s2 + $0x278] sm:$0xff]  ;;  %v153_v2 = vld [vmem:[%s5648_s2 + $0x370] sm:$0xff] }
  0x17   :  { %204 = vmatpush.msra.mxu1 %v65_v39  ;;  %185 = vmatpush.msra.mxu0 %v48_v41  ;;  %v170_v1 = vld [vmem:[%s5648_s2 + $0x3f8] sm:$0xff]  ;;  %v59_v3 = vld [vmem:[%s5648_s2 + $0x80] sm:$0xff]  ;;  %v121_v4 = vld [vmem:[%s5648_s2 + $0x270] sm:$0xff] }
  0x18   :  { %245 = vmatpush.msra.mxu3 %v96_v42  ;;  %226 = vmatpush.msra.mxu2 %v79_v44  ;;  %v138_v5 = vld [vmem:[%s5648_s2 + $0x2f8] sm:$0xff]  ;;  %v152_v6 = vld [vmem:[%s5648_s2 + $0x368] sm:$0xff]  ;;  %v169_v7 = vld [vmem:[%s5648_s2 + $0x3f0] sm:$0xff] }
  0x19   :  { %205 = vmatpush.msra.mxu1 %v64_v43  ;;  %186 = vmatpush.msra.mxu0 %v47_v45  ;;  %v120_v8 = vld [vmem:[%s5648_s2 + $0x268] sm:$0xff]  ;;  %v137_v9 = vld [vmem:[%s5648_s2 + $0x2f0] sm:$0xff]  ;;  %v151_v10 = vld [vmem:[%s5648_s2 + $0x360] sm:$0xff] }
  0x1a   :  { %246 = vmatpush.msra.mxu3 %v95_v46  ;;  %227 = vmatpush.msra.mxu2 %v78_v48  ;;  %v168_v11 = vld [vmem:[%s5648_s2 + $0x3e8] sm:$0xff]  ;;  %v119_v12 = vld [vmem:[%s5648_s2 + $0x260] sm:$0xff]  ;;  %v150_v14 = vld [vmem:[%s5648_s2 + $0x358] sm:$0xff] }
  0x1b   :  { %206 = vmatpush.msra.mxu1 %v63_v47  ;;  %187 = vmatpush.msra.mxu0 %v46_v49  ;;  %v136_v13 = vld [vmem:[%s5648_s2 + $0x2e8] sm:$0xff]  ;;  %v167_v15 = vld [vmem:[%s5648_s2 + $0x3e0] sm:$0xff]  ;;  %v118_v16 = vld [vmem:[%s5648_s2 + $0x258] sm:$0xff] }
  0x1c   :  { %247 = vmatpush.msra.mxu3 %v94_v50  ;;  %228 = vmatpush.msra.mxu2 %v77_v52  ;;  %v135_v17 = vld [vmem:[%s5648_s2 + $0x2e0] sm:$0xff]  ;;  %v149_v18 = vld [vmem:[%s5648_s2 + $0x350] sm:$0xff]  ;;  %v166_v19 = vld [vmem:[%s5648_s2 + $0x3d8] sm:$0xff] }
  0x1d   :  { %207 = vmatpush.msra.mxu1 %v62_v51  ;;  %188 = vmatpush.msra.mxu0 %v45_v53  ;;  %v117_v20 = vld [vmem:[%s5648_s2 + $0x250] sm:$0xff]  ;;  %v134_v21 = vld [vmem:[%s5648_s2 + $0x2d8] sm:$0xff]  ;;  %v148_v22 = vld [vmem:[%s5648_s2 + $0x348] sm:$0xff] }
  0x1e   :  { %248 = vmatpush.msra.mxu3 %v93_v54  ;;  %229 = vmatpush.msra.mxu2 %v76_v56  ;;  %v165_v23 = vld [vmem:[%s5648_s2 + $0x3d0] sm:$0xff]  ;;  %v116_v24 = vld [vmem:[%s5648_s2 + $0x248] sm:$0xff]  ;;  %v147_v26 = vld [vmem:[%s5648_s2 + $0x340] sm:$0xff] }
  0x1f   :  { %208 = vmatpush.msra.mxu1 %v61_v55  ;;  %189 = vmatpush.msra.mxu0 %v44_v57  ;;  %v133_v25 = vld [vmem:[%s5648_s2 + $0x2d0] sm:$0xff]  ;;  %v164_v27 = vld [vmem:[%s5648_s2 + $0x3c8] sm:$0xff]  ;;  %v115_v28 = vld [vmem:[%s5648_s2 + $0x240] sm:$0xff] }
  0x20   :  { %249 = vmatpush.msra.mxu3 %v92_v58  ;;  %230 = vmatpush.msra.mxu2 %v75_v60  ;;  %v132_v29 = vld [vmem:[%s5648_s2 + $0x2c8] sm:$0xff]  ;;  %v146_v30 = vld [vmem:[%s5648_s2 + $0x338] sm:$0xff]  ;;  %v163_v31 = vld [vmem:[%s5648_s2 + $0x3c0] sm:$0xff] }
  0x21   :  { %209 = vmatpush.msra.mxu1 %v60_v59  ;;  %190 = vmatpush.msra.mxu0 %v43_v61  ;;  %v114_v32 = vld [vmem:[%s5648_s2 + $0x238] sm:$0xff]  ;;  %v131_v33 = vld [vmem:[%s5648_s2 + $0x2c0] sm:$0xff]  ;;  %v145_v34 = vld [vmem:[%s5648_s2 + $0x330] sm:$0xff] }
  0x22   :  { %295 = vmatpush.msrb.mxu2 %v154_v62  ;;  %250 = vmatpush.msra.mxu3 %v91_v63  ;;  %v162_v35 = vld [vmem:[%s5648_s2 + $0x3b8] sm:$0xff]  ;;  %v113_v36 = vld [vmem:[%s5648_s2 + $0x230] sm:$0xff]  ;;  %v144_v38 = vld [vmem:[%s5648_s2 + $0x328] sm:$0xff] }
  0x23   :  { %255 = vmatpush.msrb.mxu0 %v122_v0  ;;  %210 = vmatpush.msra.mxu1 %v59_v3  ;;  %v130_v37 = vld [vmem:[%s5648_s2 + $0x2b8] sm:$0xff]  ;;  %v161_v39 = vld [vmem:[%s5648_s2 + $0x3b0] sm:$0xff]  ;;  %v112_v40 = vld [vmem:[%s5648_s2 + $0x228] sm:$0xff] }
  0x24   :  { %315 = vmatpush.msrb.mxu3 %v170_v1  ;;  %296 = vmatpush.msrb.mxu2 %v153_v2  ;;  %v129_v41 = vld [vmem:[%s5648_s2 + $0x2b0] sm:$0xff]  ;;  %v143_v42 = vld [vmem:[%s5648_s2 + $0x320] sm:$0xff]  ;;  %v160_v43 = vld [vmem:[%s5648_s2 + $0x3a8] sm:$0xff] }
  0x25   :  { %256 = vmatpush.msrb.mxu0 %v121_v4  ;;  %275 = vmatpush.msrb.mxu1 %v138_v5  ;;  %v37_v44 = vld [vmem:[%s5649_s0 + $0x10] sm:$0xff]  ;;  %v111_v45 = vld [vmem:[%s5648_s2 + $0x220] sm:$0xff]  ;;  %v128_v46 = vld [vmem:[%s5648_s2 + $0x2a8] sm:$0xff] }
  0x26   :  { %297 = vmatpush.msrb.mxu2 %v152_v6  ;;  %316 = vmatpush.msrb.mxu3 %v169_v7  ;;  %v142_v47 = vld [vmem:[%s5648_s2 + $0x318] sm:$0xff]  ;;  %v159_v48 = vld [vmem:[%s5648_s2 + $0x3a0] sm:$0xff]  ;;  %v141_v53 = vld [vmem:[%s5648_s2 + $0x310] sm:$0xff] }
  0x27   :  { %257 = vmatpush.msrb.mxu0 %v120_v8  ;;  %276 = vmatpush.msrb.mxu1 %v137_v9  ;;  %v35_v49 = vld [vmem:[%s5649_s0] sm:$0xff]  ;;  %v38_v50 = vld [vmem:[%s5649_s0 + $0x18] sm:$0xff]  ;;  %v36_v55 = vld [vmem:[%s5649_s0 + $0x8] sm:$0xff] }
  0x28   :  { %298 = vmatpush.msrb.mxu2 %v151_v10  ;;  %317 = vmatpush.msrb.mxu3 %v168_v11  ;;  %v110_v51 = vld [vmem:[%s5648_s2 + $0x218] sm:$0xff]  ;;  %v127_v52 = vld [vmem:[%s5648_s2 + $0x2a0] sm:$0xff]  ;;  %v109_v56 = vld [vmem:[%s5648_s2 + $0x210] sm:$0xff] }
  0x29   :  { %258 = vmatpush.msrb.mxu0 %v119_v12  ;;  %277 = vmatpush.msrb.mxu1 %v136_v13  ;;  %v158_v54 = vld [vmem:[%s5648_s2 + $0x398] sm:$0xff]  ;;  %v140_v58 = vld [vmem:[%s5648_s2 + $0x308] sm:$0xff]  ;;  %v157_v59 = vld [vmem:[%s5648_s2 + $0x390] sm:$0xff] }
  0x2a   :  { %299 = vmatpush.msrb.mxu2 %v150_v14  ;;  %318 = vmatpush.msrb.mxu3 %v167_v15  ;;  %v126_v57 = vld [vmem:[%s5648_s2 + $0x298] sm:$0xff]  ;;  %v108_v60 = vld [vmem:[%s5648_s2 + $0x208] sm:$0xff]  ;;  %v125_v61 = vld [vmem:[%s5648_s2 + $0x290] sm:$0xff] }
  0x2b   :  { %259 = vmatpush.msrb.mxu0 %v118_v16  ;;  %278 = vmatpush.msrb.mxu1 %v135_v17  ;;  %v139_v62 = vld [vmem:[%s5648_s2 + $0x300] sm:$0xff]  ;;  %v156_v63 = vld [vmem:[%s5648_s2 + $0x388] sm:$0xff]  ;;  %v41_v0 = vld [vmem:[%s5649_s0 + $0x30] sm:$0xff] }
  0x2c   :  { %300 = vmatpush.msrb.mxu2 %v149_v18  ;;  %319 = vmatpush.msrb.mxu3 %v166_v19  ;;  %v107_v1 = vld [vmem:[%s5648_s2 + $0x200] sm:$0xff]  ;;  %v124_v2 = vld [vmem:[%s5648_s2 + $0x288] sm:$0xff]  ;;  %v42_v5 = vld [vmem:[%s5649_s0 + $0x38] sm:$0xff] }
  0x2d   :  { %260 = vmatpush.msrb.mxu0 %v117_v20  ;;  %279 = vmatpush.msrb.mxu1 %v134_v21  ;;  %v155_v3 = vld [vmem:[%s5648_s2 + $0x380] sm:$0xff]  ;;  %v40_v8 = vld [vmem:[%s5649_s0 + $0x28] sm:$0xff]  ;;  %v449_v9 = vld [vmem:[%s5651_s1 + $0x390] sm:$0xff] }
  0x2e   :  { %301 = vmatpush.msrb.mxu2 %v148_v22  ;;  %320 = vmatpush.msrb.mxu3 %v165_v23  ;;  %v39_v4 = vld [vmem:[%s5649_s0 + $0x20] sm:$0xff]  ;;  %v448_v10 = vld [vmem:[%s5651_s1 + $0x388] sm:$0xff]  ;;  %v450_v11 = vld [vmem:[%s5651_s1 + $0x398] sm:$0xff] }
  0x2f   :  { %261 = vmatpush.msrb.mxu0 %v116_v24  ;;  %280 = vmatpush.msrb.mxu1 %v133_v25  ;;  %v123_v6 = vld [vmem:[%s5648_s2 + $0x280] sm:$0xff]  ;;  %v433_v13 = vld [vmem:[%s5651_s1 + $0x310] sm:$0xff]  ;;  %v432_v14 = vld [vmem:[%s5651_s1 + $0x308] sm:$0xff] }
  0x30   :  { %302 = vmatpush.msrb.mxu2 %v147_v26  ;;  %321 = vmatpush.msrb.mxu3 %v164_v27  ;;  %v447_v7 = vld [vmem:[%s5651_s1 + $0x380] sm:$0xff]  ;;  %v434_v15 = vld [vmem:[%s5651_s1 + $0x318] sm:$0xff]  ;;  %v417_v17 = vld [vmem:[%s5651_s1 + $0x290] sm:$0xff] }
  0x31   :  { %262 = vmatpush.msrb.mxu0 %v115_v28  ;;  %281 = vmatpush.msrb.mxu1 %v132_v29  ;;  %v431_v12 = vld [vmem:[%s5651_s1 + $0x300] sm:$0xff]  ;;  %v416_v18 = vld [vmem:[%s5651_s1 + $0x288] sm:$0xff]  ;;  %v418_v19 = vld [vmem:[%s5651_s1 + $0x298] sm:$0xff] }
  0x32   :  { %303 = vmatpush.msrb.mxu2 %v146_v30  ;;  %322 = vmatpush.msrb.mxu3 %v163_v31  ;;  %v415_v16 = vld [vmem:[%s5651_s1 + $0x280] sm:$0xff]  ;;  %v401_v21 = vld [vmem:[%s5651_s1 + $0x210] sm:$0xff]  ;;  %v400_v22 = vld [vmem:[%s5651_s1 + $0x208] sm:$0xff] }
  0x33   :  { %263 = vmatpush.msrb.mxu0 %v114_v32  ;;  %282 = vmatpush.msrb.mxu1 %v131_v33  ;;  %v399_v20 = vld [vmem:[%s5651_s1 + $0x200] sm:$0xff]  ;;  %v402_v23 = vld [vmem:[%s5651_s1 + $0x218] sm:$0xff]  ;;  %v385_v25 = vld [vmem:[%s5651_s1 + $0x190] sm:$0xff] }
  0x34   :  { %304 = vmatpush.msrb.mxu2 %v145_v34  ;;  %323 = vmatpush.msrb.mxu3 %v162_v35  ;;  %v383_v24 = vld [vmem:[%s5651_s1 + $0x180] sm:$0xff]  ;;  %v384_v26 = vld [vmem:[%s5651_s1 + $0x188] sm:$0xff]  ;;  %v386_v27 = vld [vmem:[%s5651_s1 + $0x198] sm:$0xff] }
  0x35   :  { %264 = vmatpush.msrb.mxu0 %v113_v36  ;;  %283 = vmatpush.msrb.mxu1 %v130_v37  ;;  %v367_v28 = vld [vmem:[%s5651_s1 + $0x100] sm:$0xff]  ;;  %v369_v29 = vld [vmem:[%s5651_s1 + $0x110] sm:$0xff]  ;;  %v368_v30 = vld [vmem:[%s5651_s1 + $0x108] sm:$0xff] }
  0x36   :  { %305 = vmatpush.msrb.mxu2 %v144_v38  ;;  %324 = vmatpush.msrb.mxu3 %v161_v39  ;;  %v370_v31 = vld [vmem:[%s5651_s1 + $0x118] sm:$0xff]  ;;  %v351_v32 = vld [vmem:[%s5651_s1 + $0x80] sm:$0xff]  ;;  %v353_v33 = vld [vmem:[%s5651_s1 + $0x90] sm:$0xff] }
  0x37   :  { %265 = vmatpush.msrb.mxu0 %v112_v40  ;;  %284 = vmatpush.msrb.mxu1 %v129_v41  ;;  %v352_v34 = vld [vmem:[%s5651_s1 + $0x88] sm:$0xff]  ;;  %v354_v35 = vld [vmem:[%s5651_s1 + $0x98] sm:$0xff]  ;;  %v335_v36 = vld [vmem:[%s5651_s1] sm:$0xff] }
  0x38   :  { %306 = vmatpush.msrb.mxu2 %v143_v42  ;;  %325 = vmatpush.msrb.mxu3 %v160_v43  ;;  %v336_v37 = vld [vmem:[%s5651_s1 + $0x8] sm:$0xff]  ;;  %v337_v38 = vld [vmem:[%s5651_s1 + $0x10] sm:$0xff]  ;;  %v338_v39 = vld [vmem:[%s5651_s1 + $0x18] sm:$0xff] }
  0x39   :  { %231 = vmatmul.f32.vlgmr.msra.gmra.mxu2 %v37_v44  ;;  %266 = vmatpush.msrb.mxu0 %v111_v45  ;;  %v451_v40 = vld [vmem:[%s5651_s1 + $0x3a0] sm:$0xff]  ;;  %v452_v41 = vld [vmem:[%s5651_s1 + $0x3a8] sm:$0xff]  ;;  %v453_v42 = vld [vmem:[%s5651_s1 + $0x3b0] sm:$0xff] }
  0x3a   :  { %285 = vmatpush.msrb.mxu1 %v128_v46  ;;  %307 = vmatpush.msrb.mxu2 %v142_v47  ;;  %v454_v43 = vld [vmem:[%s5651_s1 + $0x3b8] sm:$0xff]  ;;  %v435_v44 = vld [vmem:[%s5651_s1 + $0x320] sm:$0xff]  ;;  %v436_v45 = vld [vmem:[%s5651_s1 + $0x328] sm:$0xff] }
  0x3b   :  { %326 = vmatpush.msrb.mxu3 %v159_v48  ;;  %191 = vmatmul.f32.vlgmr.msra.gmra.mxu0 %v35_v49  ;;  %v437_v46 = vld [vmem:[%s5651_s1 + $0x330] sm:$0xff]  ;;  %v438_v47 = vld [vmem:[%s5651_s1 + $0x338] sm:$0xff]  ;;  %v419_v48 = vld [vmem:[%s5651_s1 + $0x2a0] sm:$0xff] }
  0x3c   :  { %251 = vmatmul.f32.vlgmr.msra.gmra.mxu3 %v38_v50  ;;  %267 = vmatpush.msrb.mxu0 %v110_v51  ;;  %v420_v49 = vld [vmem:[%s5651_s1 + $0x2a8] sm:$0xff]  ;;  %v421_v50 = vld [vmem:[%s5651_s1 + $0x2b0] sm:$0xff]  ;;  %v422_v51 = vld [vmem:[%s5651_s1 + $0x2b8] sm:$0xff] }
  0x3d   :  { %286 = vmatpush.msrb.mxu1 %v127_v52  ;;  %308 = vmatpush.msrb.mxu2 %v141_v53  ;;  %v403_v52 = vld [vmem:[%s5651_s1 + $0x220] sm:$0xff]  ;;  %v404_v53 = vld [vmem:[%s5651_s1 + $0x228] sm:$0xff] }
  0x3e   :  { %327 = vmatpush.msrb.mxu3 %v158_v54  ;;  %211 = vmatmul.f32.vlgmr.msra.gmra.mxu1 %v36_v55  ;;  %v405_v54 = vld [vmem:[%s5651_s1 + $0x230] sm:$0xff]  ;;  %v406_v55 = vld [vmem:[%s5651_s1 + $0x238] sm:$0xff] }
  0x3f   :  { %268 = vmatpush.msrb.mxu0 %v109_v56  ;;  %287 = vmatpush.msrb.mxu1 %v126_v57  ;;  %v387_v56 = vld [vmem:[%s5651_s1 + $0x1a0] sm:$0xff]  ;;  %v388_v57 = vld [vmem:[%s5651_s1 + $0x1a8] sm:$0xff] }
  0x40   :  { %309 = vmatpush.msrb.mxu2 %v140_v58  ;;  %328 = vmatpush.msrb.mxu3 %v157_v59  ;;  %v389_v58 = vld [vmem:[%s5651_s1 + $0x1b0] sm:$0xff]  ;;  %v390_v59 = vld [vmem:[%s5651_s1 + $0x1b8] sm:$0xff] }
  0x41   :  { %269 = vmatpush.msrb.mxu0 %v108_v60  ;;  %288 = vmatpush.msrb.mxu1 %v125_v61  ;;  %v371_v60 = vld [vmem:[%s5651_s1 + $0x120] sm:$0xff]  ;;  %v372_v61 = vld [vmem:[%s5651_s1 + $0x128] sm:$0xff] }
  0x42   :  { %310 = vmatpush.msrb.mxu2 %v139_v62  ;;  %329 = vmatpush.msrb.mxu3 %v156_v63  ;;  %v373_v62 = vld [vmem:[%s5651_s1 + $0x130] sm:$0xff]  ;;  %v374_v63 = vld [vmem:[%s5651_s1 + $0x138] sm:$0xff] }
  0x43   :  { %311 = vmatmul.f32.vlgmr.msrb.gmra.mxu2 %v41_v0  ;;  %270 = vmatpush.msrb.mxu0 %v107_v1  ;;  %v355_v0 = vld [vmem:[%s5651_s1 + $0xa0] sm:$0xff]  ;;  %v356_v1 = vld [vmem:[%s5651_s1 + $0xa8] sm:$0xff] }
  0x44   :  { %289 = vmatpush.msrb.mxu1 %v124_v2  ;;  %330 = vmatpush.msrb.mxu3 %v155_v3  ;;  %v357_v2 = vld [vmem:[%s5651_s1 + $0xb0] sm:$0xff]  ;;  %v358_v3 = vld [vmem:[%s5651_s1 + $0xb8] sm:$0xff] }
  0x45   :  { %271 = vmatmul.f32.vlgmr.msrb.gmra.mxu0 %v39_v4  ;;  %331 = vmatmul.f32.vlgmr.msrb.gmra.mxu3 %v42_v5  ;;  %v339_v4 = vld [vmem:[%s5651_s1 + $0x20] sm:$0xff]  ;;  %v340_v5 = vld [vmem:[%s5651_s1 + $0x28] sm:$0xff] }
  0x46   :  { %290 = vmatpush.msrb.mxu1 %v123_v6  ;;  %475 = vmatpush.msra.mxu0 %v447_v7  ;;  %v341_v6 = vld [vmem:[%s5651_s1 + $0x30] sm:$0xff]  ;;  %v342_v7 = vld [vmem:[%s5651_s1 + $0x38] sm:$0xff] }
  0x47   :  { %291 = vmatmul.f32.vlgmr.msrb.gmra.mxu1 %v40_v8  ;;  %515 = vmatpush.msra.mxu2 %v449_v9  ;;  %v2550_v8 = vld [vmem:[%s5650_s3] ss:$0 sm:$0xff] }
  0x48   :  { %495 = vmatpush.msra.mxu1 %v448_v10  ;;  %535 = vmatpush.msra.mxu3 %v450_v11 }
  0x49   :  { %476 = vmatpush.msra.mxu0 %v431_v12  ;;  %516 = vmatpush.msra.mxu2 %v433_v13 }
  0x4a   :  { %496 = vmatpush.msra.mxu1 %v432_v14  ;;  %536 = vmatpush.msra.mxu3 %v434_v15 }
  0x4b   :  { %477 = vmatpush.msra.mxu0 %v415_v16  ;;  %517 = vmatpush.msra.mxu2 %v417_v17 }
  0x4c   :  { %497 = vmatpush.msra.mxu1 %v416_v18  ;;  %537 = vmatpush.msra.mxu3 %v418_v19 }
  0x4d   :  { %478 = vmatpush.msra.mxu0 %v399_v20  ;;  %518 = vmatpush.msra.mxu2 %v401_v21 }
  0x4e   :  { %498 = vmatpush.msra.mxu1 %v400_v22  ;;  %538 = vmatpush.msra.mxu3 %v402_v23 }
  0x4f   :  { %479 = vmatpush.msra.mxu0 %v383_v24  ;;  %519 = vmatpush.msra.mxu2 %v385_v25  ;;  %v455_v25 = vld [vmem:[%s5651_s1 + $0x3c0] sm:$0xff] }
  0x50   :  { %499 = vmatpush.msra.mxu1 %v384_v26  ;;  %539 = vmatpush.msra.mxu3 %v386_v27  ;;  %v456_v26 = vld [vmem:[%s5651_s1 + $0x3c8] sm:$0xff]  ;;  %v457_v27 = vld [vmem:[%s5651_s1 + $0x3d0] sm:$0xff] }
  0x51   :  { %480 = vmatpush.msra.mxu0 %v367_v28  ;;  %520 = vmatpush.msra.mxu2 %v369_v29  ;;  %v458_v28 = vld [vmem:[%s5651_s1 + $0x3d8] sm:$0xff]  ;;  %v439_v29 = vld [vmem:[%s5651_s1 + $0x340] sm:$0xff] }
  0x52   :  { %500 = vmatpush.msra.mxu1 %v368_v30  ;;  %540 = vmatpush.msra.mxu3 %v370_v31  ;;  %v440_v30 = vld [vmem:[%s5651_s1 + $0x348] sm:$0xff]  ;;  %v441_v31 = vld [vmem:[%s5651_s1 + $0x350] sm:$0xff] }
  0x53   :  { %481 = vmatpush.msra.mxu0 %v351_v32  ;;  %521 = vmatpush.msra.mxu2 %v353_v33  ;;  %v442_v32 = vld [vmem:[%s5651_s1 + $0x358] sm:$0xff]  ;;  %v423_v33 = vld [vmem:[%s5651_s1 + $0x2c0] sm:$0xff] }
  0x54   :  { %501 = vmatpush.msra.mxu1 %v352_v34  ;;  %541 = vmatpush.msra.mxu3 %v354_v35  ;;  %v424_v34 = vld [vmem:[%s5651_s1 + $0x2c8] sm:$0xff]  ;;  %v425_v35 = vld [vmem:[%s5651_s1 + $0x2d0] sm:$0xff] }
  0x55   :  { %482 = vmatpush.msra.mxu0 %v335_v36  ;;  %522 = vmatpush.msra.mxu2 %v337_v38  ;;  %v426_v36 = vld [vmem:[%s5651_s1 + $0x2d8] sm:$0xff]  ;;  %v408_v38 = vld [vmem:[%s5651_s1 + $0x248] sm:$0xff] }
  0x56   :  { %502 = vmatpush.msra.mxu1 %v336_v37  ;;  %542 = vmatpush.msra.mxu3 %v338_v39  ;;  %v407_v37 = vld [vmem:[%s5651_s1 + $0x240] sm:$0xff]  ;;  %v409_v39 = vld [vmem:[%s5651_s1 + $0x250] sm:$0xff] }
  0x57   :  { %555 = vmatpush.msrb.mxu0 %v451_v40  ;;  %595 = vmatpush.msrb.mxu2 %v453_v42  ;;  %v410_v40 = vld [vmem:[%s5651_s1 + $0x258] sm:$0xff]  ;;  %v392_v42 = vld [vmem:[%s5651_s1 + $0x1c8] sm:$0xff] }
  0x58   :  { %575 = vmatpush.msrb.mxu1 %v452_v41  ;;  %615 = vmatpush.msrb.mxu3 %v454_v43  ;;  %v391_v41 = vld [vmem:[%s5651_s1 + $0x1c0] sm:$0xff]  ;;  %v393_v43 = vld [vmem:[%s5651_s1 + $0x1d0] sm:$0xff] }
  0x59   :  { %556 = vmatpush.msrb.mxu0 %v435_v44  ;;  %596 = vmatpush.msrb.mxu2 %v437_v46  ;;  %v394_v44 = vld [vmem:[%s5651_s1 + $0x1d8] sm:$0xff]  ;;  %v376_v46 = vld [vmem:[%s5651_s1 + $0x148] sm:$0xff] }
  0x5a   :  { %576 = vmatpush.msrb.mxu1 %v436_v45  ;;  %616 = vmatpush.msrb.mxu3 %v438_v47  ;;  %v375_v45 = vld [vmem:[%s5651_s1 + $0x140] sm:$0xff]  ;;  %v377_v47 = vld [vmem:[%s5651_s1 + $0x150] sm:$0xff] }
  0x5b   :  { %557 = vmatpush.msrb.mxu0 %v419_v48  ;;  %597 = vmatpush.msrb.mxu2 %v421_v50  ;;  %v378_v48 = vld [vmem:[%s5651_s1 + $0x158] sm:$0xff]  ;;  %v360_v50 = vld [vmem:[%s5651_s1 + $0xc8] sm:$0xff] }
  0x5c   :  { %577 = vmatpush.msrb.mxu1 %v420_v49  ;;  %617 = vmatpush.msrb.mxu3 %v422_v51  ;;  %v359_v49 = vld [vmem:[%s5651_s1 + $0xc0] sm:$0xff]  ;;  %v361_v51 = vld [vmem:[%s5651_s1 + $0xd0] sm:$0xff] }
  0x5d   :  { %558 = vmatpush.msrb.mxu0 %v403_v52  ;;  %598 = vmatpush.msrb.mxu2 %v405_v54  ;;  %v362_v52 = vld [vmem:[%s5651_s1 + $0xd8] sm:$0xff]  ;;  %v344_v54 = vld [vmem:[%s5651_s1 + $0x48] sm:$0xff] }
  0x5e   :  { %578 = vmatpush.msrb.mxu1 %v404_v53  ;;  %618 = vmatpush.msrb.mxu3 %v406_v55  ;;  %v343_v53 = vld [vmem:[%s5651_s1 + $0x40] sm:$0xff]  ;;  %v345_v55 = vld [vmem:[%s5651_s1 + $0x50] sm:$0xff] }
  0x5f   :  { %559 = vmatpush.msrb.mxu0 %v387_v56  ;;  %599 = vmatpush.msrb.mxu2 %v389_v58  ;;  %v346_v56 = vld [vmem:[%s5651_s1 + $0x58] sm:$0xff]  ;;  %v460_v58 = vld [vmem:[%s5651_s1 + $0x3e8] sm:$0xff] }
  0x60   :  { %579 = vmatpush.msrb.mxu1 %v388_v57  ;;  %619 = vmatpush.msrb.mxu3 %v390_v59  ;;  %v459_v57 = vld [vmem:[%s5651_s1 + $0x3e0] sm:$0xff]  ;;  %v461_v59 = vld [vmem:[%s5651_s1 + $0x3f0] sm:$0xff] }
  0x61   :  { %560 = vmatpush.msrb.mxu0 %v371_v60  ;;  %600 = vmatpush.msrb.mxu2 %v373_v62  ;;  %v462_v60 = vld [vmem:[%s5651_s1 + $0x3f8] sm:$0xff]  ;;  %v444_v62 = vld [vmem:[%s5651_s1 + $0x368] sm:$0xff] }
  0x62   :  { %580 = vmatpush.msrb.mxu1 %v372_v61  ;;  %620 = vmatpush.msrb.mxu3 %v374_v63  ;;  %v443_v61 = vld [vmem:[%s5651_s1 + $0x360] sm:$0xff]  ;;  %v445_v63 = vld [vmem:[%s5651_s1 + $0x370] sm:$0xff] }
  0x63   :  { %561 = vmatpush.msrb.mxu0 %v355_v0  ;;  %601 = vmatpush.msrb.mxu2 %v357_v2  ;;  %v446_v0 = vld [vmem:[%s5651_s1 + $0x378] sm:$0xff]  ;;  %v428_v2 = vld [vmem:[%s5651_s1 + $0x2e8] sm:$0xff] }
  0x64   :  { %581 = vmatpush.msrb.mxu1 %v356_v1  ;;  %621 = vmatpush.msrb.mxu3 %v358_v3  ;;  %v427_v1 = vld [vmem:[%s5651_s1 + $0x2e0] sm:$0xff]  ;;  %v429_v3 = vld [vmem:[%s5651_s1 + $0x2f0] sm:$0xff] }
  0x65   :  { %562 = vmatpush.msrb.mxu0 %v339_v4  ;;  %602 = vmatpush.msrb.mxu2 %v341_v6  ;;  %v430_v4 = vld [vmem:[%s5651_s1 + $0x2f8] sm:$0xff]  ;;  %v412_v6 = vld [vmem:[%s5651_s1 + $0x268] sm:$0xff] }
  0x66   :  { %582 = vmatpush.msrb.mxu1 %v340_v5  ;;  %622 = vmatpush.msrb.mxu3 %v342_v7  ;;  %v411_v5 = vld [vmem:[%s5651_s1 + $0x260] sm:$0xff]  ;;  %v413_v7 = vld [vmem:[%s5651_s1 + $0x270] sm:$0xff] }
  0xb8   :  { %v192_v9 = vpop.f32.mrf.mxu0 }
  0xb9   :  { %v193_v10 = vadd.f32 %v2550_v8, %v192_v9  ;;  %v414_v8 = vld [vmem:[%s5651_s1 + $0x278] sm:$0xff]  ;;  %v395_v9 = vld [vmem:[%s5651_s1 + $0x1e0] sm:$0xff] }
  0xbb   :  { %v212_v11 = vpop.f32.mrf.mxu1 }
  0xbc   :  { %v213_v12 = vadd.f32 %v212_v11, %v193_v10  ;;  %v232_v13 = vpop.f32.mrf.mxu2  ;;  %v396_v10 = vld [vmem:[%s5651_s1 + $0x1e8] sm:$0xff]  ;;  %v397_v11 = vld [vmem:[%s5651_s1 + $0x1f0] sm:$0xff] }
  0xbe   :  { %v233_v14 = vadd.f32 %v232_v13, %v213_v12  ;;  %v398_v12 = vld [vmem:[%s5651_s1 + $0x1f8] sm:$0xff]  ;;  %v379_v13 = vld [vmem:[%s5651_s1 + $0x160] sm:$0xff] }
  0xbf   :  { %v252_v15 = vpop.f32.mrf.mxu3 }
  0xc0   :  { %v253_v16 = vadd.f32 %v252_v15, %v233_v14  ;;  %v380_v14 = vld [vmem:[%s5651_s1 + $0x168] sm:$0xff]  ;;  %v381_v15 = vld [vmem:[%s5651_s1 + $0x170] sm:$0xff] }
  0xc2   :  { %v272_v17 = vpop.f32.mrf.mxu0 }
  0xc3   :  { %v273_v18 = vadd.f32 %v272_v17, %v253_v16  ;;  %v382_v16 = vld [vmem:[%s5651_s1 + $0x178] sm:$0xff]  ;;  %v363_v17 = vld [vmem:[%s5651_s1 + $0xe0] sm:$0xff] }
  0xc4   :  { %v292_v19 = vpop.f32.mrf.mxu1 }
  0xc5   :  { %v293_v20 = vadd.f32 %v292_v19, %v273_v18  ;;  %v364_v18 = vld [vmem:[%s5651_s1 + $0xe8] sm:$0xff]  ;;  %v365_v19 = vld [vmem:[%s5651_s1 + $0xf0] sm:$0xff] }
  0xc6   :  { %v312_v21 = vpop.f32.mrf.mxu2 }
  0xc7   :  { %v313_v22 = vadd.f32 %v312_v21, %v293_v20  ;;  %v366_v20 = vld [vmem:[%s5651_s1 + $0xf8] sm:$0xff]  ;;  %v347_v21 = vld [vmem:[%s5651_s1 + $0x60] sm:$0xff] }
  0xc8   :  { %v332_v23 = vpop.f32.mrf.mxu3 }
  0xc9   :  { %v3407_v24 = vadd.f32 %v332_v23, %v313_v22  ;;  %v348_v22 = vld [vmem:[%s5651_s1 + $0x68] sm:$0xff]  ;;  %v349_v23 = vld [vmem:[%s5651_s1 + $0x70] sm:$0xff] }
  0xcb   :  { %2518 = vmatmul.msk.f32.vlgmr.msra.gmra.mxu0 %vm463_vm0, %v3407_v24  ;;  %2519 = vmatmul.msk.f32.vlgmr.msra.gmra.mxu1 %vm463_vm0, %v3407_v24 }
  0xcc   :  { %2520 = vmatmul.msk.f32.vlgmr.msra.gmra.mxu2 %vm463_vm0, %v3407_v24  ;;  %2521 = vmatmul.msk.f32.vlgmr.msra.gmra.mxu3 %vm463_vm0, %v3407_v24 }
  0xcd   :  { %635 = vmatpush.msra.mxu0 %v455_v25  ;;  %655 = vmatpush.msra.mxu1 %v456_v26  ;;  %v350_v25 = vld [vmem:[%s5651_s1 + $0x78] sm:$0xff] }
  0xce   :  { %675 = vmatpush.msra.mxu2 %v457_v27  ;;  %695 = vmatpush.msra.mxu3 %v458_v28  ;;  %v918_v26 = vld [vmem:[%s5652_s5 + $0x78] sm:$0xff] }
  0xcf   :  { %636 = vmatpush.msra.mxu0 %v439_v29  ;;  %656 = vmatpush.msra.mxu1 %v440_v30  ;;  %v934_v27 = vld [vmem:[%s5652_s5 + $0xf8] sm:$0xff]  ;;  %v917_v30 = vld [vmem:[%s5652_s5 + $0x70] sm:$0xff] }
  0xd0   :  { %676 = vmatpush.msra.mxu2 %v441_v31  ;;  %696 = vmatpush.msra.mxu3 %v442_v32  ;;  %v950_v28 = vld [vmem:[%s5652_s5 + $0x178] sm:$0xff]  ;;  %v933_v31 = vld [vmem:[%s5652_s5 + $0xf0] sm:$0xff] }
  0xd1   :  { %637 = vmatpush.msra.mxu0 %v423_v33  ;;  %657 = vmatpush.msra.mxu1 %v424_v34  ;;  %v966_v29 = vld [vmem:[%s5652_s5 + $0x1f8] sm:$0xff]  ;;  %v949_v32 = vld [vmem:[%s5652_s5 + $0x170] sm:$0xff]  ;;  %v932_v34 = vld [vmem:[%s5652_s5 + $0xe8] sm:$0xff] }
  0xd2   :  { %677 = vmatpush.msra.mxu2 %v425_v35  ;;  %697 = vmatpush.msra.mxu3 %v426_v36  ;;  %v965_v33 = vld [vmem:[%s5652_s5 + $0x1f0] sm:$0xff]  ;;  %v948_v35 = vld [vmem:[%s5652_s5 + $0x168] sm:$0xff] }
  0xd3   :  { %638 = vmatpush.msra.mxu0 %v407_v37  ;;  %658 = vmatpush.msra.mxu1 %v408_v38  ;;  %v964_v36 = vld [vmem:[%s5652_s5 + $0x1e8] sm:$0xff]  ;;  %v915_v37 = vld [vmem:[%s5652_s5 + $0x60] sm:$0xff] }
  0xd4   :  { %678 = vmatpush.msra.mxu2 %v409_v39  ;;  %698 = vmatpush.msra.mxu3 %v410_v40  ;;  %v931_v38 = vld [vmem:[%s5652_s5 + $0xe0] sm:$0xff] }
  0xd5   :  { %2522 = vmatmul.msk.f32.vlgmr.msrb.gmra.mxu0 %vm463_vm0, %v3407_v24  ;;  %2523 = vmatmul.msk.f32.vlgmr.msrb.gmra.mxu1 %vm463_vm0, %v3407_v24  ;;  %v947_v39 = vld [vmem:[%s5652_s5 + $0x160] sm:$0xff] }
  0xd6   :  { %2524 = vmatmul.msk.f32.vlgmr.msrb.gmra.mxu2 %vm463_vm0, %v3407_v24  ;;  %2525 = vmatmul.msk.f32.vlgmr.msrb.gmra.mxu3 %vm463_vm0, %v3407_v24  ;;  %v963_v40 = vld [vmem:[%s5652_s5 + $0x1e0] sm:$0xff] }
  0xd7   :  { %639 = vmatpush.msra.mxu0 %v391_v41  ;;  %659 = vmatpush.msra.mxu1 %v392_v42  ;;  %v914_v41 = vld [vmem:[%s5652_s5 + $0x58] sm:$0xff] }
  0xd8   :  { %679 = vmatpush.msra.mxu2 %v393_v43  ;;  %699 = vmatpush.msra.mxu3 %v394_v44  ;;  %v930_v42 = vld [vmem:[%s5652_s5 + $0xd8] sm:$0xff] }
  0xd9   :  { %640 = vmatpush.msra.mxu0 %v375_v45  ;;  %660 = vmatpush.msra.mxu1 %v376_v46  ;;  %v946_v43 = vld [vmem:[%s5652_s5 + $0x158] sm:$0xff]  ;;  %v913_v45 = vld [vmem:[%s5652_s5 + $0x50] sm:$0xff] }
  0xda   :  { %680 = vmatpush.msra.mxu2 %v377_v47  ;;  %700 = vmatpush.msra.mxu3 %v378_v48  ;;  %v962_v44 = vld [vmem:[%s5652_s5 + $0x1d8] sm:$0xff]  ;;  %v929_v46 = vld [vmem:[%s5652_s5 + $0xd0] sm:$0xff] }
  0xdb   :  { %641 = vmatpush.msra.mxu0 %v359_v49  ;;  %661 = vmatpush.msra.mxu1 %v360_v50  ;;  %v945_v47 = vld [vmem:[%s5652_s5 + $0x150] sm:$0xff]  ;;  %v912_v49 = vld [vmem:[%s5652_s5 + $0x48] sm:$0xff] }
  0xdc   :  { %681 = vmatpush.msra.mxu2 %v361_v51  ;;  %701 = vmatpush.msra.mxu3 %v362_v52  ;;  %v961_v48 = vld [vmem:[%s5652_s5 + $0x1d0] sm:$0xff]  ;;  %v928_v50 = vld [vmem:[%s5652_s5 + $0xc8] sm:$0xff] }
  0xdd   :  { %642 = vmatpush.msra.mxu0 %v343_v53  ;;  %662 = vmatpush.msra.mxu1 %v344_v54  ;;  %v944_v51 = vld [vmem:[%s5652_s5 + $0x148] sm:$0xff]  ;;  %v911_v53 = vld [vmem:[%s5652_s5 + $0x40] sm:$0xff] }
  0xde   :  { %682 = vmatpush.msra.mxu2 %v345_v55  ;;  %702 = vmatpush.msra.mxu3 %v346_v56  ;;  %v960_v52 = vld [vmem:[%s5652_s5 + $0x1c8] sm:$0xff]  ;;  %v927_v54 = vld [vmem:[%s5652_s5 + $0xc0] sm:$0xff] }
  0xdf   :  { %715 = vmatpush.msrb.mxu0 %v459_v57  ;;  %735 = vmatpush.msrb.mxu1 %v460_v58  ;;  %v943_v55 = vld [vmem:[%s5652_s5 + $0x140] sm:$0xff]  ;;  %v910_v57 = vld [vmem:[%s5652_s5 + $0x38] sm:$0xff] }
  0xe0   :  { %755 = vmatpush.msrb.mxu2 %v461_v59  ;;  %775 = vmatpush.msrb.mxu3 %v462_v60  ;;  %v959_v56 = vld [vmem:[%s5652_s5 + $0x1c0] sm:$0xff]  ;;  %v926_v58 = vld [vmem:[%s5652_s5 + $0xb8] sm:$0xff] }
  0xe1   :  { %2526 = vmatmul.msk.f32.vlgmr.msra.gmra.mxu0 %vm463_vm0, %v3407_v24  ;;  %2527 = vmatmul.msk.f32.vlgmr.msra.gmra.mxu1 %vm463_vm0, %v3407_v24  ;;  %v942_v59 = vld [vmem:[%s5652_s5 + $0x138] sm:$0xff] }
  0xe2   :  { %2528 = vmatmul.msk.f32.vlgmr.msra.gmra.mxu2 %vm463_vm0, %v3407_v24  ;;  %2529 = vmatmul.msk.f32.vlgmr.msra.gmra.mxu3 %vm463_vm0, %v3407_v24  ;;  %v958_v60 = vld [vmem:[%s5652_s5 + $0x1b8] sm:$0xff] }
  0xe3   :  { %716 = vmatpush.msrb.mxu0 %v443_v61  ;;  %736 = vmatpush.msrb.mxu1 %v444_v62  ;;  %v909_v61 = vld [vmem:[%s5652_s5 + $0x30] sm:$0xff] }
  0xe4   :  { %756 = vmatpush.msrb.mxu2 %v445_v63  ;;  %776 = vmatpush.msrb.mxu3 %v446_v0  ;;  %v925_v62 = vld [vmem:[%s5652_s5 + $0xb0] sm:$0xff] }
  0xe5   :  { %717 = vmatpush.msrb.mxu0 %v427_v1  ;;  %737 = vmatpush.msrb.mxu1 %v428_v2  ;;  %v941_v63 = vld [vmem:[%s5652_s5 + $0x130] sm:$0xff]  ;;  %v908_v1 = vld [vmem:[%s5652_s5 + $0x28] sm:$0xff] }
  0xe6   :  { %757 = vmatpush.msrb.mxu2 %v429_v3  ;;  %777 = vmatpush.msrb.mxu3 %v430_v4  ;;  %v957_v0 = vld [vmem:[%s5652_s5 + $0x1b0] sm:$0xff]  ;;  %v924_v2 = vld [vmem:[%s5652_s5 + $0xa8] sm:$0xff] }
  0xe7   :  { %718 = vmatpush.msrb.mxu0 %v411_v5  ;;  %738 = vmatpush.msrb.mxu1 %v412_v6  ;;  %v940_v3 = vld [vmem:[%s5652_s5 + $0x128] sm:$0xff]  ;;  %v907_v5 = vld [vmem:[%s5652_s5 + $0x20] sm:$0xff] }
  0xe8   :  { %758 = vmatpush.msrb.mxu2 %v413_v7  ;;  %778 = vmatpush.msrb.mxu3 %v414_v8  ;;  %v956_v4 = vld [vmem:[%s5652_s5 + $0x1a8] sm:$0xff]  ;;  %v923_v6 = vld [vmem:[%s5652_s5 + $0xa0] sm:$0xff] }
  0xe9   :  { %719 = vmatpush.msrb.mxu0 %v395_v9  ;;  %739 = vmatpush.msrb.mxu1 %v396_v10  ;;  %v939_v7 = vld [vmem:[%s5652_s5 + $0x120] sm:$0xff]  ;;  %v906_v9 = vld [vmem:[%s5652_s5 + $0x18] sm:$0xff] }
  0xea   :  { %759 = vmatpush.msrb.mxu2 %v397_v11  ;;  %779 = vmatpush.msrb.mxu3 %v398_v12  ;;  %v955_v8 = vld [vmem:[%s5652_s5 + $0x1a0] sm:$0xff]  ;;  %v922_v10 = vld [vmem:[%s5652_s5 + $0x98] sm:$0xff] }
  0xeb   :  { %720 = vmatpush.msrb.mxu0 %v379_v13  ;;  %740 = vmatpush.msrb.mxu1 %v380_v14  ;;  %v938_v11 = vld [vmem:[%s5652_s5 + $0x118] sm:$0xff]  ;;  %v905_v13 = vld [vmem:[%s5652_s5 + $0x10] sm:$0xff] }
  0xec   :  { %760 = vmatpush.msrb.mxu2 %v381_v15  ;;  %780 = vmatpush.msrb.mxu3 %v382_v16  ;;  %v954_v12 = vld [vmem:[%s5652_s5 + $0x198] sm:$0xff]  ;;  %v921_v14 = vld [vmem:[%s5652_s5 + $0x90] sm:$0xff] }
  0xed   :  { %721 = vmatpush.msrb.mxu0 %v363_v17  ;;  %741 = vmatpush.msrb.mxu1 %v364_v18  ;;  %v937_v15 = vld [vmem:[%s5652_s5 + $0x110] sm:$0xff]  ;;  %v904_v17 = vld [vmem:[%s5652_s5 + $0x8] sm:$0xff] }
  0xee   :  { %761 = vmatpush.msrb.mxu2 %v365_v19  ;;  %781 = vmatpush.msrb.mxu3 %v366_v20  ;;  %v953_v16 = vld [vmem:[%s5652_s5 + $0x190] sm:$0xff]  ;;  %v920_v18 = vld [vmem:[%s5652_s5 + $0x88] sm:$0xff] }
  0xef   :  { %722 = vmatpush.msrb.mxu0 %v347_v21  ;;  %742 = vmatpush.msrb.mxu1 %v348_v22  ;;  %v936_v19 = vld [vmem:[%s5652_s5 + $0x108] sm:$0xff]  ;;  %v903_v21 = vld [vmem:[%s5652_s5] sm:$0xff] }
  0xf0   :  { %762 = vmatpush.msrb.mxu2 %v349_v23  ;;  %782 = vmatpush.msrb.mxu3 %v350_v25  ;;  %v952_v20 = vld [vmem:[%s5652_s5 + $0x188] sm:$0xff]  ;;  %v919_v22 = vld [vmem:[%s5652_s5 + $0x80] sm:$0xff]  ;;  %v982_v23 = vld [vmem:[%s5652_s5 + $0x278] sm:$0xff] }
  0xf1   :  { %2530 = vmatmul.msk.f32.vlgmr.msrb.gmra.mxu0 %vm463_vm0, %v3407_v24  ;;  %2531 = vmatmul.msk.f32.vlgmr.msrb.gmra.mxu1 %vm463_vm0, %v3407_v24  ;;  %v998_v25 = vld [vmem:[%s5652_s5 + $0x2f8] sm:$0xff] }
  0xf2   :  { %2532 = vmatmul.msk.f32.vlgmr.msrb.gmra.mxu2 %vm463_vm0, %v3407_v24  ;;  %2533 = vmatmul.msk.f32.vlgmr.msrb.gmra.mxu3 %vm463_vm0, %v3407_v24  ;;  %v916_v24 = vld [vmem:[%s5652_s5 + $0x68] sm:$0xff] }
  0xf3   :  { %1163 = vmatpush.msra.mxu0 %v918_v26  ;;  %1183 = vmatpush.msra.mxu1 %v934_v27  ;;  %v935_v26 = vld [vmem:[%s5652_s5 + $0x100] sm:$0xff] }
  0xf4   :  { %1203 = vmatpush.msra.mxu2 %v950_v28  ;;  %1223 = vmatpush.msra.mxu3 %v966_v29  ;;  %v951_v27 = vld [vmem:[%s5652_s5 + $0x180] sm:$0xff]  ;;  %v981_v28 = vld [vmem:[%s5652_s5 + $0x270] sm:$0xff] }
  0xf5   :  { %1164 = vmatpush.msra.mxu0 %v917_v30  ;;  %1184 = vmatpush.msra.mxu1 %v933_v31  ;;  %v997_v29 = vld [vmem:[%s5652_s5 + $0x2f0] sm:$0xff]  ;;  %v1014_v30 = vld [vmem:[%s5652_s5 + $0x378] sm:$0xff] }
  0xf6   :  { %1204 = vmatpush.msra.mxu2 %v949_v32  ;;  %1224 = vmatpush.msra.mxu3 %v965_v33  ;;  %v1030_v31 = vld [vmem:[%s5652_s5 + $0x3f8] sm:$0xff]  ;;  %v980_v32 = vld [vmem:[%s5652_s5 + $0x268] sm:$0xff] }
  0xf7   :  { %1165 = vmatpush.msra.mxu0 %v916_v24  ;;  %1185 = vmatpush.msra.mxu1 %v932_v34  ;;  %v996_v33 = vld [vmem:[%s5652_s5 + $0x2e8] sm:$0xff]  ;;  %v1013_v24 = vld [vmem:[%s5652_s5 + $0x370] sm:$0xff] }
  0xf8   :  { %1205 = vmatpush.msra.mxu2 %v948_v35  ;;  %1225 = vmatpush.msra.mxu3 %v964_v36  ;;  %v1029_v34 = vld [vmem:[%s5652_s5 + $0x3f0] sm:$0xff]  ;;  %v979_v35 = vld [vmem:[%s5652_s5 + $0x260] sm:$0xff] }
  0xf9   :  { %1166 = vmatpush.msra.mxu0 %v915_v37  ;;  %1186 = vmatpush.msra.mxu1 %v931_v38  ;;  %v995_v36 = vld [vmem:[%s5652_s5 + $0x2e0] sm:$0xff]  ;;  %v1012_v37 = vld [vmem:[%s5652_s5 + $0x368] sm:$0xff] }
  0xfa   :  { %1206 = vmatpush.msra.mxu2 %v947_v39  ;;  %1226 = vmatpush.msra.mxu3 %v963_v40  ;;  %v1028_v38 = vld [vmem:[%s5652_s5 + $0x3e8] sm:$0xff]  ;;  %v978_v39 = vld [vmem:[%s5652_s5 + $0x258] sm:$0xff] }
  0xfb   :  { %1167 = vmatpush.msra.mxu0 %v914_v41  ;;  %1187 = vmatpush.msra.mxu1 %v930_v42  ;;  %v994_v40 = vld [vmem:[%s5652_s5 + $0x2d8] sm:$0xff]  ;;  %v1011_v41 = vld [vmem:[%s5652_s5 + $0x360] sm:$0xff] }
  0xfc   :  { %1207 = vmatpush.msra.mxu2 %v946_v43  ;;  %1227 = vmatpush.msra.mxu3 %v962_v44  ;;  %v1027_v42 = vld [vmem:[%s5652_s5 + $0x3e0] sm:$0xff]  ;;  %v977_v43 = vld [vmem:[%s5652_s5 + $0x250] sm:$0xff] }
  0xfd   :  { %1168 = vmatpush.msra.mxu0 %v913_v45  ;;  %1188 = vmatpush.msra.mxu1 %v929_v46  ;;  %v993_v44 = vld [vmem:[%s5652_s5 + $0x2d0] sm:$0xff]  ;;  %v1010_v45 = vld [vmem:[%s5652_s5 + $0x358] sm:$0xff] }
  0xfe   :  { %1208 = vmatpush.msra.mxu2 %v945_v47  ;;  %1228 = vmatpush.msra.mxu3 %v961_v48  ;;  %v1026_v46 = vld [vmem:[%s5652_s5 + $0x3d8] sm:$0xff]  ;;  %v976_v47 = vld [vmem:[%s5652_s5 + $0x248] sm:$0xff] }
  0xff   :  { %1169 = vmatpush.msra.mxu0 %v912_v49  ;;  %1189 = vmatpush.msra.mxu1 %v928_v50  ;;  %v992_v48 = vld [vmem:[%s5652_s5 + $0x2c8] sm:$0xff]  ;;  %v975_v49 = vld [vmem:[%s5652_s5 + $0x240] sm:$0xff] }
 0x100   :  { %1209 = vmatpush.msra.mxu2 %v944_v51  ;;  %1229 = vmatpush.msra.mxu3 %v960_v52  ;;  %v991_v50 = vld [vmem:[%s5652_s5 + $0x2c0] sm:$0xff]  ;;  %v974_v51 = vld [vmem:[%s5652_s5 + $0x238] sm:$0xff] }
 0x101   :  { %1170 = vmatpush.msra.mxu0 %v911_v53  ;;  %1190 = vmatpush.msra.mxu1 %v927_v54  ;;  %v990_v52 = vld [vmem:[%s5652_s5 + $0x2b8] sm:$0xff]  ;;  %v1009_v53 = vld [vmem:[%s5652_s5 + $0x350] sm:$0xff] }
 0x102   :  { %1210 = vmatpush.msra.mxu2 %v943_v55  ;;  %1230 = vmatpush.msra.mxu3 %v959_v56  ;;  %v1025_v54 = vld [vmem:[%s5652_s5 + $0x3d0] sm:$0xff] }
 0x103   :  { %1171 = vmatpush.msra.mxu0 %v910_v57  ;;  %1191 = vmatpush.msra.mxu1 %v926_v58  ;;  %v973_v55 = vld [vmem:[%s5652_s5 + $0x230] sm:$0xff]  ;;  %v1008_v57 = vld [vmem:[%s5652_s5 + $0x348] sm:$0xff] }
 0x104   :  { %1211 = vmatpush.msra.mxu2 %v942_v59  ;;  %1231 = vmatpush.msra.mxu3 %v958_v60  ;;  %v989_v56 = vld [vmem:[%s5652_s5 + $0x2b0] sm:$0xff]  ;;  %v1024_v58 = vld [vmem:[%s5652_s5 + $0x3c8] sm:$0xff] }
 0x105   :  { %1172 = vmatpush.msra.mxu0 %v909_v61  ;;  %1192 = vmatpush.msra.mxu1 %v925_v62  ;;  %v972_v59 = vld [vmem:[%s5652_s5 + $0x228] sm:$0xff]  ;;  %v1007_v61 = vld [vmem:[%s5652_s5 + $0x340] sm:$0xff] }
 0x106   :  { %1212 = vmatpush.msra.mxu2 %v941_v63  ;;  %1232 = vmatpush.msra.mxu3 %v957_v0  ;;  %v988_v60 = vld [vmem:[%s5652_s5 + $0x2a8] sm:$0xff]  ;;  %v1023_v62 = vld [vmem:[%s5652_s5 + $0x3c0] sm:$0xff] }
 0x107   :  { %1173 = vmatpush.msra.mxu0 %v908_v1  ;;  %1193 = vmatpush.msra.mxu1 %v924_v2  ;;  %v971_v63 = vld [vmem:[%s5652_s5 + $0x220] sm:$0xff]  ;;  %v1006_v1 = vld [vmem:[%s5652_s5 + $0x338] sm:$0xff] }
 0x108   :  { %1213 = vmatpush.msra.mxu2 %v940_v3  ;;  %1233 = vmatpush.msra.mxu3 %v956_v4  ;;  %v987_v0 = vld [vmem:[%s5652_s5 + $0x2a0] sm:$0xff]  ;;  %v1022_v2 = vld [vmem:[%s5652_s5 + $0x3b8] sm:$0xff] }
 0x109   :  { %1174 = vmatpush.msra.mxu0 %v907_v5  ;;  %1194 = vmatpush.msra.mxu1 %v923_v6  ;;  %v970_v3 = vld [vmem:[%s5652_s5 + $0x218] sm:$0xff]  ;;  %v1005_v5 = vld [vmem:[%s5652_s5 + $0x330] sm:$0xff] }
 0x10a   :  { %1214 = vmatpush.msra.mxu2 %v939_v7  ;;  %1234 = vmatpush.msra.mxu3 %v955_v8  ;;  %v986_v4 = vld [vmem:[%s5652_s5 + $0x298] sm:$0xff]  ;;  %v1021_v6 = vld [vmem:[%s5652_s5 + $0x3b0] sm:$0xff] }
 0x10b   :  { %1175 = vmatpush.msra.mxu0 %v906_v9  ;;  %1195 = vmatpush.msra.mxu1 %v922_v10  ;;  %v969_v7 = vld [vmem:[%s5652_s5 + $0x210] sm:$0xff]  ;;  %v1004_v9 = vld [vmem:[%s5652_s5 + $0x328] sm:$0xff] }
 0x10c   :  { %1215 = vmatpush.msra.mxu2 %v938_v11  ;;  %1235 = vmatpush.msra.mxu3 %v954_v12  ;;  %v985_v8 = vld [vmem:[%s5652_s5 + $0x290] sm:$0xff]  ;;  %v1020_v10 = vld [vmem:[%s5652_s5 + $0x3a8] sm:$0xff] }
 0x10d   :  { %1176 = vmatpush.msra.mxu0 %v905_v13  ;;  %1196 = vmatpush.msra.mxu1 %v921_v14  ;;  %v968_v11 = vld [vmem:[%s5652_s5 + $0x208] sm:$0xff]  ;;  %v1003_v13 = vld [vmem:[%s5652_s5 + $0x320] sm:$0xff] }
 0x10e   :  { %1216 = vmatpush.msra.mxu2 %v937_v15  ;;  %1236 = vmatpush.msra.mxu3 %v953_v16  ;;  %v984_v12 = vld [vmem:[%s5652_s5 + $0x288] sm:$0xff]  ;;  %v1019_v14 = vld [vmem:[%s5652_s5 + $0x3a0] sm:$0xff] }
 0x10f   :  { %1177 = vmatpush.msra.mxu0 %v904_v17  ;;  %1197 = vmatpush.msra.mxu1 %v920_v18  ;;  %v967_v15 = vld [vmem:[%s5652_s5 + $0x200] sm:$0xff]  ;;  %v1002_v17 = vld [vmem:[%s5652_s5 + $0x318] sm:$0xff] }
 0x110   :  { %1217 = vmatpush.msra.mxu2 %v936_v19  ;;  %1237 = vmatpush.msra.mxu3 %v952_v20  ;;  %v983_v16 = vld [vmem:[%s5652_s5 + $0x280] sm:$0xff]  ;;  %v1018_v18 = vld [vmem:[%s5652_s5 + $0x398] sm:$0xff]  ;;  %v1001_v19 = vld [vmem:[%s5652_s5 + $0x310] sm:$0xff] }
 0x111   :  { %1178 = vmatpush.msra.mxu0 %v903_v21  ;;  %1198 = vmatpush.msra.mxu1 %v919_v22  ;;  %v1017_v20 = vld [vmem:[%s5652_s5 + $0x390] sm:$0xff]  ;;  %v4008_v21 = vld [vmem:[%s5654_s4] sm:$0xff]  ;;  %v1000_v22 = vld [vmem:[%s5652_s5 + $0x308] sm:$0xff] }
 0x112   :  { %1218 = vmatpush.msra.mxu2 %v935_v26  ;;  %1238 = vmatpush.msra.mxu3 %v951_v27  ;;  %v792_v26 = vperm.slane %v4008_v21, 1  ;;  %v999_v27 = vld [vmem:[%s5652_s5 + $0x300] sm:$0xff] }
 0x113   :  { %1243 = vmatpush.msrb.mxu0 %v982_v23  ;;  %1263 = vmatpush.msrb.mxu1 %v998_v25  ;;  %v1016_v23 = vld [vmem:[%s5652_s5 + $0x388] sm:$0xff]  ;;  %v791_v25 = vperm.slane %v4008_v21, 0 }
 0x114   :  { %1283 = vmatpush.msrb.mxu2 %v1014_v30  ;;  %1303 = vmatpush.msrb.mxu3 %v1030_v31 }
 0x115   :  { %1244 = vmatpush.msrb.mxu0 %v981_v28  ;;  %1264 = vmatpush.msrb.mxu1 %v997_v29  ;;  %v1015_v28 = vld [vmem:[%s5652_s5 + $0x380] sm:$0xff] }
 0x116   :  { %1284 = vmatpush.msrb.mxu2 %v1013_v24  ;;  %1304 = vmatpush.msrb.mxu3 %v1029_v34  ;;  %v793_v34 = vperm.slane %v4008_v21, 2 }
 0x117   :  { %1245 = vmatpush.msrb.mxu0 %v980_v32  ;;  %1265 = vmatpush.msrb.mxu1 %v996_v33 }
 0x118   :  { %1285 = vmatpush.msrb.mxu2 %v1012_v37  ;;  %1305 = vmatpush.msrb.mxu3 %v1028_v38 }
 0x119   :  { %1246 = vmatpush.msrb.mxu0 %v979_v35  ;;  %1266 = vmatpush.msrb.mxu1 %v995_v36  ;;  %v794_v35 = vperm.slane %v4008_v21, 3 }
 0x11a   :  { %1286 = vmatpush.msrb.mxu2 %v1011_v41  ;;  %1306 = vmatpush.msrb.mxu3 %v1027_v42  ;;  %v795_v42 = vperm.slane %v4008_v21, 4 }
 0x11b   :  { %1247 = vmatpush.msrb.mxu0 %v978_v39  ;;  %1267 = vmatpush.msrb.mxu1 %v994_v40 }
 0x11c   :  { %1287 = vmatpush.msrb.mxu2 %v1010_v45  ;;  %1307 = vmatpush.msrb.mxu3 %v1026_v46 }
 0x11d   :  { %1248 = vmatpush.msrb.mxu0 %v977_v43  ;;  %1268 = vmatpush.msrb.mxu1 %v993_v44  ;;  %v796_v43 = vperm.slane %v4008_v21, 5 }
 0x11e   :  { %1288 = vmatpush.msrb.mxu2 %v1009_v53  ;;  %1308 = vmatpush.msrb.mxu3 %v1025_v54 }
 0x11f   :  { %1249 = vmatpush.msrb.mxu0 %v976_v47  ;;  %1269 = vmatpush.msrb.mxu1 %v992_v48 }
 0x120   :  { %1289 = vmatpush.msrb.mxu2 %v1008_v57  ;;  %1309 = vmatpush.msrb.mxu3 %v1024_v58 }
 0x121   :  { %1250 = vmatpush.msrb.mxu0 %v975_v49  ;;  %1270 = vmatpush.msrb.mxu1 %v991_v50 }
 0x122   :  { %1290 = vmatpush.msrb.mxu2 %v1007_v61  ;;  %1310 = vmatpush.msrb.mxu3 %v1023_v62 }
 0x123   :  { %1251 = vmatpush.msrb.mxu0 %v974_v51  ;;  %1271 = vmatpush.msrb.mxu1 %v990_v52 }
 0x124   :  { %1291 = vmatpush.msrb.mxu2 %v1006_v1  ;;  %1311 = vmatpush.msrb.mxu3 %v1022_v2  ;;  %v1045_v2 = vld [vmem:[%s5652_s5 + $0x470] sm:$0xff] }
 0x125   :  { %1252 = vmatpush.msrb.mxu0 %v973_v55  ;;  %1272 = vmatpush.msrb.mxu1 %v989_v56  ;;  %v797_v56 = vperm.slane %v4008_v21, 6 }
 0x126   :  { %1292 = vmatpush.msrb.mxu2 %v1005_v5  ;;  %1312 = vmatpush.msrb.mxu3 %v1021_v6 }
 0x127   :  { %1253 = vmatpush.msrb.mxu0 %v972_v59  ;;  %1273 = vmatpush.msrb.mxu1 %v988_v60  ;;  %v798_v59 = vperm.slane %v4008_v21, 7  ;;  %v1046_v60 = vld [vmem:[%s5652_s5 + $0x478] sm:$0xff] }
 0x128   :  { %1293 = vmatpush.msrb.mxu2 %v1004_v9  ;;  %1313 = vmatpush.msrb.mxu3 %v1020_v10  ;;  %v1044_v10 = vld [vmem:[%s5652_s5 + $0x468] sm:$0xff]  ;;  %v1094_v21 = vld [vmem:[%s5652_s5 + $0x5f8] sm:$0xff] }
 0x129   :  { %1254 = vmatpush.msrb.mxu0 %v971_v63  ;;  %1274 = vmatpush.msrb.mxu1 %v987_v0  ;;  %v1062_v0 = vld [vmem:[%s5652_s5 + $0x4f8] sm:$0xff] }
 0x12a   :  { %1294 = vmatpush.msrb.mxu2 %v1003_v13  ;;  %1314 = vmatpush.msrb.mxu3 %v1019_v14  ;;  %v1043_v14 = vld [vmem:[%s5652_s5 + $0x460] sm:$0xff] }
 0x12b   :  { %1255 = vmatpush.msrb.mxu0 %v970_v3  ;;  %1275 = vmatpush.msrb.mxu1 %v986_v4 }
 0x12c   :  { %1295 = vmatpush.msrb.mxu2 %v1002_v17  ;;  %1315 = vmatpush.msrb.mxu3 %v1018_v18 }
 0x12d   :  { %1256 = vmatpush.msrb.mxu0 %v969_v7  ;;  %1276 = vmatpush.msrb.mxu1 %v985_v8  ;;  %v1061_v7 = vld [vmem:[%s5652_s5 + $0x4f0] sm:$0xff] }
 0x12e   :  { %1296 = vmatpush.msrb.mxu2 %v1001_v19  ;;  %1316 = vmatpush.msrb.mxu3 %v1017_v20  ;;  %v1078_v20 = vld [vmem:[%s5652_s5 + $0x578] sm:$0xff] }
 0x12f   :  { %1257 = vmatpush.msrb.mxu0 %v968_v11  ;;  %1277 = vmatpush.msrb.mxu1 %v984_v12  ;;  %v1060_v11 = vld [vmem:[%s5652_s5 + $0x4e8] sm:$0xff] }
 0x130   :  { %1297 = vmatpush.msrb.mxu2 %v1000_v22  ;;  %1317 = vmatpush.msrb.mxu3 %v1016_v23  ;;  %v1058_v23 = vld [vmem:[%s5652_s5 + $0x4d8] sm:$0xff] }
 0x131   :  { %1258 = vmatpush.msrb.mxu0 %v967_v15  ;;  %1278 = vmatpush.msrb.mxu1 %v983_v16  ;;  %v4054_v15 = vld [vmem:[%s5654_s4 + $0x8] sm:$0xff]  ;;  %v1059_v16 = vld [vmem:[%s5652_s5 + $0x4e0] sm:$0xff] }
 0x132   :  { %1298 = vmatpush.msrb.mxu2 %v999_v27  ;;  %1318 = vmatpush.msrb.mxu3 %v1015_v28  ;;  %v799_v27 = vperm.slane %v4054_v15, 0  ;;  %v1042_v28 = vld [vmem:[%s5652_s5 + $0x458] sm:$0xff] }
 0x148   :  { %v484_v29 = vpop.f32.mrf.mxu0  ;;  %v504_v30 = vpop.f32.mrf.mxu1 }
 0x149   :  { %v823_v31 = vsub.f32 %v484_v29, %v791_v25  ;;  %v824_v32 = vsub.f32 %v504_v30, %v792_v26 }
 0x14b   :  { %v839_v33 = vand.u32 2147483647, %v823_v31  ;;  %v840_v24 = vand.u32 2147483647, %v824_v32  ;;  %v800_v31 = vperm.slane %v4054_v15, 1  ;;  %v1077_v32 = vld [vmem:[%s5652_s5 + $0x570] sm:$0xff] }
 0x14d   :  { %v855_v36 = vsub.f32 0.0, %v839_v33  ;;  %v856_v37 = vsub.f32 0.0, %v840_v24  ;;  %v1093_v33 = vld [vmem:[%s5652_s5 + $0x5f0] sm:$0xff] }
 0x14f   :  { %v871_v38 = vmul.f32 1.442695, %v855_v36  ;;  %v873_v39 = vmul.f32 1.442695, %v856_v37  ;;  %v524_v40 = vpop.f32.mrf.mxu2  ;;  %v544_v41 = vpop.f32.mrf.mxu3  ;;  %v1057_v36 = vld [vmem:[%s5652_s5 + $0x4d0] sm:$0xff]  ;;  %v1076_v37 = vld [vmem:[%s5652_s5 + $0x568] sm:$0xff] }
 0x150   :  { %v825_v44 = vsub.f32 %v524_v40, %v793_v34  ;;  %v826_v45 = vsub.f32 %v544_v41, %v794_v35  ;;  %v1041_v35 = vld [vmem:[%s5652_s5 + $0x450] sm:$0xff]  ;;  %v1040_v40 = vld [vmem:[%s5652_s5 + $0x448] sm:$0xff] }
 0x151   :  { %2553 = vpow2.f32 %v871_v38  ;;  %v1092_v38 = vld [vmem:[%s5652_s5 + $0x5e8] sm:$0xff] }
 0x152   :  { %2555 = vpow2.f32 %v873_v39  ;;  %v841_v46 = vand.u32 2147483647, %v825_v44  ;;  %v842_v47 = vand.u32 2147483647, %v826_v45  ;;  %v564_v48 = vpop.f32.mrf.mxu0  ;;  %v584_v49 = vpop.f32.mrf.mxu1  ;;  %v1056_v41 = vld [vmem:[%s5652_s5 + $0x4c8] sm:$0xff]  ;;  %v1091_v44 = vld [vmem:[%s5652_s5 + $0x5e0] sm:$0xff] }
 0x153   :  { %v827_v50 = vsub.f32 %v564_v48, %v795_v42  ;;  %v828_v51 = vsub.f32 %v584_v49, %v796_v43  ;;  %v1075_v43 = vld [vmem:[%s5652_s5 + $0x560] sm:$0xff] }
 0x154   :  { %v857_v52 = vsub.f32 0.0, %v841_v46  ;;  %v858_v53 = vsub.f32 0.0, %v842_v47  ;;  %v1039_v45 = vld [vmem:[%s5652_s5 + $0x440] sm:$0xff]  ;;  %v801_v46 = vperm.slane %v4054_v15, 2 }
 0x155   :  { %v843_v54 = vand.u32 2147483647, %v827_v50  ;;  %v844_v55 = vand.u32 2147483647, %v828_v51  ;;  %v1055_v47 = vld [vmem:[%s5652_s5 + $0x4c0] sm:$0xff]  ;;  %v802_v51 = vperm.slane %v4054_v15, 3 }
 0x156   :  { %v875_v57 = vmul.f32 1.442695, %v857_v52  ;;  %v877_v58 = vmul.f32 1.442695, %v858_v53  ;;  %v1074_v52 = vld [vmem:[%s5652_s5 + $0x558] sm:$0xff] }
 0x157   :  { %v2554_v61 = vpop.eup %2553  ;;  %v859_v62 = vsub.f32 0.0, %v843_v54  ;;  %v860_v63 = vsub.f32 0.0, %v844_v55  ;;  %v1090_v53 = vld [vmem:[%s5652_s5 + $0x5d8] sm:$0xff] }
 0x158   :  { %v2556_v1 = vpop.eup %2555  ;;  %2557 = vpow2.f32 %v875_v57  ;;  %1179 = vmatmul.f32.vlgmr.msra.gmra.mxu0 %v2554_v61  ;;  %v1038_v57 = vld [vmem:[%s5652_s5 + $0x438] sm:$0xff] }
 0x159   :  { %2559 = vpow2.f32 %v877_v58  ;;  %v879_v3 = vmul.f32 1.442695, %v859_v62  ;;  %v881_v4 = vmul.f32 1.442695, %v860_v63  ;;  %v604_v5 = vpop.f32.mrf.mxu2  ;;  %v624_v6 = vpop.f32.mrf.mxu3  ;;  %1199 = vmatmul.f32.vlgmr.msra.gmra.mxu1 %v2556_v1  ;;  %1323 = vmatpush.msra.mxu0 %v1046_v60  ;;  %v1054_v58 = vld [vmem:[%s5652_s5 + $0x4b8] sm:$0xff]  ;;  %v1089_v60 = vld [vmem:[%s5652_s5 + $0x5d0] sm:$0xff] }
 0x15a   :  { %v829_v8 = vsub.f32 %v604_v5, %v797_v56  ;;  %v830_v9 = vsub.f32 %v624_v6, %v798_v59  ;;  %1343 = vmatpush.msra.mxu1 %v1062_v0  ;;  %v1073_v59 = vld [vmem:[%s5652_s5 + $0x550] sm:$0xff]  ;;  %v1036_v5 = vld [vmem:[%s5652_s5 + $0x428] sm:$0xff] }
 0x15b   :  { %2561 = vpow2.f32 %v879_v3  ;;  %1324 = vmatpush.msra.mxu0 %v1045_v2  ;;  %v1037_v62 = vld [vmem:[%s5652_s5 + $0x430] sm:$0xff]  ;;  %v1072_v2 = vld [vmem:[%s5652_s5 + $0x548] sm:$0xff] }
 0x15c   :  { %2563 = vpow2.f32 %v881_v4  ;;  %v845_v12 = vand.u32 2147483647, %v829_v8  ;;  %v846_v13 = vand.u32 2147483647, %v830_v9  ;;  %1344 = vmatpush.msra.mxu1 %v1061_v7  ;;  %v1053_v63 = vld [vmem:[%s5652_s5 + $0x4b0] sm:$0xff]  ;;  %v1088_v3 = vld [vmem:[%s5652_s5 + $0x5c8] sm:$0xff] }
 0x15d   :  { %1325 = vmatpush.msra.mxu0 %v1044_v10  ;;  %v1052_v6 = vld [vmem:[%s5652_s5 + $0x4a8] sm:$0xff]  ;;  %v1071_v7 = vld [vmem:[%s5652_s5 + $0x540] sm:$0xff] }
 0x15e   :  { %v2558_v17 = vpop.eup %2557  ;;  %v861_v18 = vsub.f32 0.0, %v845_v12  ;;  %v862_v19 = vsub.f32 0.0, %v846_v13  ;;  %1345 = vmatpush.msra.mxu1 %v1060_v11  ;;  %v644_v30 = vpop.f32.mrf.mxu0  ;;  %v1087_v8 = vld [vmem:[%s5652_s5 + $0x5c0] sm:$0xff] }
 0x15f   :  { %v2560_v22 = vpop.eup %2559  ;;  %1219 = vmatmul.f32.vlgmr.msra.gmra.mxu2 %v2558_v17  ;;  %1326 = vmatpush.msra.mxu0 %v1043_v14  ;;  %v664_v34 = vpop.f32.mrf.mxu1  ;;  %v831_v39 = vsub.f32 %v644_v30, %v799_v27  ;;  %v1035_v10 = vld [vmem:[%s5652_s5 + $0x420] sm:$0xff]  ;;  %v1070_v14 = vld [vmem:[%s5652_s5 + $0x538] sm:$0xff]  ;;  %v1068_v27 = vld [vmem:[%s5652_s5 + $0x528] sm:$0xff] }
 0x160   :  { %v883_v25 = vmul.f32 1.442695, %v861_v18  ;;  %v885_v26 = vmul.f32 1.442695, %v862_v19  ;;  %1239 = vmatmul.f32.vlgmr.msra.gmra.mxu3 %v2560_v22  ;;  %1346 = vmatpush.msra.mxu1 %v1059_v16  ;;  %v832_v42 = vsub.f32 %v664_v34, %v800_v31  ;;  %v1051_v11 = vld [vmem:[%s5652_s5 + $0x4a0] sm:$0xff]  ;;  %v1086_v16 = vld [vmem:[%s5652_s5 + $0x5b8] sm:$0xff] }
 0x161   :  { %v2562_v29 = vpop.eup %2561  ;;  %1363 = vmatpush.msra.mxu2 %v1078_v20  ;;  %1383 = vmatpush.msra.mxu3 %v1094_v21  ;;  %v847_v49 = vand.u32 2147483647, %v831_v39  ;;  %v1034_v18 = vld [vmem:[%s5652_s5 + $0x418] sm:$0xff]  ;;  %v1069_v20 = vld [vmem:[%s5652_s5 + $0x530] sm:$0xff]  ;;  %v1048_v30 = vld [vmem:[%s5652_s5 + $0x488] sm:$0xff] }
 0x162   :  { %v2564_v24 = vpop.eup %2563  ;;  %2565 = vpow2.f32 %v883_v25  ;;  %1259 = vmatmul.f32.vlgmr.msrb.gmra.mxu0 %v2562_v29  ;;  %1347 = vmatpush.msra.mxu1 %v1058_v23  ;;  %v848_v55 = vand.u32 2147483647, %v832_v42  ;;  %v1050_v19 = vld [vmem:[%s5652_s5 + $0x498] sm:$0xff]  ;;  %v1085_v21 = vld [vmem:[%s5652_s5 + $0x5b0] sm:$0xff]  ;;  %v1032_v29 = vld [vmem:[%s5652_s5 + $0x408] sm:$0xff] }
 0x163   :  { %2567 = vpow2.f32 %v885_v26  ;;  %1279 = vmatmul.f32.vlgmr.msrb.gmra.mxu1 %v2564_v24  ;;  %1327 = vmatpush.msra.mxu0 %v1042_v28  ;;  %v863_v0 = vsub.f32 0.0, %v847_v49  ;;  %v1033_v23 = vld [vmem:[%s5652_s5 + $0x410] sm:$0xff]  ;;  %v1084_v28 = vld [vmem:[%s5652_s5 + $0x5a8] sm:$0xff]  ;;  %v1067_v31 = vld [vmem:[%s5652_s5 + $0x520] sm:$0xff] }
 0x164   :  { %1364 = vmatpush.msra.mxu2 %v1077_v32  ;;  %1384 = vmatpush.msra.mxu3 %v1093_v33  ;;  %v864_v4 = vsub.f32 0.0, %v848_v55  ;;  %v1049_v25 = vld [vmem:[%s5652_s5 + $0x490] sm:$0xff]  ;;  %v1083_v32 = vld [vmem:[%s5652_s5 + $0x5a0] sm:$0xff]  ;;  %v1110_v39 = vld [vmem:[%s5652_s5 + $0x678] sm:$0xff] }
 0x165   :  { %1328 = vmatpush.msra.mxu0 %v1041_v35  ;;  %1348 = vmatpush.msra.mxu1 %v1057_v36  ;;  %v684_v50 = vpop.f32.mrf.mxu2  ;;  %v704_v56 = vpop.f32.mrf.mxu3  ;;  %v887_v12 = vmul.f32 1.442695, %v863_v0  ;;  %v1031_v24 = vld [vmem:[%s5652_s5 + $0x400] sm:$0xff]  ;;  %v1066_v36 = vld [vmem:[%s5652_s5 + $0x518] sm:$0xff]  ;;  %v1065_v42 = vld [vmem:[%s5652_s5 + $0x510] sm:$0xff] }
 0x166   :  { %1365 = vmatpush.msra.mxu2 %v1076_v37  ;;  %1385 = vmatpush.msra.mxu3 %v1092_v38  ;;  %v833_v61 = vsub.f32 %v684_v50, %v801_v46  ;;  %v834_v1 = vsub.f32 %v704_v56, %v802_v51  ;;  %v889_v17 = vmul.f32 1.442695, %v864_v4  ;;  %v1047_v34 = vld [vmem:[%s5652_s5 + $0x480] sm:$0xff]  ;;  %v1082_v37 = vld [vmem:[%s5652_s5 + $0x598] sm:$0xff]  ;;  %v1064_v46 = vld [vmem:[%s5652_s5 + $0x508] sm:$0xff]  ;;  %v803_v56 = vperm.slane %v4054_v15, 4 }
 0x167   :  { %1329 = vmatpush.msra.mxu0 %v1040_v40  ;;  %1349 = vmatpush.msra.mxu1 %v1056_v41  ;;  %2569 = vpow2.f32 %v887_v12  ;;  %v1126_v40 = vld [vmem:[%s5652_s5 + $0x6f8] sm:$0xff]  ;;  %v1124_v49 = vld [vmem:[%s5652_s5 + $0x6e8] sm:$0xff]  ;;  %v1063_v50 = vld [vmem:[%s5652_s5 + $0x500] sm:$0xff] }
 0x168   :  { %v2566_v48 = vpop.eup %2565  ;;  %1366 = vmatpush.msra.mxu2 %v1075_v43  ;;  %1386 = vmatpush.msra.mxu3 %v1091_v44  ;;  %v849_v9 = vand.u32 2147483647, %v833_v61  ;;  %v850_v13 = vand.u32 2147483647, %v834_v1  ;;  %2571 = vpow2.f32 %v889_v17  ;;  %v1081_v43 = vld [vmem:[%s5652_s5 + $0x590] sm:$0xff]  ;;  %v1079_v51 = vld [vmem:[%s5652_s5 + $0x580] sm:$0xff] }
 0x169   :  { %v2568_v54 = vpop.eup %2567  ;;  %1299 = vmatmul.f32.vlgmr.msrb.gmra.mxu2 %v2566_v48  ;;  %1330 = vmatpush.msra.mxu0 %v1039_v45  ;;  %v1109_v44 = vld [vmem:[%s5652_s5 + $0x670] sm:$0xff]  ;;  %v1108_v48 = vld [vmem:[%s5652_s5 + $0x668] sm:$0xff]  ;;  %v1106_v61 = vld [vmem:[%s5652_s5 + $0x658] sm:$0xff] }
 0x16a   :  { %1319 = vmatmul.f32.vlgmr.msrb.gmra.mxu3 %v2568_v54  ;;  %1350 = vmatpush.msra.mxu1 %v1055_v47  ;;  %v865_v22 = vsub.f32 0.0, %v849_v9  ;;  %v866_v26 = vsub.f32 0.0, %v850_v13  ;;  %v1125_v45 = vld [vmem:[%s5652_s5 + $0x6f0] sm:$0xff]  ;;  %v1080_v47 = vld [vmem:[%s5652_s5 + $0x588] sm:$0xff]  ;;  %v1123_v54 = vld [vmem:[%s5652_s5 + $0x6e0] sm:$0xff] }
 0x16b   :  { %1367 = vmatpush.msra.mxu2 %v1074_v52  ;;  %1387 = vmatpush.msra.mxu3 %v1090_v53  ;;  %v1107_v53 = vld [vmem:[%s5652_s5 + $0x660] sm:$0xff]  ;;  %v1141_v0 = vld [vmem:[%s5652_s5 + $0x770] sm:$0xff]  ;;  %v1120_v9 = vld [vmem:[%s5652_s5 + $0x6c8] sm:$0xff] }
 0x16c   :  { %1331 = vmatpush.msra.mxu0 %v1038_v57  ;;  %1351 = vmatpush.msra.mxu1 %v1054_v58  ;;  %v891_v33 = vmul.f32 1.442695, %v865_v22  ;;  %v893_v35 = vmul.f32 1.442695, %v866_v26  ;;  %v1142_v57 = vld [vmem:[%s5652_s5 + $0x778] sm:$0xff]  ;;  %v1157_v1 = vld [vmem:[%s5652_s5 + $0x7f0] sm:$0xff] }
 0x16d   :  { %1368 = vmatpush.msra.mxu2 %v1073_v59  ;;  %1388 = vmatpush.msra.mxu3 %v1089_v60  ;;  %v2570_v38 = vpop.eup %2569  ;;  %v1158_v58 = vld [vmem:[%s5652_s5 + $0x7f8] sm:$0xff]  ;;  %v804_v60 = vperm.slane %v4054_v15, 5  ;;  %v1155_v12 = vld [vmem:[%s5652_s5 + $0x7e0] sm:$0xff]  ;;  %v1137_v26 = vld [vmem:[%s5652_s5 + $0x750] sm:$0xff] }
 0x16e   :  { %1332 = vmatpush.msra.mxu0 %v1037_v62  ;;  %1352 = vmatpush.msra.mxu1 %v1053_v63  ;;  %v2572_v41 = vpop.eup %2571  ;;  %2573 = vpow2.f32 %v891_v33  ;;  %v724_v59 = vpop.f32.mrf.mxu0  ;;  %v1122_v62 = vld [vmem:[%s5652_s5 + $0x6d8] sm:$0xff]  ;;  %v1119_v17 = vld [vmem:[%s5652_s5 + $0x6c0] sm:$0xff]  ;;  %v1152_v33 = vld [vmem:[%s5652_s5 + $0x7c8] sm:$0xff] }
 0x16f   :  { %1369 = vmatpush.msra.mxu2 %v1072_v2  ;;  %1389 = vmatpush.msra.mxu3 %v1088_v3  ;;  %2575 = vpow2.f32 %v893_v35  ;;  %v744_v63 = vpop.f32.mrf.mxu1  ;;  %v1105_v2 = vld [vmem:[%s5652_s5 + $0x650] sm:$0xff]  ;;  %v835_v4 = vsub.f32 %v724_v59, %v803_v56  ;;  %v1102_v22 = vld [vmem:[%s5652_s5 + $0x638] sm:$0xff]  ;;  %v1116_v35 = vld [vmem:[%s5652_s5 + $0x6a8] sm:$0xff] }
 0x170   :  { %1333 = vmatpush.msra.mxu0 %v1036_v5  ;;  %1353 = vmatpush.msra.mxu1 %v1052_v6  ;;  %v1121_v3 = vld [vmem:[%s5652_s5 + $0x6d0] sm:$0xff]  ;;  %v1140_v5 = vld [vmem:[%s5652_s5 + $0x768] sm:$0xff]  ;;  %v1131_v59 = vld [vmem:[%s5652_s5 + $0x720] sm:$0xff] }
 0x171   :  { %1370 = vmatpush.msra.mxu2 %v1071_v7  ;;  %1390 = vmatpush.msra.mxu3 %v1087_v8  ;;  %v1156_v6 = vld [vmem:[%s5652_s5 + $0x7e8] sm:$0xff]  ;;  %v836_v7 = vsub.f32 %v744_v63, %v804_v60  ;;  %v1147_v60 = vld [vmem:[%s5652_s5 + $0x7a0] sm:$0xff] }
 0x172   :  { %1334 = vmatpush.msra.mxu0 %v1035_v10  ;;  %1354 = vmatpush.msra.mxu1 %v1051_v11  ;;  %v1104_v8 = vld [vmem:[%s5652_s5 + $0x648] sm:$0xff]  ;;  %v805_v10 = vperm.slane %v4054_v15, 6  ;;  %v1139_v11 = vld [vmem:[%s5652_s5 + $0x760] sm:$0xff] }
 0x173   :  { %1371 = vmatpush.msra.mxu2 %v1070_v14  ;;  %1391 = vmatpush.msra.mxu3 %v1086_v16  ;;  %v806_v14 = vperm.slane %v4054_v15, 7  ;;  %v1103_v16 = vld [vmem:[%s5652_s5 + $0x640] sm:$0xff]  ;;  %v1154_v15 = vld [vmem:[%s5652_s5 + $0x7d8] sm:$0xff]  ;;  %v1096_v56 = vld [vmem:[%s5652_s5 + $0x608] sm:$0xff] }
 0x174   :  { %1335 = vmatpush.msra.mxu0 %v1034_v18  ;;  %1355 = vmatpush.msra.mxu1 %v1050_v19  ;;  %v2574_v52 = vpop.eup %2573  ;;  %v851_v18 = vand.u32 2147483647, %v835_v4  ;;  %v1111_v63 = vld [vmem:[%s5652_s5 + $0x680] sm:$0xff]  ;;  %v1145_v4 = vld [vmem:[%s5652_s5 + $0x790] sm:$0xff] }
 0x175   :  { %1372 = vmatpush.msra.mxu2 %v1069_v20  ;;  %1392 = vmatpush.msra.mxu3 %v1085_v21  ;;  %v2576_v55 = vpop.eup %2575  ;;  %v764_v13 = vpop.f32.mrf.mxu2  ;;  %v1138_v20 = vld [vmem:[%s5652_s5 + $0x758] sm:$0xff]  ;;  %v852_v21 = vand.u32 2147483647, %v836_v7  ;;  %v1144_v7 = vld [vmem:[%s5652_s5 + $0x788] sm:$0xff] }
 0x176   :  { %1336 = vmatpush.msra.mxu0 %v1033_v23  ;;  %1356 = vmatpush.msra.mxu1 %v1049_v25  ;;  %v784_v19 = vpop.f32.mrf.mxu3  ;;  %v1118_v23 = vld [vmem:[%s5652_s5 + $0x6b8] sm:$0xff]  ;;  %v837_v25 = vsub.f32 %v764_v13, %v805_v10  ;;  %v2621_v10 = vld [vmem:[%s5651_s1 + $0x380] sm:$0xff] }
 0x177   :  { %1373 = vmatpush.msra.mxu2 %v1068_v27  ;;  %1393 = vmatpush.msra.mxu3 %v1084_v28  ;;  %v1153_v27 = vld [vmem:[%s5652_s5 + $0x7d0] sm:$0xff]  ;;  %v838_v28 = vsub.f32 %v784_v19, %v806_v14  ;;  %v2623_v13 = vld [vmem:[%s5651_s1 + $0x300] sm:$0xff]  ;;  %v2624_v14 = vld [vmem:[%s5651_s1 + $0x308] sm:$0xff] }
 0x178   :  { %1337 = vmatpush.msra.mxu0 %v1032_v29  ;;  %1357 = vmatpush.msra.mxu1 %v1048_v30  ;;  %v1101_v29 = vld [vmem:[%s5652_s5 + $0x630] sm:$0xff]  ;;  %v2627_v19 = vld [vmem:[%s5651_s1 + $0x280] sm:$0xff] }
 0x179   :  { %1374 = vmatpush.msra.mxu2 %v1067_v31  ;;  %1394 = vmatpush.msra.mxu3 %v1083_v32  ;;  %v1117_v30 = vld [vmem:[%s5652_s5 + $0x6b0] sm:$0xff]  ;;  %v867_v31 = vsub.f32 0.0, %v851_v18  ;;  %v1136_v32 = vld [vmem:[%s5652_s5 + $0x748] sm:$0xff]  ;;  %v2626_v18 = vld [vmem:[%s5651_s1 + $0x398] sm:$0xff] }
 0x17a   :  { %1338 = vmatpush.msra.mxu0 %v1031_v24  ;;  %1358 = vmatpush.msra.mxu1 %v1047_v34  ;;  %v868_v24 = vsub.f32 0.0, %v852_v21  ;;  %v1100_v34 = vld [vmem:[%s5652_s5 + $0x628] sm:$0xff]  ;;  %v2630_v21 = vld [vmem:[%s5651_s1 + $0x318] sm:$0xff] }
 0x17b   :  { %1375 = vmatpush.msra.mxu2 %v1066_v36  ;;  %1395 = vmatpush.msra.mxu3 %v1082_v37  ;;  %v853_v36 = vand.u32 2147483647, %v837_v25  ;;  %v1135_v37 = vld [vmem:[%s5652_s5 + $0x740] sm:$0xff]  ;;  %v2633_v25 = vld [vmem:[%s5651_s1 + $0x290] sm:$0xff] }
 0x17c   :  { %1339 = vmatmul.f32.vlgmr.msra.gmra.mxu0 %v2570_v38  ;;  %1359 = vmatmul.f32.vlgmr.msra.gmra.mxu1 %v2572_v41  ;;  %v1151_v38 = vld [vmem:[%s5652_s5 + $0x7c0] sm:$0xff] }
 0x17d   :  { %1403 = vmatpush.msrb.mxu0 %v1110_v39  ;;  %1423 = vmatpush.msrb.mxu1 %v1126_v40  ;;  %v854_v39 = vand.u32 2147483647, %v838_v28  ;;  %v1099_v40 = vld [vmem:[%s5652_s5 + $0x620] sm:$0xff]  ;;  %v2636_v28 = vld [vmem:[%s5651_s1 + $0x188] sm:$0xff] }
 0x17e   :  { %1376 = vmatpush.msra.mxu2 %v1065_v42  ;;  %1396 = vmatpush.msra.mxu3 %v1081_v43  ;;  %v1115_v41 = vld [vmem:[%s5652_s5 + $0x6a0] sm:$0xff]  ;;  %v895_v42 = vmul.f32 1.442695, %v867_v31  ;;  %v1134_v43 = vld [vmem:[%s5652_s5 + $0x738] sm:$0xff] }
 0x17f   :  { %1404 = vmatpush.msrb.mxu0 %v1109_v44  ;;  %1424 = vmatpush.msrb.mxu1 %v1125_v45  ;;  %v1150_v44 = vld [vmem:[%s5652_s5 + $0x7b8] sm:$0xff]  ;;  %v897_v45 = vmul.f32 1.442695, %v868_v24  ;;  %v2639_v31 = vld [vmem:[%s5651_s1 + $0x100] sm:$0xff] }
 0x180   :  { %1377 = vmatpush.msra.mxu2 %v1064_v46  ;;  %1397 = vmatpush.msra.mxu3 %v1080_v47  ;;  %v1098_v46 = vld [vmem:[%s5652_s5 + $0x618] sm:$0xff]  ;;  %2577 = vpow2.f32 %v895_v42  ;;  %v2651_v42 = vld [vmem:[%s5651_s1 + $0x3a0] sm:$0xff] }
 0x181   :  { %1405 = vmatpush.msrb.mxu0 %v1108_v48  ;;  %1425 = vmatpush.msrb.mxu1 %v1124_v49  ;;  %v1114_v47 = vld [vmem:[%s5652_s5 + $0x698] sm:$0xff]  ;;  %v869_v48 = vsub.f32 0.0, %v853_v36  ;;  %v1133_v49 = vld [vmem:[%s5652_s5 + $0x730] sm:$0xff]  ;;  %2579 = vpow2.f32 %v897_v45 }
 0x182   :  { %1378 = vmatpush.msra.mxu2 %v1063_v50  ;;  %1398 = vmatpush.msra.mxu3 %v1079_v51  ;;  %v1149_v50 = vld [vmem:[%s5652_s5 + $0x7b0] sm:$0xff]  ;;  %v870_v51 = vsub.f32 0.0, %v854_v39  ;;  %v2642_v24 = vld [vmem:[%s5651_s1 + $0x198] sm:$0xff]  ;;  %v2648_v39 = vld [vmem:[%s5651_s1 + $0x8] sm:$0xff] }
 0x183   :  { %1379 = vmatmul.f32.vlgmr.msra.gmra.mxu2 %v2574_v52  ;;  %1399 = vmatmul.f32.vlgmr.msra.gmra.mxu3 %v2576_v55  ;;  %v1097_v52 = vld [vmem:[%s5652_s5 + $0x610] sm:$0xff]  ;;  %v1148_v55 = vld [vmem:[%s5652_s5 + $0x7a8] sm:$0xff]  ;;  %v2654_v45 = vld [vmem:[%s5651_s1 + $0x18] sm:$0xff] }
 0x184   :  { %1406 = vmatpush.msrb.mxu0 %v1107_v53  ;;  %1426 = vmatpush.msrb.mxu1 %v1123_v54  ;;  %v1113_v53 = vld [vmem:[%s5652_s5 + $0x690] sm:$0xff]  ;;  %v1132_v54 = vld [vmem:[%s5652_s5 + $0x728] sm:$0xff] }
 0x185   :  { %1443 = vmatpush.msrb.mxu2 %v1142_v57  ;;  %1463 = vmatpush.msrb.mxu3 %v1158_v58  ;;  %v1112_v57 = vld [vmem:[%s5652_s5 + $0x688] sm:$0xff]  ;;  %v899_v58 = vmul.f32 1.442695, %v869_v48  ;;  %v2645_v36 = vld [vmem:[%s5651_s1 + $0x110] sm:$0xff]  ;;  %v2657_v48 = vld [vmem:[%s5651_s1 + $0x320] sm:$0xff] }
 0x186   :  { %1407 = vmatpush.msrb.mxu0 %v1106_v61  ;;  %1427 = vmatpush.msrb.mxu1 %v1122_v62  ;;  %v901_v61 = vmul.f32 1.442695, %v870_v51  ;;  %v1095_v62 = vld [vmem:[%s5652_s5 + $0x600] sm:$0xff]  ;;  %v2660_v51 = vld [vmem:[%s5651_s1 + $0x338] sm:$0xff] }
 0x187   :  { %1444 = vmatpush.msrb.mxu2 %v1141_v0  ;;  %1464 = vmatpush.msrb.mxu3 %v1157_v1  ;;  %v1130_v0 = vld [vmem:[%s5652_s5 + $0x718] sm:$0xff]  ;;  %2581 = vpow2.f32 %v899_v58  ;;  %v2667_v58 = vld [vmem:[%s5651_s1 + $0x230] sm:$0xff] }
 0x188   :  { %1408 = vmatpush.msrb.mxu0 %v1105_v2  ;;  %1428 = vmatpush.msrb.mxu1 %v1121_v3  ;;  %v1146_v1 = vld [vmem:[%s5652_s5 + $0x798] sm:$0xff]  ;;  %v2578_v2 = vpop.eup %2577  ;;  %v1129_v3 = vld [vmem:[%s5652_s5 + $0x710] sm:$0xff]  ;;  %2583 = vpow2.f32 %v901_v61  ;;  %v2670_v61 = vld [vmem:[%s5651_s1 + $0x1a8] sm:$0xff] }
 0x189   :  { %1445 = vmatpush.msrb.mxu2 %v1140_v5  ;;  %1465 = vmatpush.msrb.mxu3 %v1156_v6  ;;  %v2580_v5 = vpop.eup %2579  ;;  %v1128_v6 = vld [vmem:[%s5652_s5 + $0x708] sm:$0xff] }
 0x18a   :  { %1409 = vmatpush.msrb.mxu0 %v1104_v8  ;;  %1429 = vmatpush.msrb.mxu1 %v1120_v9  ;;  %v1127_v8 = vld [vmem:[%s5652_s5 + $0x700] sm:$0xff] }
 0x18b   :  { %1446 = vmatpush.msrb.mxu2 %v1139_v11  ;;  %1466 = vmatpush.msrb.mxu3 %v1155_v12  ;;  %v1143_v9 = vld [vmem:[%s5652_s5 + $0x780] sm:$0xff]  ;;  %v2622_v11 = vld [vmem:[%s5651_s1 + $0x388] sm:$0xff] }
 0x18c   :  { %1410 = vmatpush.msrb.mxu0 %v1103_v16  ;;  %1430 = vmatpush.msrb.mxu1 %v1119_v17  ;;  %v2625_v17 = vld [vmem:[%s5651_s1 + $0x390] sm:$0xff] }
 0x18d   :  { %1447 = vmatpush.msrb.mxu2 %v1138_v20  ;;  %1467 = vmatpush.msrb.mxu3 %v1154_v15  ;;  %v2582_v12 = vpop.eup %2581  ;;  %v2628_v20 = vld [vmem:[%s5651_s1 + $0x288] sm:$0xff]  ;;  %v2629_v15 = vld [vmem:[%s5651_s1 + $0x310] sm:$0xff] }
 0x18e   :  { %1411 = vmatpush.msrb.mxu0 %v1102_v22  ;;  %1431 = vmatpush.msrb.mxu1 %v1118_v23  ;;  %v2584_v16 = vpop.eup %2583  ;;  %v2631_v22 = vld [vmem:[%s5651_s1 + $0x200] sm:$0xff]  ;;  %v2632_v23 = vld [vmem:[%s5651_s1 + $0x208] sm:$0xff] }
 0x18f   :  { %1448 = vmatpush.msrb.mxu2 %v1137_v26  ;;  %1468 = vmatpush.msrb.mxu3 %v1153_v27  ;;  %v2634_v26 = vld [vmem:[%s5651_s1 + $0x298] sm:$0xff]  ;;  %v2635_v27 = vld [vmem:[%s5651_s1 + $0x180] sm:$0xff] }
 0x190   :  { %1412 = vmatpush.msrb.mxu0 %v1101_v29  ;;  %1432 = vmatpush.msrb.mxu1 %v1117_v30  ;;  %v2637_v29 = vld [vmem:[%s5651_s1 + $0x210] sm:$0xff]  ;;  %v2638_v30 = vld [vmem:[%s5651_s1 + $0x218] sm:$0xff] }
 0x191   :  { %1449 = vmatpush.msrb.mxu2 %v1136_v32  ;;  %1469 = vmatpush.msrb.mxu3 %v1152_v33  ;;  %v2640_v32 = vld [vmem:[%s5651_s1 + $0x108] sm:$0xff]  ;;  %v2641_v33 = vld [vmem:[%s5651_s1 + $0x190] sm:$0xff] }
 0x192   :  { %1413 = vmatpush.msrb.mxu0 %v1100_v34  ;;  %1433 = vmatpush.msrb.mxu1 %v1116_v35  ;;  %v2643_v34 = vld [vmem:[%s5651_s1 + $0x80] sm:$0xff]  ;;  %v2644_v35 = vld [vmem:[%s5651_s1 + $0x88] sm:$0xff] }
 0x193   :  { %1450 = vmatpush.msrb.mxu2 %v1135_v37  ;;  %1470 = vmatpush.msrb.mxu3 %v1151_v38  ;;  %v2646_v37 = vld [vmem:[%s5651_s1 + $0x118] sm:$0xff]  ;;  %v2647_v38 = vld [vmem:[%s5651_s1] sm:$0xff] }
 0x194   :  { %1414 = vmatpush.msrb.mxu0 %v1099_v40  ;;  %1434 = vmatpush.msrb.mxu1 %v1115_v41  ;;  %v2649_v40 = vld [vmem:[%s5651_s1 + $0x90] sm:$0xff]  ;;  %v2650_v41 = vld [vmem:[%s5651_s1 + $0x98] sm:$0xff] }
 0x195   :  { %1451 = vmatpush.msrb.mxu2 %v1134_v43  ;;  %1471 = vmatpush.msrb.mxu3 %v1150_v44  ;;  %v2652_v43 = vld [vmem:[%s5651_s1 + $0x3a8] sm:$0xff]  ;;  %v2653_v44 = vld [vmem:[%s5651_s1 + $0x10] sm:$0xff] }
 0x196   :  { %1415 = vmatpush.msrb.mxu0 %v1098_v46  ;;  %1435 = vmatpush.msrb.mxu1 %v1114_v47  ;;  %v2655_v46 = vld [vmem:[%s5651_s1 + $0x3b0] sm:$0xff]  ;;  %v2656_v47 = vld [vmem:[%s5651_s1 + $0x3b8] sm:$0xff] }
 0x197   :  { %1452 = vmatpush.msrb.mxu2 %v1133_v49  ;;  %1472 = vmatpush.msrb.mxu3 %v1149_v50  ;;  %v2658_v49 = vld [vmem:[%s5651_s1 + $0x328] sm:$0xff]  ;;  %v2659_v50 = vld [vmem:[%s5651_s1 + $0x330] sm:$0xff] }
 0x198   :  { %1416 = vmatpush.msrb.mxu0 %v1097_v52  ;;  %1436 = vmatpush.msrb.mxu1 %v1113_v53  ;;  %v2661_v52 = vld [vmem:[%s5651_s1 + $0x2a0] sm:$0xff]  ;;  %v2662_v53 = vld [vmem:[%s5651_s1 + $0x2a8] sm:$0xff] }
 0x199   :  { %1453 = vmatpush.msrb.mxu2 %v1132_v54  ;;  %1473 = vmatpush.msrb.mxu3 %v1148_v55  ;;  %v2663_v54 = vld [vmem:[%s5651_s1 + $0x2b0] sm:$0xff]  ;;  %v2664_v55 = vld [vmem:[%s5651_s1 + $0x2b8] sm:$0xff] }
 0x19a   :  { %1417 = vmatpush.msrb.mxu0 %v1096_v56  ;;  %1437 = vmatpush.msrb.mxu1 %v1112_v57  ;;  %v2665_v56 = vld [vmem:[%s5651_s1 + $0x220] sm:$0xff]  ;;  %v2666_v57 = vld [vmem:[%s5651_s1 + $0x228] sm:$0xff] }
 0x19b   :  { %1454 = vmatpush.msrb.mxu2 %v1131_v59  ;;  %1474 = vmatpush.msrb.mxu3 %v1147_v60  ;;  %v2668_v59 = vld [vmem:[%s5651_s1 + $0x238] sm:$0xff]  ;;  %v2669_v60 = vld [vmem:[%s5651_s1 + $0x1a0] sm:$0xff] }
 0x19c   :  { %1418 = vmatpush.msrb.mxu0 %v1095_v62  ;;  %1438 = vmatpush.msrb.mxu1 %v1111_v63  ;;  %v2671_v62 = vld [vmem:[%s5651_s1 + $0x1b0] sm:$0xff]  ;;  %v2672_v63 = vld [vmem:[%s5651_s1 + $0x1b8] sm:$0xff] }
 0x19d   :  { %1455 = vmatpush.msrb.mxu2 %v1130_v0  ;;  %1475 = vmatpush.msrb.mxu3 %v1146_v1  ;;  %v2673_v0 = vld [vmem:[%s5651_s1 + $0x120] sm:$0xff]  ;;  %v2674_v1 = vld [vmem:[%s5651_s1 + $0x128] sm:$0xff] }
 0x19e   :  { %1419 = vmatmul.f32.vlgmr.msrb.gmra.mxu0 %v2578_v2  ;;  %1439 = vmatmul.f32.vlgmr.msrb.gmra.mxu1 %v2580_v5  ;;  %v2675_v2 = vld [vmem:[%s5651_s1 + $0x130] sm:$0xff]  ;;  %v2678_v5 = vld [vmem:[%s5651_s1 + $0xa8] sm:$0xff] }
 0x19f   :  { %1456 = vmatpush.msrb.mxu2 %v1129_v3  ;;  %1476 = vmatpush.msrb.mxu3 %v1145_v4  ;;  %v2676_v3 = vld [vmem:[%s5651_s1 + $0x138] sm:$0xff]  ;;  %v2677_v4 = vld [vmem:[%s5651_s1 + $0xa0] sm:$0xff] }
 0x1a0   :  { %1494 = vmatpush.msra.mxu0 %v2621_v10  ;;  %1514 = vmatpush.msra.mxu1 %v2622_v11  ;;  %v2683_v10 = vld [vmem:[%s5651_s1 + $0x30] sm:$0xff]  ;;  %v2684_v11 = vld [vmem:[%s5651_s1 + $0x38] sm:$0xff] }
 0x1a1   :  { %1457 = vmatpush.msrb.mxu2 %v1128_v6  ;;  %1477 = vmatpush.msrb.mxu3 %v1144_v7  ;;  %v2679_v6 = vld [vmem:[%s5651_s1 + $0xb0] sm:$0xff]  ;;  %v2680_v7 = vld [vmem:[%s5651_s1 + $0xb8] sm:$0xff] }
 0x1a2   :  { %1495 = vmatpush.msra.mxu0 %v2623_v13  ;;  %1515 = vmatpush.msra.mxu1 %v2624_v14 }
 0x1a3   :  { %1458 = vmatpush.msrb.mxu2 %v1127_v8  ;;  %1478 = vmatpush.msrb.mxu3 %v1143_v9  ;;  %v2681_v8 = vld [vmem:[%s5651_s1 + $0x20] sm:$0xff]  ;;  %v2682_v9 = vld [vmem:[%s5651_s1 + $0x28] sm:$0xff] }
 0x1a4   :  { %1459 = vmatmul.f32.vlgmr.msrb.gmra.mxu2 %v2582_v12  ;;  %1479 = vmatmul.f32.vlgmr.msrb.gmra.mxu3 %v2584_v16  ;;  %v2551_v12 = vld [vmem:[%s5653_s6] ss:$0 sm:$0xff] }
 0x1a5   :  { %1534 = vmatpush.msra.mxu2 %v2625_v17  ;;  %1554 = vmatpush.msra.mxu3 %v2626_v18 }
 0x1a6   :  { %1496 = vmatpush.msra.mxu0 %v2627_v19  ;;  %1516 = vmatpush.msra.mxu1 %v2628_v20 }
 0x1a7   :  { %1535 = vmatpush.msra.mxu2 %v2629_v15  ;;  %1555 = vmatpush.msra.mxu3 %v2630_v21 }
 0x1a8   :  { %1497 = vmatpush.msra.mxu0 %v2631_v22  ;;  %1517 = vmatpush.msra.mxu1 %v2632_v23 }
 0x1a9   :  { %1536 = vmatpush.msra.mxu2 %v2633_v25  ;;  %1556 = vmatpush.msra.mxu3 %v2634_v26 }
 0x1aa   :  { %1498 = vmatpush.msra.mxu0 %v2635_v27  ;;  %1518 = vmatpush.msra.mxu1 %v2636_v28 }
 0x1ab   :  { %1537 = vmatpush.msra.mxu2 %v2637_v29  ;;  %1557 = vmatpush.msra.mxu3 %v2638_v30 }
 0x1ac   :  { %1499 = vmatpush.msra.mxu0 %v2639_v31  ;;  %1519 = vmatpush.msra.mxu1 %v2640_v32 }
 0x1ad   :  { %1538 = vmatpush.msra.mxu2 %v2641_v33  ;;  %1558 = vmatpush.msra.mxu3 %v2642_v24 }
 0x1ae   :  { %1500 = vmatpush.msra.mxu0 %v2643_v34  ;;  %1520 = vmatpush.msra.mxu1 %v2644_v35 }
 0x1af   :  { %1539 = vmatpush.msra.mxu2 %v2645_v36  ;;  %1559 = vmatpush.msra.mxu3 %v2646_v37 }
 0x1b0   :  { %1501 = vmatpush.msra.mxu0 %v2647_v38  ;;  %1521 = vmatpush.msra.mxu1 %v2648_v39 }
 0x1b1   :  { %1540 = vmatpush.msra.mxu2 %v2649_v40  ;;  %1560 = vmatpush.msra.mxu3 %v2650_v41 }
 0x1b2   :  { %1574 = vmatpush.msrb.mxu0 %v2651_v42  ;;  %1594 = vmatpush.msrb.mxu1 %v2652_v43 }
 0x1b3   :  { %1541 = vmatpush.msra.mxu2 %v2653_v44  ;;  %1561 = vmatpush.msra.mxu3 %v2654_v45  ;;  %v2685_v45 = vld [vmem:[%s5651_s1 + $0x3c0] sm:$0xff] }
 0x1b4   :  { %1575 = vmatpush.msrb.mxu0 %v2657_v48  ;;  %1595 = vmatpush.msrb.mxu1 %v2658_v49  ;;  %v2688_v48 = vld [vmem:[%s5651_s1 + $0x3d8] sm:$0xff]  ;;  %v2689_v49 = vld [vmem:[%s5651_s1 + $0x340] sm:$0xff] }
 0x1b5   :  { %1614 = vmatpush.msrb.mxu2 %v2655_v46  ;;  %1634 = vmatpush.msrb.mxu3 %v2656_v47  ;;  %v2686_v46 = vld [vmem:[%s5651_s1 + $0x3c8] sm:$0xff]  ;;  %v2687_v47 = vld [vmem:[%s5651_s1 + $0x3d0] sm:$0xff] }
 0x1b6   :  { %1576 = vmatpush.msrb.mxu0 %v2661_v52  ;;  %1596 = vmatpush.msrb.mxu1 %v2662_v53  ;;  %v2692_v52 = vld [vmem:[%s5651_s1 + $0x358] sm:$0xff]  ;;  %v2693_v53 = vld [vmem:[%s5651_s1 + $0x2c0] sm:$0xff] }
 0x1b7   :  { %1615 = vmatpush.msrb.mxu2 %v2659_v50  ;;  %1635 = vmatpush.msrb.mxu3 %v2660_v51  ;;  %v2690_v50 = vld [vmem:[%s5651_s1 + $0x348] sm:$0xff]  ;;  %v2691_v51 = vld [vmem:[%s5651_s1 + $0x350] sm:$0xff] }
 0x1b8   :  { %1577 = vmatpush.msrb.mxu0 %v2665_v56  ;;  %1597 = vmatpush.msrb.mxu1 %v2666_v57  ;;  %v2696_v56 = vld [vmem:[%s5651_s1 + $0x2d8] sm:$0xff]  ;;  %v2697_v57 = vld [vmem:[%s5651_s1 + $0x240] sm:$0xff] }
 0x1b9   :  { %1616 = vmatpush.msrb.mxu2 %v2663_v54  ;;  %1636 = vmatpush.msrb.mxu3 %v2664_v55  ;;  %v2694_v54 = vld [vmem:[%s5651_s1 + $0x2c8] sm:$0xff]  ;;  %v2695_v55 = vld [vmem:[%s5651_s1 + $0x2d0] sm:$0xff] }
 0x1ba   :  { %1578 = vmatpush.msrb.mxu0 %v2669_v60  ;;  %1598 = vmatpush.msrb.mxu1 %v2670_v61  ;;  %v2700_v60 = vld [vmem:[%s5651_s1 + $0x258] sm:$0xff]  ;;  %v2701_v61 = vld [vmem:[%s5651_s1 + $0x1c0] sm:$0xff] }
 0x1bb   :  { %1617 = vmatpush.msrb.mxu2 %v2667_v58  ;;  %1637 = vmatpush.msrb.mxu3 %v2668_v59  ;;  %v2698_v58 = vld [vmem:[%s5651_s1 + $0x248] sm:$0xff]  ;;  %v2699_v59 = vld [vmem:[%s5651_s1 + $0x250] sm:$0xff] }
 0x1bc   :  { %1579 = vmatpush.msrb.mxu0 %v2673_v0  ;;  %1599 = vmatpush.msrb.mxu1 %v2674_v1  ;;  %v2704_v0 = vld [vmem:[%s5651_s1 + $0x1d8] sm:$0xff]  ;;  %v2705_v1 = vld [vmem:[%s5651_s1 + $0x140] sm:$0xff] }
 0x1bd   :  { %1618 = vmatpush.msrb.mxu2 %v2671_v62  ;;  %1638 = vmatpush.msrb.mxu3 %v2672_v63  ;;  %v2702_v62 = vld [vmem:[%s5651_s1 + $0x1c8] sm:$0xff]  ;;  %v2703_v63 = vld [vmem:[%s5651_s1 + $0x1d0] sm:$0xff] }
 0x1be   :  { %1580 = vmatpush.msrb.mxu0 %v2677_v4  ;;  %1600 = vmatpush.msrb.mxu1 %v2678_v5  ;;  %v2708_v4 = vld [vmem:[%s5651_s1 + $0x158] sm:$0xff]  ;;  %v2709_v5 = vld [vmem:[%s5651_s1 + $0xc0] sm:$0xff] }
 0x1bf   :  { %1619 = vmatpush.msrb.mxu2 %v2675_v2  ;;  %1639 = vmatpush.msrb.mxu3 %v2676_v3  ;;  %v2706_v2 = vld [vmem:[%s5651_s1 + $0x148] sm:$0xff]  ;;  %v2707_v3 = vld [vmem:[%s5651_s1 + $0x150] sm:$0xff] }
 0x1c0   :  { %1581 = vmatpush.msrb.mxu0 %v2681_v8  ;;  %1601 = vmatpush.msrb.mxu1 %v2682_v9  ;;  %v2712_v8 = vld [vmem:[%s5651_s1 + $0xd8] sm:$0xff]  ;;  %v2713_v9 = vld [vmem:[%s5651_s1 + $0x40] sm:$0xff] }
 0x1c1   :  { %1620 = vmatpush.msrb.mxu2 %v2679_v6  ;;  %1640 = vmatpush.msrb.mxu3 %v2680_v7  ;;  %v2710_v6 = vld [vmem:[%s5651_s1 + $0xc8] sm:$0xff]  ;;  %v2711_v7 = vld [vmem:[%s5651_s1 + $0xd0] sm:$0xff] }
 0x1c3   :  { %1621 = vmatpush.msrb.mxu2 %v2683_v10  ;;  %1641 = vmatpush.msrb.mxu3 %v2684_v11  ;;  %v2714_v10 = vld [vmem:[%s5651_s1 + $0x48] sm:$0xff]  ;;  %v2715_v11 = vld [vmem:[%s5651_s1 + $0x50] sm:$0xff] }
 0x1d5   :  { %v1180_v13 = vpop.f32.mrf.mxu0 }
 0x1d6   :  { %v1181_v14 = vadd.f32 %v2551_v12, %v1180_v13  ;;  %v1200_v16 = vpop.f32.mrf.mxu1  ;;  %v2716_v12 = vld [vmem:[%s5651_s1 + $0x58] sm:$0xff]  ;;  %v2717_v13 = vld [vmem:[%s5651_s1 + $0x3e0] sm:$0xff] }
 0x1d8   :  { %v1201_v18 = vadd.f32 %v1200_v16, %v1181_v14  ;;  %v2718_v14 = vld [vmem:[%s5651_s1 + $0x3e8] sm:$0xff]  ;;  %v2719_v16 = vld [vmem:[%s5651_s1 + $0x3f0] sm:$0xff] }
 0x1df   :  { %v1260_v21 = vpop.f32.mrf.mxu0 }
 0x1e0   :  { %v1280_v23 = vpop.f32.mrf.mxu1 }
 0x1e2   :  { %v1220_v17 = vpop.f32.mrf.mxu2 }
 0x1e3   :  { %v1221_v19 = vadd.f32 %v1220_v17, %v1201_v18  ;;  %v1240_v20 = vpop.f32.mrf.mxu3  ;;  %v2720_v17 = vld [vmem:[%s5651_s1 + $0x3f8] sm:$0xff]  ;;  %v2721_v18 = vld [vmem:[%s5651_s1 + $0x360] sm:$0xff] }
 0x1e5   :  { %v1241_v15 = vadd.f32 %v1240_v20, %v1221_v19  ;;  %v2722_v19 = vld [vmem:[%s5651_s1 + $0x368] sm:$0xff]  ;;  %v2723_v20 = vld [vmem:[%s5651_s1 + $0x370] sm:$0xff] }
 0x1e7   :  { %v1261_v22 = vadd.f32 %v1260_v21, %v1241_v15  ;;  %v2724_v15 = vld [vmem:[%s5651_s1 + $0x378] sm:$0xff]  ;;  %v2725_v21 = vld [vmem:[%s5651_s1 + $0x2e0] sm:$0xff] }
 0x1e9   :  { %v1281_v25 = vadd.f32 %v1280_v23, %v1261_v22  ;;  %v2726_v22 = vld [vmem:[%s5651_s1 + $0x2e8] sm:$0xff]  ;;  %v2727_v23 = vld [vmem:[%s5651_s1 + $0x2f0] sm:$0xff] }
 0x1ec   :  { %v1300_v26 = vpop.f32.mrf.mxu2 }
 0x1ed   :  { %v1301_v27 = vadd.f32 %v1300_v26, %v1281_v25  ;;  %v1320_v28 = vpop.f32.mrf.mxu3  ;;  %v2728_v25 = vld [vmem:[%s5651_s1 + $0x2f8] sm:$0xff]  ;;  %v2729_v26 = vld [vmem:[%s5651_s1 + $0x260] sm:$0xff] }
 0x1ef   :  { %v1321_v30 = vadd.f32 %v1320_v28, %v1301_v27  ;;  %v2730_v27 = vld [vmem:[%s5651_s1 + $0x268] sm:$0xff]  ;;  %v2731_v28 = vld [vmem:[%s5651_s1 + $0x270] sm:$0xff] }
 0x1f9   :  { %v1340_v29 = vpop.f32.mrf.mxu0  ;;  %v1360_v32 = vpop.f32.mrf.mxu1 }
 0x1fa   :  { %v1341_v31 = vadd.f32 %v1340_v29, %v1321_v30  ;;  %v2732_v29 = vld [vmem:[%s5651_s1 + $0x278] sm:$0xff]  ;;  %v2733_v30 = vld [vmem:[%s5651_s1 + $0x1e0] sm:$0xff] }
 0x1fc   :  { %v1361_v24 = vadd.f32 %v1360_v32, %v1341_v31  ;;  %v2734_v31 = vld [vmem:[%s5651_s1 + $0x1e8] sm:$0xff]  ;;  %v2735_v32 = vld [vmem:[%s5651_s1 + $0x1f0] sm:$0xff] }
 0x206   :  { %v1380_v33 = vpop.f32.mrf.mxu2  ;;  %v1400_v35 = vpop.f32.mrf.mxu3 }
 0x207   :  { %v1381_v34 = vadd.f32 %v1380_v33, %v1361_v24  ;;  %v2736_v33 = vld [vmem:[%s5651_s1 + $0x1f8] sm:$0xff]  ;;  %v2737_v24 = vld [vmem:[%s5651_s1 + $0x160] sm:$0xff] }
 0x209   :  { %v1401_v37 = vadd.f32 %v1400_v35, %v1381_v34  ;;  %v2738_v34 = vld [vmem:[%s5651_s1 + $0x168] sm:$0xff]  ;;  %v2739_v35 = vld [vmem:[%s5651_s1 + $0x170] sm:$0xff] }
 0x21b   :  { %v1420_v36 = vpop.f32.mrf.mxu0  ;;  %v1440_v39 = vpop.f32.mrf.mxu1 }
 0x21c   :  { %v1421_v38 = vadd.f32 %v1420_v36, %v1401_v37  ;;  %v2740_v36 = vld [vmem:[%s5651_s1 + $0x178] sm:$0xff]  ;;  %v2741_v37 = vld [vmem:[%s5651_s1 + $0xe0] sm:$0xff] }
 0x21e   :  { %v1441_v40 = vadd.f32 %v1440_v39, %v1421_v38  ;;  %v2742_v38 = vld [vmem:[%s5651_s1 + $0xe8] sm:$0xff]  ;;  %v2743_v39 = vld [vmem:[%s5651_s1 + $0xf0] sm:$0xff] }
 0x227   :  { %v1460_v41 = vpop.f32.mrf.mxu2  ;;  %v1480_v43 = vpop.f32.mrf.mxu3 }
 0x228   :  { %v1461_v42 = vadd.f32 %v1460_v41, %v1441_v40  ;;  %v2744_v40 = vld [vmem:[%s5651_s1 + $0xf8] sm:$0xff]  ;;  %v2745_v41 = vld [vmem:[%s5651_s1 + $0x60] sm:$0xff] }
 0x22a   :  { %v4622_v44 = vadd.f32 %v1480_v43, %v1461_v42  ;;  %v2746_v42 = vld [vmem:[%s5651_s1 + $0x68] sm:$0xff]  ;;  %v2747_v43 = vld [vmem:[%s5651_s1 + $0x70] sm:$0xff] }
 0x22c   :  { %2534 = vmatmul.msk.f32.vlgmr.msra.gmra.mxu0 %vm463_vm0, %v4622_v44  ;;  %2535 = vmatmul.msk.f32.vlgmr.msra.gmra.mxu1 %vm463_vm0, %v4622_v44 }
 0x22d   :  { %2536 = vmatmul.msk.f32.vlgmr.msra.gmra.mxu2 %vm463_vm0, %v4622_v44  ;;  %2537 = vmatmul.msk.f32.vlgmr.msra.gmra.mxu3 %vm463_vm0, %v4622_v44 }
 0x22e   :  { %1654 = vmatpush.msra.mxu0 %v2685_v45  ;;  %1674 = vmatpush.msra.mxu1 %v2686_v46  ;;  %v2748_v45 = vld [vmem:[%s5651_s1 + $0x78] sm:$0xff] }
 0x22f   :  { %1694 = vmatpush.msra.mxu2 %v2687_v47  ;;  %1714 = vmatpush.msra.mxu3 %v2688_v48  ;;  %v1937_v46 = vld [vmem:[%s5655_s8 + $0x78] sm:$0xff] }
 0x230   :  { %1655 = vmatpush.msra.mxu0 %v2689_v49  ;;  %1675 = vmatpush.msra.mxu1 %v2690_v50  ;;  %v1953_v47 = vld [vmem:[%s5655_s8 + $0xf8] sm:$0xff]  ;;  %v1936_v50 = vld [vmem:[%s5655_s8 + $0x70] sm:$0xff] }
 0x231   :  { %1695 = vmatpush.msra.mxu2 %v2691_v51  ;;  %1715 = vmatpush.msra.mxu3 %v2692_v52  ;;  %v1969_v48 = vld [vmem:[%s5655_s8 + $0x178] sm:$0xff]  ;;  %v1952_v51 = vld [vmem:[%s5655_s8 + $0xf0] sm:$0xff] }
 0x232   :  { %1656 = vmatpush.msra.mxu0 %v2693_v53  ;;  %1676 = vmatpush.msra.mxu1 %v2694_v54  ;;  %v1985_v49 = vld [vmem:[%s5655_s8 + $0x1f8] sm:$0xff]  ;;  %v1968_v52 = vld [vmem:[%s5655_s8 + $0x170] sm:$0xff]  ;;  %v1951_v54 = vld [vmem:[%s5655_s8 + $0xe8] sm:$0xff] }
 0x233   :  { %1696 = vmatpush.msra.mxu2 %v2695_v55  ;;  %1716 = vmatpush.msra.mxu3 %v2696_v56  ;;  %v1984_v53 = vld [vmem:[%s5655_s8 + $0x1f0] sm:$0xff]  ;;  %v1967_v55 = vld [vmem:[%s5655_s8 + $0x168] sm:$0xff] }
 0x234   :  { %1657 = vmatpush.msra.mxu0 %v2697_v57  ;;  %1677 = vmatpush.msra.mxu1 %v2698_v58  ;;  %v1983_v56 = vld [vmem:[%s5655_s8 + $0x1e8] sm:$0xff]  ;;  %v1934_v57 = vld [vmem:[%s5655_s8 + $0x60] sm:$0xff] }
 0x235   :  { %1697 = vmatpush.msra.mxu2 %v2699_v59  ;;  %1717 = vmatpush.msra.mxu3 %v2700_v60  ;;  %v1950_v58 = vld [vmem:[%s5655_s8 + $0xe0] sm:$0xff] }
 0x236   :  { %2538 = vmatmul.msk.f32.vlgmr.msrb.gmra.mxu0 %vm463_vm0, %v4622_v44  ;;  %2539 = vmatmul.msk.f32.vlgmr.msrb.gmra.mxu1 %vm463_vm0, %v4622_v44  ;;  %v1966_v59 = vld [vmem:[%s5655_s8 + $0x160] sm:$0xff] }
 0x237   :  { %2540 = vmatmul.msk.f32.vlgmr.msrb.gmra.mxu2 %vm463_vm0, %v4622_v44  ;;  %2541 = vmatmul.msk.f32.vlgmr.msrb.gmra.mxu3 %vm463_vm0, %v4622_v44  ;;  %v1982_v60 = vld [vmem:[%s5655_s8 + $0x1e0] sm:$0xff] }
 0x238   :  { %1658 = vmatpush.msra.mxu0 %v2701_v61  ;;  %1678 = vmatpush.msra.mxu1 %v2702_v62  ;;  %v1933_v61 = vld [vmem:[%s5655_s8 + $0x58] sm:$0xff] }
 0x239   :  { %1698 = vmatpush.msra.mxu2 %v2703_v63  ;;  %1718 = vmatpush.msra.mxu3 %v2704_v0  ;;  %v1949_v62 = vld [vmem:[%s5655_s8 + $0xd8] sm:$0xff] }
 0x23a   :  { %1659 = vmatpush.msra.mxu0 %v2705_v1  ;;  %1679 = vmatpush.msra.mxu1 %v2706_v2  ;;  %v1965_v63 = vld [vmem:[%s5655_s8 + $0x158] sm:$0xff]  ;;  %v1932_v1 = vld [vmem:[%s5655_s8 + $0x50] sm:$0xff] }
 0x23b   :  { %1699 = vmatpush.msra.mxu2 %v2707_v3  ;;  %1719 = vmatpush.msra.mxu3 %v2708_v4  ;;  %v1981_v0 = vld [vmem:[%s5655_s8 + $0x1d8] sm:$0xff]  ;;  %v1948_v2 = vld [vmem:[%s5655_s8 + $0xd0] sm:$0xff] }
 0x23c   :  { %1660 = vmatpush.msra.mxu0 %v2709_v5  ;;  %1680 = vmatpush.msra.mxu1 %v2710_v6  ;;  %v1964_v3 = vld [vmem:[%s5655_s8 + $0x150] sm:$0xff]  ;;  %v1931_v5 = vld [vmem:[%s5655_s8 + $0x48] sm:$0xff] }
 0x23d   :  { %1700 = vmatpush.msra.mxu2 %v2711_v7  ;;  %1720 = vmatpush.msra.mxu3 %v2712_v8  ;;  %v1980_v4 = vld [vmem:[%s5655_s8 + $0x1d0] sm:$0xff]  ;;  %v1947_v6 = vld [vmem:[%s5655_s8 + $0xc8] sm:$0xff] }
 0x23e   :  { %1661 = vmatpush.msra.mxu0 %v2713_v9  ;;  %1681 = vmatpush.msra.mxu1 %v2714_v10  ;;  %v1963_v7 = vld [vmem:[%s5655_s8 + $0x148] sm:$0xff]  ;;  %v1930_v9 = vld [vmem:[%s5655_s8 + $0x40] sm:$0xff] }
 0x23f   :  { %1701 = vmatpush.msra.mxu2 %v2715_v11  ;;  %1721 = vmatpush.msra.mxu3 %v2716_v12  ;;  %v1979_v8 = vld [vmem:[%s5655_s8 + $0x1c8] sm:$0xff]  ;;  %v1946_v10 = vld [vmem:[%s5655_s8 + $0xc0] sm:$0xff] }
 0x240   :  { %1734 = vmatpush.msrb.mxu0 %v2717_v13  ;;  %1754 = vmatpush.msrb.mxu1 %v2718_v14  ;;  %v1962_v11 = vld [vmem:[%s5655_s8 + $0x140] sm:$0xff]  ;;  %v1929_v13 = vld [vmem:[%s5655_s8 + $0x38] sm:$0xff] }
 0x241   :  { %1774 = vmatpush.msrb.mxu2 %v2719_v16  ;;  %1794 = vmatpush.msrb.mxu3 %v2720_v17  ;;  %v1978_v12 = vld [vmem:[%s5655_s8 + $0x1c0] sm:$0xff]  ;;  %v1945_v14 = vld [vmem:[%s5655_s8 + $0xb8] sm:$0xff] }
 0x242   :  { %2542 = vmatmul.msk.f32.vlgmr.msra.gmra.mxu0 %vm463_vm0, %v4622_v44  ;;  %2543 = vmatmul.msk.f32.vlgmr.msra.gmra.mxu1 %vm463_vm0, %v4622_v44  ;;  %v1961_v16 = vld [vmem:[%s5655_s8 + $0x138] sm:$0xff] }
 0x243   :  { %2544 = vmatmul.msk.f32.vlgmr.msra.gmra.mxu2 %vm463_vm0, %v4622_v44  ;;  %2545 = vmatmul.msk.f32.vlgmr.msra.gmra.mxu3 %vm463_vm0, %v4622_v44  ;;  %v1977_v17 = vld [vmem:[%s5655_s8 + $0x1b8] sm:$0xff] }
 0x244   :  { %1735 = vmatpush.msrb.mxu0 %v2721_v18  ;;  %1755 = vmatpush.msrb.mxu1 %v2722_v19  ;;  %v1928_v18 = vld [vmem:[%s5655_s8 + $0x30] sm:$0xff] }
 0x245   :  { %1775 = vmatpush.msrb.mxu2 %v2723_v20  ;;  %1795 = vmatpush.msrb.mxu3 %v2724_v15  ;;  %v1944_v19 = vld [vmem:[%s5655_s8 + $0xb0] sm:$0xff] }
 0x246   :  { %1736 = vmatpush.msrb.mxu0 %v2725_v21  ;;  %1756 = vmatpush.msrb.mxu1 %v2726_v22  ;;  %v1960_v20 = vld [vmem:[%s5655_s8 + $0x130] sm:$0xff]  ;;  %v1927_v21 = vld [vmem:[%s5655_s8 + $0x28] sm:$0xff] }
 0x247   :  { %1776 = vmatpush.msrb.mxu2 %v2727_v23  ;;  %1796 = vmatpush.msrb.mxu3 %v2728_v25  ;;  %v1976_v15 = vld [vmem:[%s5655_s8 + $0x1b0] sm:$0xff]  ;;  %v1943_v22 = vld [vmem:[%s5655_s8 + $0xa8] sm:$0xff] }
 0x248   :  { %1737 = vmatpush.msrb.mxu0 %v2729_v26  ;;  %1757 = vmatpush.msrb.mxu1 %v2730_v27  ;;  %v1959_v23 = vld [vmem:[%s5655_s8 + $0x128] sm:$0xff]  ;;  %v1926_v26 = vld [vmem:[%s5655_s8 + $0x20] sm:$0xff] }
 0x249   :  { %1777 = vmatpush.msrb.mxu2 %v2731_v28  ;;  %1797 = vmatpush.msrb.mxu3 %v2732_v29  ;;  %v1975_v25 = vld [vmem:[%s5655_s8 + $0x1a8] sm:$0xff]  ;;  %v1942_v27 = vld [vmem:[%s5655_s8 + $0xa0] sm:$0xff] }
 0x24a   :  { %1738 = vmatpush.msrb.mxu0 %v2733_v30  ;;  %1758 = vmatpush.msrb.mxu1 %v2734_v31  ;;  %v1958_v28 = vld [vmem:[%s5655_s8 + $0x120] sm:$0xff]  ;;  %v1925_v30 = vld [vmem:[%s5655_s8 + $0x18] sm:$0xff] }
 0x24b   :  { %1778 = vmatpush.msrb.mxu2 %v2735_v32  ;;  %1798 = vmatpush.msrb.mxu3 %v2736_v33  ;;  %v1974_v29 = vld [vmem:[%s5655_s8 + $0x1a0] sm:$0xff]  ;;  %v1941_v31 = vld [vmem:[%s5655_s8 + $0x98] sm:$0xff] }
 0x24c   :  { %1739 = vmatpush.msrb.mxu0 %v2737_v24  ;;  %1759 = vmatpush.msrb.mxu1 %v2738_v34  ;;  %v1957_v32 = vld [vmem:[%s5655_s8 + $0x118] sm:$0xff]  ;;  %v1924_v24 = vld [vmem:[%s5655_s8 + $0x10] sm:$0xff] }
 0x24d   :  { %1779 = vmatpush.msrb.mxu2 %v2739_v35  ;;  %1799 = vmatpush.msrb.mxu3 %v2740_v36  ;;  %v1973_v33 = vld [vmem:[%s5655_s8 + $0x198] sm:$0xff]  ;;  %v1940_v34 = vld [vmem:[%s5655_s8 + $0x90] sm:$0xff] }
 0x24e   :  { %1740 = vmatpush.msrb.mxu0 %v2741_v37  ;;  %1760 = vmatpush.msrb.mxu1 %v2742_v38  ;;  %v1956_v35 = vld [vmem:[%s5655_s8 + $0x110] sm:$0xff]  ;;  %v1923_v37 = vld [vmem:[%s5655_s8 + $0x8] sm:$0xff] }
 0x24f   :  { %1780 = vmatpush.msrb.mxu2 %v2743_v39  ;;  %1800 = vmatpush.msrb.mxu3 %v2744_v40  ;;  %v1972_v36 = vld [vmem:[%s5655_s8 + $0x190] sm:$0xff]  ;;  %v1939_v38 = vld [vmem:[%s5655_s8 + $0x88] sm:$0xff] }
 0x250   :  { %1741 = vmatpush.msrb.mxu0 %v2745_v41  ;;  %1761 = vmatpush.msrb.mxu1 %v2746_v42  ;;  %v1955_v39 = vld [vmem:[%s5655_s8 + $0x108] sm:$0xff]  ;;  %v1922_v41 = vld [vmem:[%s5655_s8] sm:$0xff] }
 0x251   :  { %1781 = vmatpush.msrb.mxu2 %v2747_v43  ;;  %1801 = vmatpush.msrb.mxu3 %v2748_v45  ;;  %v1971_v40 = vld [vmem:[%s5655_s8 + $0x188] sm:$0xff]  ;;  %v1938_v42 = vld [vmem:[%s5655_s8 + $0x80] sm:$0xff]  ;;  %v2001_v43 = vld [vmem:[%s5655_s8 + $0x278] sm:$0xff] }
 0x252   :  { %2546 = vmatmul.msk.f32.vlgmr.msrb.gmra.mxu0 %vm463_vm0, %v4622_v44  ;;  %2547 = vmatmul.msk.f32.vlgmr.msrb.gmra.mxu1 %vm463_vm0, %v4622_v44  ;;  %v2017_v45 = vld [vmem:[%s5655_s8 + $0x2f8] sm:$0xff] }
 0x253   :  { %2548 = vmatmul.msk.f32.vlgmr.msrb.gmra.mxu2 %vm463_vm0, %v4622_v44  ;;  %2549 = vmatmul.msk.f32.vlgmr.msrb.gmra.mxu3 %vm463_vm0, %v4622_v44  ;;  %v1935_v44 = vld [vmem:[%s5655_s8 + $0x68] sm:$0xff] }
 0x254   :  { %2182 = vmatpush.msra.mxu0 %v1937_v46  ;;  %2202 = vmatpush.msra.mxu1 %v1953_v47  ;;  %v1954_v46 = vld [vmem:[%s5655_s8 + $0x100] sm:$0xff] }
 0x255   :  { %2222 = vmatpush.msra.mxu2 %v1969_v48  ;;  %2242 = vmatpush.msra.mxu3 %v1985_v49  ;;  %v1970_v47 = vld [vmem:[%s5655_s8 + $0x180] sm:$0xff]  ;;  %v2000_v48 = vld [vmem:[%s5655_s8 + $0x270] sm:$0xff] }
 0x256   :  { %2183 = vmatpush.msra.mxu0 %v1936_v50  ;;  %2203 = vmatpush.msra.mxu1 %v1952_v51  ;;  %v2016_v49 = vld [vmem:[%s5655_s8 + $0x2f0] sm:$0xff]  ;;  %v2033_v50 = vld [vmem:[%s5655_s8 + $0x378] sm:$0xff] }
 0x257   :  { %2223 = vmatpush.msra.mxu2 %v1968_v52  ;;  %2243 = vmatpush.msra.mxu3 %v1984_v53  ;;  %v2049_v51 = vld [vmem:[%s5655_s8 + $0x3f8] sm:$0xff]  ;;  %v1999_v52 = vld [vmem:[%s5655_s8 + $0x268] sm:$0xff] }
 0x258   :  { %2184 = vmatpush.msra.mxu0 %v1935_v44  ;;  %2204 = vmatpush.msra.mxu1 %v1951_v54  ;;  %v2015_v53 = vld [vmem:[%s5655_s8 + $0x2e8] sm:$0xff]  ;;  %v2032_v44 = vld [vmem:[%s5655_s8 + $0x370] sm:$0xff] }
 0x259   :  { %2224 = vmatpush.msra.mxu2 %v1967_v55  ;;  %2244 = vmatpush.msra.mxu3 %v1983_v56  ;;  %v2048_v54 = vld [vmem:[%s5655_s8 + $0x3f0] sm:$0xff]  ;;  %v1998_v55 = vld [vmem:[%s5655_s8 + $0x260] sm:$0xff] }
 0x25a   :  { %2185 = vmatpush.msra.mxu0 %v1934_v57  ;;  %2205 = vmatpush.msra.mxu1 %v1950_v58  ;;  %v2014_v56 = vld [vmem:[%s5655_s8 + $0x2e0] sm:$0xff]  ;;  %v2031_v57 = vld [vmem:[%s5655_s8 + $0x368] sm:$0xff] }
 0x25b   :  { %2225 = vmatpush.msra.mxu2 %v1966_v59  ;;  %2245 = vmatpush.msra.mxu3 %v1982_v60  ;;  %v2047_v58 = vld [vmem:[%s5655_s8 + $0x3e8] sm:$0xff]  ;;  %v1997_v59 = vld [vmem:[%s5655_s8 + $0x258] sm:$0xff] }
 0x25c   :  { %2186 = vmatpush.msra.mxu0 %v1933_v61  ;;  %2206 = vmatpush.msra.mxu1 %v1949_v62  ;;  %v2013_v60 = vld [vmem:[%s5655_s8 + $0x2d8] sm:$0xff]  ;;  %v2030_v61 = vld [vmem:[%s5655_s8 + $0x360] sm:$0xff] }
 0x25d   :  { %2226 = vmatpush.msra.mxu2 %v1965_v63  ;;  %2246 = vmatpush.msra.mxu3 %v1981_v0  ;;  %v2046_v62 = vld [vmem:[%s5655_s8 + $0x3e0] sm:$0xff]  ;;  %v1996_v63 = vld [vmem:[%s5655_s8 + $0x250] sm:$0xff] }
 0x25e   :  { %2187 = vmatpush.msra.mxu0 %v1932_v1  ;;  %2207 = vmatpush.msra.mxu1 %v1948_v2  ;;  %v2012_v0 = vld [vmem:[%s5655_s8 + $0x2d0] sm:$0xff]  ;;  %v2029_v1 = vld [vmem:[%s5655_s8 + $0x358] sm:$0xff] }
 0x25f   :  { %2227 = vmatpush.msra.mxu2 %v1964_v3  ;;  %2247 = vmatpush.msra.mxu3 %v1980_v4  ;;  %v2045_v2 = vld [vmem:[%s5655_s8 + $0x3d8] sm:$0xff]  ;;  %v1995_v3 = vld [vmem:[%s5655_s8 + $0x248] sm:$0xff] }
 0x260   :  { %2188 = vmatpush.msra.mxu0 %v1931_v5  ;;  %2208 = vmatpush.msra.mxu1 %v1947_v6  ;;  %v2011_v4 = vld [vmem:[%s5655_s8 + $0x2c8] sm:$0xff]  ;;  %v1994_v5 = vld [vmem:[%s5655_s8 + $0x240] sm:$0xff] }
 0x261   :  { %2228 = vmatpush.msra.mxu2 %v1963_v7  ;;  %2248 = vmatpush.msra.mxu3 %v1979_v8  ;;  %v2010_v6 = vld [vmem:[%s5655_s8 + $0x2c0] sm:$0xff]  ;;  %v1993_v7 = vld [vmem:[%s5655_s8 + $0x238] sm:$0xff] }
 0x262   :  { %2189 = vmatpush.msra.mxu0 %v1930_v9  ;;  %2209 = vmatpush.msra.mxu1 %v1946_v10  ;;  %v2009_v8 = vld [vmem:[%s5655_s8 + $0x2b8] sm:$0xff]  ;;  %v2028_v9 = vld [vmem:[%s5655_s8 + $0x350] sm:$0xff] }
 0x263   :  { %2229 = vmatpush.msra.mxu2 %v1962_v11  ;;  %2249 = vmatpush.msra.mxu3 %v1978_v12  ;;  %v2044_v10 = vld [vmem:[%s5655_s8 + $0x3d0] sm:$0xff] }
 0x264   :  { %2190 = vmatpush.msra.mxu0 %v1929_v13  ;;  %2210 = vmatpush.msra.mxu1 %v1945_v14  ;;  %v1992_v11 = vld [vmem:[%s5655_s8 + $0x230] sm:$0xff]  ;;  %v2027_v13 = vld [vmem:[%s5655_s8 + $0x348] sm:$0xff] }
 0x265   :  { %2230 = vmatpush.msra.mxu2 %v1961_v16  ;;  %2250 = vmatpush.msra.mxu3 %v1977_v17  ;;  %v2008_v12 = vld [vmem:[%s5655_s8 + $0x2b0] sm:$0xff]  ;;  %v2043_v14 = vld [vmem:[%s5655_s8 + $0x3c8] sm:$0xff] }
 0x266   :  { %2191 = vmatpush.msra.mxu0 %v1928_v18  ;;  %2211 = vmatpush.msra.mxu1 %v1944_v19  ;;  %v1991_v16 = vld [vmem:[%s5655_s8 + $0x228] sm:$0xff]  ;;  %v2026_v18 = vld [vmem:[%s5655_s8 + $0x340] sm:$0xff] }
 0x267   :  { %2231 = vmatpush.msra.mxu2 %v1960_v20  ;;  %2251 = vmatpush.msra.mxu3 %v1976_v15  ;;  %v2007_v17 = vld [vmem:[%s5655_s8 + $0x2a8] sm:$0xff]  ;;  %v2042_v19 = vld [vmem:[%s5655_s8 + $0x3c0] sm:$0xff] }
 0x268   :  { %2192 = vmatpush.msra.mxu0 %v1927_v21  ;;  %2212 = vmatpush.msra.mxu1 %v1943_v22  ;;  %v1990_v20 = vld [vmem:[%s5655_s8 + $0x220] sm:$0xff]  ;;  %v2025_v21 = vld [vmem:[%s5655_s8 + $0x338] sm:$0xff] }
 0x269   :  { %2232 = vmatpush.msra.mxu2 %v1959_v23  ;;  %2252 = vmatpush.msra.mxu3 %v1975_v25  ;;  %v2006_v15 = vld [vmem:[%s5655_s8 + $0x2a0] sm:$0xff]  ;;  %v2041_v22 = vld [vmem:[%s5655_s8 + $0x3b8] sm:$0xff] }
 0x26a   :  { %2193 = vmatpush.msra.mxu0 %v1926_v26  ;;  %2213 = vmatpush.msra.mxu1 %v1942_v27  ;;  %v1989_v23 = vld [vmem:[%s5655_s8 + $0x218] sm:$0xff]  ;;  %v2024_v26 = vld [vmem:[%s5655_s8 + $0x330] sm:$0xff] }
 0x26b   :  { %2233 = vmatpush.msra.mxu2 %v1958_v28  ;;  %2253 = vmatpush.msra.mxu3 %v1974_v29  ;;  %v2005_v25 = vld [vmem:[%s5655_s8 + $0x298] sm:$0xff]  ;;  %v2040_v27 = vld [vmem:[%s5655_s8 + $0x3b0] sm:$0xff] }
 0x26c   :  { %2194 = vmatpush.msra.mxu0 %v1925_v30  ;;  %2214 = vmatpush.msra.mxu1 %v1941_v31  ;;  %v1988_v28 = vld [vmem:[%s5655_s8 + $0x210] sm:$0xff]  ;;  %v2023_v30 = vld [vmem:[%s5655_s8 + $0x328] sm:$0xff] }
 0x26d   :  { %2234 = vmatpush.msra.mxu2 %v1957_v32  ;;  %2254 = vmatpush.msra.mxu3 %v1973_v33  ;;  %v2004_v29 = vld [vmem:[%s5655_s8 + $0x290] sm:$0xff]  ;;  %v2039_v31 = vld [vmem:[%s5655_s8 + $0x3a8] sm:$0xff] }
 0x26e   :  { %2195 = vmatpush.msra.mxu0 %v1924_v24  ;;  %2215 = vmatpush.msra.mxu1 %v1940_v34  ;;  %v1987_v32 = vld [vmem:[%s5655_s8 + $0x208] sm:$0xff]  ;;  %v2022_v24 = vld [vmem:[%s5655_s8 + $0x320] sm:$0xff] }
 0x26f   :  { %2235 = vmatpush.msra.mxu2 %v1956_v35  ;;  %2255 = vmatpush.msra.mxu3 %v1972_v36  ;;  %v2003_v33 = vld [vmem:[%s5655_s8 + $0x288] sm:$0xff]  ;;  %v2038_v34 = vld [vmem:[%s5655_s8 + $0x3a0] sm:$0xff] }
 0x270   :  { %2196 = vmatpush.msra.mxu0 %v1923_v37  ;;  %2216 = vmatpush.msra.mxu1 %v1939_v38  ;;  %v1986_v35 = vld [vmem:[%s5655_s8 + $0x200] sm:$0xff]  ;;  %v2021_v37 = vld [vmem:[%s5655_s8 + $0x318] sm:$0xff] }
 0x271   :  { %2236 = vmatpush.msra.mxu2 %v1955_v39  ;;  %2256 = vmatpush.msra.mxu3 %v1971_v40  ;;  %v2002_v36 = vld [vmem:[%s5655_s8 + $0x280] sm:$0xff]  ;;  %v2037_v38 = vld [vmem:[%s5655_s8 + $0x398] sm:$0xff]  ;;  %v2020_v39 = vld [vmem:[%s5655_s8 + $0x310] sm:$0xff] }
 0x272   :  { %2197 = vmatpush.msra.mxu0 %v1922_v41  ;;  %2217 = vmatpush.msra.mxu1 %v1938_v42  ;;  %v2036_v40 = vld [vmem:[%s5655_s8 + $0x390] sm:$0xff]  ;;  %v5223_v41 = vld [vmem:[%s5657_s7] sm:$0xff]  ;;  %v2019_v42 = vld [vmem:[%s5655_s8 + $0x308] sm:$0xff] }
 0x273   :  { %2237 = vmatpush.msra.mxu2 %v1954_v46  ;;  %2257 = vmatpush.msra.mxu3 %v1970_v47  ;;  %v1811_v46 = vperm.slane %v5223_v41, 1  ;;  %v2018_v47 = vld [vmem:[%s5655_s8 + $0x300] sm:$0xff] }
 0x274   :  { %2262 = vmatpush.msrb.mxu0 %v2001_v43  ;;  %2282 = vmatpush.msrb.mxu1 %v2017_v45  ;;  %v2035_v43 = vld [vmem:[%s5655_s8 + $0x388] sm:$0xff]  ;;  %v1810_v45 = vperm.slane %v5223_v41, 0 }
 0x275   :  { %2302 = vmatpush.msrb.mxu2 %v2033_v50  ;;  %2322 = vmatpush.msrb.mxu3 %v2049_v51 }
 0x276   :  { %2263 = vmatpush.msrb.mxu0 %v2000_v48  ;;  %2283 = vmatpush.msrb.mxu1 %v2016_v49  ;;  %v2034_v48 = vld [vmem:[%s5655_s8 + $0x380] sm:$0xff] }
 0x277   :  { %2303 = vmatpush.msrb.mxu2 %v2032_v44  ;;  %2323 = vmatpush.msrb.mxu3 %v2048_v54  ;;  %v1812_v54 = vperm.slane %v5223_v41, 2 }
 0x278   :  { %2264 = vmatpush.msrb.mxu0 %v1999_v52  ;;  %2284 = vmatpush.msrb.mxu1 %v2015_v53 }
 0x279   :  { %2304 = vmatpush.msrb.mxu2 %v2031_v57  ;;  %2324 = vmatpush.msrb.mxu3 %v2047_v58 }
 0x27a   :  { %2265 = vmatpush.msrb.mxu0 %v1998_v55  ;;  %2285 = vmatpush.msrb.mxu1 %v2014_v56  ;;  %v1813_v55 = vperm.slane %v5223_v41, 3 }
 0x27b   :  { %2305 = vmatpush.msrb.mxu2 %v2030_v61  ;;  %2325 = vmatpush.msrb.mxu3 %v2046_v62  ;;  %v1814_v62 = vperm.slane %v5223_v41, 4 }
 0x27c   :  { %2266 = vmatpush.msrb.mxu0 %v1997_v59  ;;  %2286 = vmatpush.msrb.mxu1 %v2013_v60 }
 0x27d   :  { %2306 = vmatpush.msrb.mxu2 %v2029_v1  ;;  %2326 = vmatpush.msrb.mxu3 %v2045_v2 }
 0x27e   :  { %2267 = vmatpush.msrb.mxu0 %v1996_v63  ;;  %2287 = vmatpush.msrb.mxu1 %v2012_v0  ;;  %v1815_v63 = vperm.slane %v5223_v41, 5 }
 0x27f   :  { %2307 = vmatpush.msrb.mxu2 %v2028_v9  ;;  %2327 = vmatpush.msrb.mxu3 %v2044_v10 }
 0x280   :  { %2268 = vmatpush.msrb.mxu0 %v1995_v3  ;;  %2288 = vmatpush.msrb.mxu1 %v2011_v4 }
 0x281   :  { %2308 = vmatpush.msrb.mxu2 %v2027_v13  ;;  %2328 = vmatpush.msrb.mxu3 %v2043_v14 }
 0x282   :  { %2269 = vmatpush.msrb.mxu0 %v1994_v5  ;;  %2289 = vmatpush.msrb.mxu1 %v2010_v6 }
 0x283   :  { %2309 = vmatpush.msrb.mxu2 %v2026_v18  ;;  %2329 = vmatpush.msrb.mxu3 %v2042_v19 }
 0x284   :  { %2270 = vmatpush.msrb.mxu0 %v1993_v7  ;;  %2290 = vmatpush.msrb.mxu1 %v2009_v8 }
 0x285   :  { %2310 = vmatpush.msrb.mxu2 %v2025_v21  ;;  %2330 = vmatpush.msrb.mxu3 %v2041_v22  ;;  %v2064_v22 = vld [vmem:[%s5655_s8 + $0x470] sm:$0xff] }
 0x286   :  { %2271 = vmatpush.msrb.mxu0 %v1992_v11  ;;  %2291 = vmatpush.msrb.mxu1 %v2008_v12  ;;  %v1816_v12 = vperm.slane %v5223_v41, 6 }
 0x287   :  { %2311 = vmatpush.msrb.mxu2 %v2024_v26  ;;  %2331 = vmatpush.msrb.mxu3 %v2040_v27 }
 0x288   :  { %2272 = vmatpush.msrb.mxu0 %v1991_v16  ;;  %2292 = vmatpush.msrb.mxu1 %v2007_v17  ;;  %v1817_v16 = vperm.slane %v5223_v41, 7  ;;  %v2065_v17 = vld [vmem:[%s5655_s8 + $0x478] sm:$0xff] }
 0x289   :  { %2312 = vmatpush.msrb.mxu2 %v2023_v30  ;;  %2332 = vmatpush.msrb.mxu3 %v2039_v31  ;;  %v2063_v31 = vld [vmem:[%s5655_s8 + $0x468] sm:$0xff]  ;;  %v2113_v41 = vld [vmem:[%s5655_s8 + $0x5f8] sm:$0xff] }
 0x28a   :  { %2273 = vmatpush.msrb.mxu0 %v1990_v20  ;;  %2293 = vmatpush.msrb.mxu1 %v2006_v15  ;;  %v2081_v15 = vld [vmem:[%s5655_s8 + $0x4f8] sm:$0xff] }
 0x28b   :  { %2313 = vmatpush.msrb.mxu2 %v2022_v24  ;;  %2333 = vmatpush.msrb.mxu3 %v2038_v34  ;;  %v2062_v34 = vld [vmem:[%s5655_s8 + $0x460] sm:$0xff] }
 0x28c   :  { %2274 = vmatpush.msrb.mxu0 %v1989_v23  ;;  %2294 = vmatpush.msrb.mxu1 %v2005_v25 }
 0x28d   :  { %2314 = vmatpush.msrb.mxu2 %v2021_v37  ;;  %2334 = vmatpush.msrb.mxu3 %v2037_v38 }
 0x28e   :  { %2275 = vmatpush.msrb.mxu0 %v1988_v28  ;;  %2295 = vmatpush.msrb.mxu1 %v2004_v29  ;;  %v2080_v28 = vld [vmem:[%s5655_s8 + $0x4f0] sm:$0xff] }
 0x28f   :  { %2315 = vmatpush.msrb.mxu2 %v2020_v39  ;;  %2335 = vmatpush.msrb.mxu3 %v2036_v40  ;;  %v2097_v40 = vld [vmem:[%s5655_s8 + $0x578] sm:$0xff] }
 0x290   :  { %2276 = vmatpush.msrb.mxu0 %v1987_v32  ;;  %2296 = vmatpush.msrb.mxu1 %v2003_v33  ;;  %v2079_v32 = vld [vmem:[%s5655_s8 + $0x4e8] sm:$0xff] }
 0x291   :  { %2316 = vmatpush.msrb.mxu2 %v2019_v42  ;;  %2336 = vmatpush.msrb.mxu3 %v2035_v43  ;;  %v2077_v43 = vld [vmem:[%s5655_s8 + $0x4d8] sm:$0xff] }
 0x292   :  { %2277 = vmatpush.msrb.mxu0 %v1986_v35  ;;  %2297 = vmatpush.msrb.mxu1 %v2002_v36  ;;  %v5269_v35 = vld [vmem:[%s5657_s7 + $0x8] sm:$0xff]  ;;  %v2078_v36 = vld [vmem:[%s5655_s8 + $0x4e0] sm:$0xff] }
 0x293   :  { %2317 = vmatpush.msrb.mxu2 %v2018_v47  ;;  %2337 = vmatpush.msrb.mxu3 %v2034_v48  ;;  %v1818_v47 = vperm.slane %v5269_v35, 0  ;;  %v2061_v48 = vld [vmem:[%s5655_s8 + $0x458] sm:$0xff] }
 0x2a9   :  { %v1503_v49 = vpop.f32.mrf.mxu0  ;;  %v1523_v50 = vpop.f32.mrf.mxu1 }
 0x2aa   :  { %v1842_v51 = vsub.f32 %v1503_v49, %v1810_v45  ;;  %v1843_v52 = vsub.f32 %v1523_v50, %v1811_v46 }
 0x2ac   :  { %v1858_v53 = vand.u32 2147483647, %v1842_v51  ;;  %v1859_v44 = vand.u32 2147483647, %v1843_v52  ;;  %v1819_v51 = vperm.slane %v5269_v35, 1  ;;  %v2096_v52 = vld [vmem:[%s5655_s8 + $0x570] sm:$0xff] }
 0x2ae   :  { %v1874_v56 = vsub.f32 0.0, %v1858_v53  ;;  %v1875_v57 = vsub.f32 0.0, %v1859_v44  ;;  %v2112_v53 = vld [vmem:[%s5655_s8 + $0x5f0] sm:$0xff] }
 0x2b0   :  { %v1890_v58 = vmul.f32 1.442695, %v1874_v56  ;;  %v1892_v59 = vmul.f32 1.442695, %v1875_v57  ;;  %v1543_v60 = vpop.f32.mrf.mxu2  ;;  %v1563_v61 = vpop.f32.mrf.mxu3  ;;  %v2076_v56 = vld [vmem:[%s5655_s8 + $0x4d0] sm:$0xff]  ;;  %v2095_v57 = vld [vmem:[%s5655_s8 + $0x568] sm:$0xff] }
 0x2b1   :  { %v1844_v0 = vsub.f32 %v1543_v60, %v1812_v54  ;;  %v1845_v1 = vsub.f32 %v1563_v61, %v1813_v55  ;;  %v2060_v55 = vld [vmem:[%s5655_s8 + $0x450] sm:$0xff]  ;;  %v2059_v60 = vld [vmem:[%s5655_s8 + $0x448] sm:$0xff] }
 0x2b2   :  { %2585 = vpow2.f32 %v1890_v58  ;;  %v2111_v58 = vld [vmem:[%s5655_s8 + $0x5e8] sm:$0xff] }
 0x2b3   :  { %2587 = vpow2.f32 %v1892_v59  ;;  %v1860_v2 = vand.u32 2147483647, %v1844_v0  ;;  %v1861_v3 = vand.u32 2147483647, %v1845_v1  ;;  %v1583_v4 = vpop.f32.mrf.mxu0  ;;  %v1603_v5 = vpop.f32.mrf.mxu1  ;;  %v2075_v61 = vld [vmem:[%s5655_s8 + $0x4c8] sm:$0xff]  ;;  %v2110_v0 = vld [vmem:[%s5655_s8 + $0x5e0] sm:$0xff] }
 0x2b4   :  { %v1846_v6 = vsub.f32 %v1583_v4, %v1814_v62  ;;  %v1847_v7 = vsub.f32 %v1603_v5, %v1815_v63  ;;  %v2094_v63 = vld [vmem:[%s5655_s8 + $0x560] sm:$0xff] }
 0x2b5   :  { %v1876_v8 = vsub.f32 0.0, %v1860_v2  ;;  %v1877_v9 = vsub.f32 0.0, %v1861_v3  ;;  %v2058_v1 = vld [vmem:[%s5655_s8 + $0x440] sm:$0xff]  ;;  %v1820_v2 = vperm.slane %v5269_v35, 2 }
 0x2b6   :  { %v1862_v10 = vand.u32 2147483647, %v1846_v6  ;;  %v1863_v11 = vand.u32 2147483647, %v1847_v7  ;;  %v2074_v3 = vld [vmem:[%s5655_s8 + $0x4c0] sm:$0xff]  ;;  %v1821_v7 = vperm.slane %v5269_v35, 3 }
 0x2b7   :  { %v1894_v13 = vmul.f32 1.442695, %v1876_v8  ;;  %v1896_v14 = vmul.f32 1.442695, %v1877_v9  ;;  %v2093_v8 = vld [vmem:[%s5655_s8 + $0x558] sm:$0xff] }
 0x2b8   :  { %v2586_v18 = vpop.eup %2585  ;;  %v1878_v19 = vsub.f32 0.0, %v1862_v10  ;;  %v1879_v20 = vsub.f32 0.0, %v1863_v11  ;;  %v2109_v9 = vld [vmem:[%s5655_s8 + $0x5d8] sm:$0xff] }
 0x2b9   :  { %v2588_v21 = vpop.eup %2587  ;;  %2589 = vpow2.f32 %v1894_v13  ;;  %2198 = vmatmul.f32.vlgmr.msra.gmra.mxu0 %v2586_v18  ;;  %v2057_v13 = vld [vmem:[%s5655_s8 + $0x438] sm:$0xff] }
 0x2ba   :  { %2591 = vpow2.f32 %v1896_v14  ;;  %v1898_v23 = vmul.f32 1.442695, %v1878_v19  ;;  %v1900_v25 = vmul.f32 1.442695, %v1879_v20  ;;  %v1623_v26 = vpop.f32.mrf.mxu2  ;;  %v1643_v27 = vpop.f32.mrf.mxu3  ;;  %2218 = vmatmul.f32.vlgmr.msra.gmra.mxu1 %v2588_v21  ;;  %2342 = vmatpush.msra.mxu0 %v2065_v17  ;;  %v2073_v14 = vld [vmem:[%s5655_s8 + $0x4b8] sm:$0xff]  ;;  %v2108_v17 = vld [vmem:[%s5655_s8 + $0x5d0] sm:$0xff] }
 0x2bb   :  { %v1848_v29 = vsub.f32 %v1623_v26, %v1816_v12  ;;  %v1849_v30 = vsub.f32 %v1643_v27, %v1817_v16  ;;  %2362 = vmatpush.msra.mxu1 %v2081_v15  ;;  %v2092_v16 = vld [vmem:[%s5655_s8 + $0x550] sm:$0xff]  ;;  %v2055_v26 = vld [vmem:[%s5655_s8 + $0x428] sm:$0xff] }
 0x2bc   :  { %2593 = vpow2.f32 %v1898_v23  ;;  %2343 = vmatpush.msra.mxu0 %v2064_v22  ;;  %v2056_v19 = vld [vmem:[%s5655_s8 + $0x430] sm:$0xff]  ;;  %v2091_v22 = vld [vmem:[%s5655_s8 + $0x548] sm:$0xff] }
 0x2bd   :  { %2595 = vpow2.f32 %v1900_v25  ;;  %v1864_v33 = vand.u32 2147483647, %v1848_v29  ;;  %v1865_v24 = vand.u32 2147483647, %v1849_v30  ;;  %2363 = vmatpush.msra.mxu1 %v2080_v28  ;;  %v2072_v20 = vld [vmem:[%s5655_s8 + $0x4b0] sm:$0xff]  ;;  %v2107_v23 = vld [vmem:[%s5655_s8 + $0x5c8] sm:$0xff] }
 0x2be   :  { %2344 = vmatpush.msra.mxu0 %v2063_v31  ;;  %v2071_v27 = vld [vmem:[%s5655_s8 + $0x4a8] sm:$0xff]  ;;  %v2090_v28 = vld [vmem:[%s5655_s8 + $0x540] sm:$0xff] }
 0x2bf   :  { %v2590_v37 = vpop.eup %2589  ;;  %v1880_v38 = vsub.f32 0.0, %v1864_v33  ;;  %v1881_v39 = vsub.f32 0.0, %v1865_v24  ;;  %2364 = vmatpush.msra.mxu1 %v2079_v32  ;;  %v1663_v50 = vpop.f32.mrf.mxu0  ;;  %v2106_v29 = vld [vmem:[%s5655_s8 + $0x5c0] sm:$0xff] }
 0x2c0   :  { %v2592_v42 = vpop.eup %2591  ;;  %2238 = vmatmul.f32.vlgmr.msra.gmra.mxu2 %v2590_v37  ;;  %2345 = vmatpush.msra.mxu0 %v2062_v34  ;;  %v1683_v54 = vpop.f32.mrf.mxu1  ;;  %v1850_v59 = vsub.f32 %v1663_v50, %v1818_v47  ;;  %v2054_v31 = vld [vmem:[%s5655_s8 + $0x420] sm:$0xff]  ;;  %v2089_v34 = vld [vmem:[%s5655_s8 + $0x538] sm:$0xff]  ;;  %v2087_v47 = vld [vmem:[%s5655_s8 + $0x528] sm:$0xff] }
 0x2c1   :  { %v1902_v45 = vmul.f32 1.442695, %v1880_v38  ;;  %v1904_v46 = vmul.f32 1.442695, %v1881_v39  ;;  %2258 = vmatmul.f32.vlgmr.msra.gmra.mxu3 %v2592_v42  ;;  %2365 = vmatpush.msra.mxu1 %v2078_v36  ;;  %v1851_v62 = vsub.f32 %v1683_v54, %v1819_v51  ;;  %v2070_v32 = vld [vmem:[%s5655_s8 + $0x4a0] sm:$0xff]  ;;  %v2105_v36 = vld [vmem:[%s5655_s8 + $0x5b8] sm:$0xff] }
 0x2c2   :  { %v2594_v49 = vpop.eup %2593  ;;  %2382 = vmatpush.msra.mxu2 %v2097_v40  ;;  %2402 = vmatpush.msra.mxu3 %v2113_v41  ;;  %v1866_v5 = vand.u32 2147483647, %v1850_v59  ;;  %v2053_v38 = vld [vmem:[%s5655_s8 + $0x418] sm:$0xff]  ;;  %v2088_v40 = vld [vmem:[%s5655_s8 + $0x530] sm:$0xff]  ;;  %v2067_v50 = vld [vmem:[%s5655_s8 + $0x488] sm:$0xff] }
 0x2c3   :  { %v2596_v44 = vpop.eup %2595  ;;  %2597 = vpow2.f32 %v1902_v45  ;;  %2278 = vmatmul.f32.vlgmr.msrb.gmra.mxu0 %v2594_v49  ;;  %2366 = vmatpush.msra.mxu1 %v2077_v43  ;;  %v1867_v11 = vand.u32 2147483647, %v1851_v62  ;;  %v2069_v39 = vld [vmem:[%s5655_s8 + $0x498] sm:$0xff]  ;;  %v2104_v41 = vld [vmem:[%s5655_s8 + $0x5b0] sm:$0xff]  ;;  %v2051_v49 = vld [vmem:[%s5655_s8 + $0x408] sm:$0xff] }
 0x2c4   :  { %2599 = vpow2.f32 %v1904_v46  ;;  %2298 = vmatmul.f32.vlgmr.msrb.gmra.mxu1 %v2596_v44  ;;  %2346 = vmatpush.msra.mxu0 %v2061_v48  ;;  %v1882_v15 = vsub.f32 0.0, %v1866_v5  ;;  %v2052_v43 = vld [vmem:[%s5655_s8 + $0x410] sm:$0xff]  ;;  %v2103_v48 = vld [vmem:[%s5655_s8 + $0x5a8] sm:$0xff]  ;;  %v2086_v51 = vld [vmem:[%s5655_s8 + $0x520] sm:$0xff] }
 0x2c5   :  { %2383 = vmatpush.msra.mxu2 %v2096_v52  ;;  %2403 = vmatpush.msra.mxu3 %v2112_v53  ;;  %v1883_v25 = vsub.f32 0.0, %v1867_v11  ;;  %v2068_v45 = vld [vmem:[%s5655_s8 + $0x490] sm:$0xff]  ;;  %v2102_v52 = vld [vmem:[%s5655_s8 + $0x5a0] sm:$0xff]  ;;  %v2129_v59 = vld [vmem:[%s5655_s8 + $0x678] sm:$0xff] }
 0x2c6   :  { %2347 = vmatpush.msra.mxu0 %v2060_v55  ;;  %2367 = vmatpush.msra.mxu1 %v2076_v56  ;;  %v1703_v6 = vpop.f32.mrf.mxu2  ;;  %v1723_v12 = vpop.f32.mrf.mxu3  ;;  %v1906_v33 = vmul.f32 1.442695, %v1882_v15  ;;  %v2050_v44 = vld [vmem:[%s5655_s8 + $0x400] sm:$0xff]  ;;  %v2085_v56 = vld [vmem:[%s5655_s8 + $0x518] sm:$0xff]  ;;  %v2084_v62 = vld [vmem:[%s5655_s8 + $0x510] sm:$0xff] }
 0x2c7   :  { %2384 = vmatpush.msra.mxu2 %v2095_v57  ;;  %2404 = vmatpush.msra.mxu3 %v2111_v58  ;;  %v1852_v18 = vsub.f32 %v1703_v6, %v1820_v2  ;;  %v1853_v21 = vsub.f32 %v1723_v12, %v1821_v7  ;;  %v1908_v37 = vmul.f32 1.442695, %v1883_v25  ;;  %v2066_v54 = vld [vmem:[%s5655_s8 + $0x480] sm:$0xff]  ;;  %v2101_v57 = vld [vmem:[%s5655_s8 + $0x598] sm:$0xff]  ;;  %v2083_v2 = vld [vmem:[%s5655_s8 + $0x508] sm:$0xff]  ;;  %v1822_v12 = vperm.slane %v5269_v35, 4 }
 0x2c8   :  { %2348 = vmatpush.msra.mxu0 %v2059_v60  ;;  %2368 = vmatpush.msra.mxu1 %v2075_v61  ;;  %2601 = vpow2.f32 %v1906_v33  ;;  %v2145_v60 = vld [vmem:[%s5655_s8 + $0x6f8] sm:$0xff]  ;;  %v2143_v5 = vld [vmem:[%s5655_s8 + $0x6e8] sm:$0xff]  ;;  %v2082_v6 = vld [vmem:[%s5655_s8 + $0x500] sm:$0xff] }
 0x2c9   :  { %v2598_v4 = vpop.eup %2597  ;;  %2385 = vmatpush.msra.mxu2 %v2094_v63  ;;  %2405 = vmatpush.msra.mxu3 %v2110_v0  ;;  %v1868_v30 = vand.u32 2147483647, %v1852_v18  ;;  %v1869_v24 = vand.u32 2147483647, %v1853_v21  ;;  %2603 = vpow2.f32 %v1908_v37  ;;  %v2100_v63 = vld [vmem:[%s5655_s8 + $0x590] sm:$0xff]  ;;  %v2098_v7 = vld [vmem:[%s5655_s8 + $0x580] sm:$0xff] }
 0x2ca   :  { %v2600_v10 = vpop.eup %2599  ;;  %2318 = vmatmul.f32.vlgmr.msrb.gmra.mxu2 %v2598_v4  ;;  %2349 = vmatpush.msra.mxu0 %v2058_v1  ;;  %v2128_v0 = vld [vmem:[%s5655_s8 + $0x670] sm:$0xff]  ;;  %v2127_v4 = vld [vmem:[%s5655_s8 + $0x668] sm:$0xff]  ;;  %v2125_v18 = vld [vmem:[%s5655_s8 + $0x658] sm:$0xff] }
 0x2cb   :  { %2338 = vmatmul.f32.vlgmr.msrb.gmra.mxu3 %v2600_v10  ;;  %2369 = vmatpush.msra.mxu1 %v2074_v3  ;;  %v1884_v42 = vsub.f32 0.0, %v1868_v30  ;;  %v1885_v46 = vsub.f32 0.0, %v1869_v24  ;;  %v2144_v1 = vld [vmem:[%s5655_s8 + $0x6f0] sm:$0xff]  ;;  %v2099_v3 = vld [vmem:[%s5655_s8 + $0x588] sm:$0xff]  ;;  %v2142_v10 = vld [vmem:[%s5655_s8 + $0x6e0] sm:$0xff] }
 0x2cc   :  { %2386 = vmatpush.msra.mxu2 %v2093_v8  ;;  %2406 = vmatpush.msra.mxu3 %v2109_v9  ;;  %v2126_v9 = vld [vmem:[%s5655_s8 + $0x660] sm:$0xff]  ;;  %v2160_v15 = vld [vmem:[%s5655_s8 + $0x770] sm:$0xff]  ;;  %v2139_v30 = vld [vmem:[%s5655_s8 + $0x6c8] sm:$0xff] }
 0x2cd   :  { %2350 = vmatpush.msra.mxu0 %v2057_v13  ;;  %2370 = vmatpush.msra.mxu1 %v2073_v14  ;;  %v1910_v53 = vmul.f32 1.442695, %v1884_v42  ;;  %v1912_v55 = vmul.f32 1.442695, %v1885_v46  ;;  %v2161_v13 = vld [vmem:[%s5655_s8 + $0x778] sm:$0xff]  ;;  %v2176_v21 = vld [vmem:[%s5655_s8 + $0x7f0] sm:$0xff] }
 0x2ce   :  { %2387 = vmatpush.msra.mxu2 %v2092_v16  ;;  %2407 = vmatpush.msra.mxu3 %v2108_v17  ;;  %v2602_v58 = vpop.eup %2601  ;;  %v2177_v14 = vld [vmem:[%s5655_s8 + $0x7f8] sm:$0xff]  ;;  %v1823_v17 = vperm.slane %v5269_v35, 5  ;;  %v2174_v33 = vld [vmem:[%s5655_s8 + $0x7e0] sm:$0xff]  ;;  %v2156_v46 = vld [vmem:[%s5655_s8 + $0x750] sm:$0xff] }
 0x2cf   :  { %2351 = vmatpush.msra.mxu0 %v2056_v19  ;;  %2371 = vmatpush.msra.mxu1 %v2072_v20  ;;  %v2604_v61 = vpop.eup %2603  ;;  %2605 = vpow2.f32 %v1910_v53  ;;  %v1743_v16 = vpop.f32.mrf.mxu0  ;;  %v2141_v19 = vld [vmem:[%s5655_s8 + $0x6d8] sm:$0xff]  ;;  %v2138_v37 = vld [vmem:[%s5655_s8 + $0x6c0] sm:$0xff]  ;;  %v2171_v53 = vld [vmem:[%s5655_s8 + $0x7c8] sm:$0xff] }
 0x2d0   :  { %2388 = vmatpush.msra.mxu2 %v2091_v22  ;;  %2408 = vmatpush.msra.mxu3 %v2107_v23  ;;  %2607 = vpow2.f32 %v1912_v55  ;;  %v1763_v20 = vpop.f32.mrf.mxu1  ;;  %v2124_v22 = vld [vmem:[%s5655_s8 + $0x650] sm:$0xff]  ;;  %v1854_v25 = vsub.f32 %v1743_v16, %v1822_v12  ;;  %v2121_v42 = vld [vmem:[%s5655_s8 + $0x638] sm:$0xff]  ;;  %v2135_v55 = vld [vmem:[%s5655_s8 + $0x6a8] sm:$0xff] }
 0x2d1   :  { %2352 = vmatpush.msra.mxu0 %v2055_v26  ;;  %2372 = vmatpush.msra.mxu1 %v2071_v27  ;;  %v2140_v23 = vld [vmem:[%s5655_s8 + $0x6d0] sm:$0xff]  ;;  %v2159_v26 = vld [vmem:[%s5655_s8 + $0x768] sm:$0xff]  ;;  %v2150_v16 = vld [vmem:[%s5655_s8 + $0x720] sm:$0xff] }
 0x2d2   :  { %2389 = vmatpush.msra.mxu2 %v2090_v28  ;;  %2409 = vmatpush.msra.mxu3 %v2106_v29  ;;  %v2175_v27 = vld [vmem:[%s5655_s8 + $0x7e8] sm:$0xff]  ;;  %v1855_v28 = vsub.f32 %v1763_v20, %v1823_v17  ;;  %v2166_v17 = vld [vmem:[%s5655_s8 + $0x7a0] sm:$0xff] }
 0x2d3   :  { %2353 = vmatpush.msra.mxu0 %v2054_v31  ;;  %2373 = vmatpush.msra.mxu1 %v2070_v32  ;;  %v2123_v29 = vld [vmem:[%s5655_s8 + $0x648] sm:$0xff]  ;;  %v1824_v31 = vperm.slane %v5269_v35, 6  ;;  %v2158_v32 = vld [vmem:[%s5655_s8 + $0x760] sm:$0xff] }
 0x2d4   :  { %2390 = vmatpush.msra.mxu2 %v2089_v34  ;;  %2410 = vmatpush.msra.mxu3 %v2105_v36  ;;  %v1825_v34 = vperm.slane %v5269_v35, 7  ;;  %v2122_v36 = vld [vmem:[%s5655_s8 + $0x640] sm:$0xff]  ;;  %v2173_v35 = vld [vmem:[%s5655_s8 + $0x7d8] sm:$0xff]  ;;  %v2115_v12 = vld [vmem:[%s5655_s8 + $0x608] sm:$0xff] }
 0x2d5   :  { %2354 = vmatpush.msra.mxu0 %v2053_v38  ;;  %2374 = vmatpush.msra.mxu1 %v2069_v39  ;;  %v2606_v8 = vpop.eup %2605  ;;  %v1870_v38 = vand.u32 2147483647, %v1854_v25  ;;  %v2130_v20 = vld [vmem:[%s5655_s8 + $0x680] sm:$0xff]  ;;  %v2164_v25 = vld [vmem:[%s5655_s8 + $0x790] sm:$0xff] }
 0x2d6   :  { %2391 = vmatpush.msra.mxu2 %v2088_v40  ;;  %2411 = vmatpush.msra.mxu3 %v2104_v41  ;;  %v2608_v11 = vpop.eup %2607  ;;  %v1783_v24 = vpop.f32.mrf.mxu2  ;;  %v2157_v40 = vld [vmem:[%s5655_s8 + $0x758] sm:$0xff]  ;;  %v1871_v41 = vand.u32 2147483647, %v1855_v28  ;;  %v2163_v28 = vld [vmem:[%s5655_s8 + $0x788] sm:$0xff] }
 0x2d7   :  { %2355 = vmatpush.msra.mxu0 %v2052_v43  ;;  %2375 = vmatpush.msra.mxu1 %v2068_v45  ;;  %v1803_v39 = vpop.f32.mrf.mxu3  ;;  %v2137_v43 = vld [vmem:[%s5655_s8 + $0x6b8] sm:$0xff]  ;;  %v1856_v45 = vsub.f32 %v1783_v24, %v1824_v31 }
 0x2d8   :  { %2392 = vmatpush.msra.mxu2 %v2087_v47  ;;  %2412 = vmatpush.msra.mxu3 %v2103_v48  ;;  %v2172_v47 = vld [vmem:[%s5655_s8 + $0x7d0] sm:$0xff]  ;;  %v1857_v48 = vsub.f32 %v1803_v39, %v1825_v34 }
 0x2d9   :  { %2356 = vmatpush.msra.mxu0 %v2051_v49  ;;  %2376 = vmatpush.msra.mxu1 %v2067_v50  ;;  %v2120_v49 = vld [vmem:[%s5655_s8 + $0x630] sm:$0xff] }
 0x2da   :  { %2393 = vmatpush.msra.mxu2 %v2086_v51  ;;  %2413 = vmatpush.msra.mxu3 %v2102_v52  ;;  %v2136_v50 = vld [vmem:[%s5655_s8 + $0x6b0] sm:$0xff]  ;;  %v1886_v51 = vsub.f32 0.0, %v1870_v38  ;;  %v2155_v52 = vld [vmem:[%s5655_s8 + $0x748] sm:$0xff] }
 0x2db   :  { %2357 = vmatpush.msra.mxu0 %v2050_v44  ;;  %2377 = vmatpush.msra.mxu1 %v2066_v54  ;;  %v1887_v44 = vsub.f32 0.0, %v1871_v41  ;;  %v2119_v54 = vld [vmem:[%s5655_s8 + $0x628] sm:$0xff] }
 0x2dc   :  { %2394 = vmatpush.msra.mxu2 %v2085_v56  ;;  %2414 = vmatpush.msra.mxu3 %v2101_v57  ;;  %v1872_v56 = vand.u32 2147483647, %v1856_v45  ;;  %v2154_v57 = vld [vmem:[%s5655_s8 + $0x740] sm:$0xff] }
 0x2dd   :  { %2358 = vmatmul.f32.vlgmr.msra.gmra.mxu0 %v2602_v58  ;;  %2378 = vmatmul.f32.vlgmr.msra.gmra.mxu1 %v2604_v61  ;;  %v2170_v58 = vld [vmem:[%s5655_s8 + $0x7c0] sm:$0xff] }
 0x2de   :  { %2422 = vmatpush.msrb.mxu0 %v2129_v59  ;;  %2442 = vmatpush.msrb.mxu1 %v2145_v60  ;;  %v1873_v59 = vand.u32 2147483647, %v1857_v48  ;;  %v2118_v60 = vld [vmem:[%s5655_s8 + $0x620] sm:$0xff] }
 0x2df   :  { %2395 = vmatpush.msra.mxu2 %v2084_v62  ;;  %2415 = vmatpush.msra.mxu3 %v2100_v63  ;;  %v2134_v61 = vld [vmem:[%s5655_s8 + $0x6a0] sm:$0xff]  ;;  %v1914_v62 = vmul.f32 1.442695, %v1886_v51  ;;  %v2153_v63 = vld [vmem:[%s5655_s8 + $0x738] sm:$0xff] }
 0x2e0   :  { %2423 = vmatpush.msrb.mxu0 %v2128_v0  ;;  %2443 = vmatpush.msrb.mxu1 %v2144_v1  ;;  %v2169_v0 = vld [vmem:[%s5655_s8 + $0x7b8] sm:$0xff]  ;;  %v1916_v1 = vmul.f32 1.442695, %v1887_v44 }
 0x2e1   :  { %2396 = vmatpush.msra.mxu2 %v2083_v2  ;;  %2416 = vmatpush.msra.mxu3 %v2099_v3  ;;  %v2117_v2 = vld [vmem:[%s5655_s8 + $0x618] sm:$0xff]  ;;  %2609 = vpow2.f32 %v1914_v62 }
 0x2e2   :  { %2424 = vmatpush.msrb.mxu0 %v2127_v4  ;;  %2444 = vmatpush.msrb.mxu1 %v2143_v5  ;;  %v2133_v3 = vld [vmem:[%s5655_s8 + $0x698] sm:$0xff]  ;;  %v1888_v4 = vsub.f32 0.0, %v1872_v56  ;;  %v2152_v5 = vld [vmem:[%s5655_s8 + $0x730] sm:$0xff]  ;;  %2611 = vpow2.f32 %v1916_v1 }
 0x2e3   :  { %2397 = vmatpush.msra.mxu2 %v2082_v6  ;;  %2417 = vmatpush.msra.mxu3 %v2098_v7  ;;  %v2168_v6 = vld [vmem:[%s5655_s8 + $0x7b0] sm:$0xff]  ;;  %v1889_v7 = vsub.f32 0.0, %v1873_v59 }
 0x2e4   :  { %2398 = vmatmul.f32.vlgmr.msra.gmra.mxu2 %v2606_v8  ;;  %2418 = vmatmul.f32.vlgmr.msra.gmra.mxu3 %v2608_v11  ;;  %v2116_v8 = vld [vmem:[%s5655_s8 + $0x610] sm:$0xff]  ;;  %v2167_v11 = vld [vmem:[%s5655_s8 + $0x7a8] sm:$0xff] }
 0x2e5   :  { %2425 = vmatpush.msrb.mxu0 %v2126_v9  ;;  %2445 = vmatpush.msrb.mxu1 %v2142_v10  ;;  %v2132_v9 = vld [vmem:[%s5655_s8 + $0x690] sm:$0xff]  ;;  %v2151_v10 = vld [vmem:[%s5655_s8 + $0x728] sm:$0xff] }
 0x2e6   :  { %2462 = vmatpush.msrb.mxu2 %v2161_v13  ;;  %2482 = vmatpush.msrb.mxu3 %v2177_v14  ;;  %v2131_v13 = vld [vmem:[%s5655_s8 + $0x688] sm:$0xff]  ;;  %v1918_v14 = vmul.f32 1.442695, %v1888_v4 }
 0x2e7   :  { %2426 = vmatpush.msrb.mxu0 %v2125_v18  ;;  %2446 = vmatpush.msrb.mxu1 %v2141_v19  ;;  %v1920_v18 = vmul.f32 1.442695, %v1889_v7  ;;  %v2114_v19 = vld [vmem:[%s5655_s8 + $0x600] sm:$0xff] }
 0x2e8   :  { %2463 = vmatpush.msrb.mxu2 %v2160_v15  ;;  %2483 = vmatpush.msrb.mxu3 %v2176_v21  ;;  %v2149_v15 = vld [vmem:[%s5655_s8 + $0x718] sm:$0xff]  ;;  %2613 = vpow2.f32 %v1918_v14 }
 0x2e9   :  { %2427 = vmatpush.msrb.mxu0 %v2124_v22  ;;  %2447 = vmatpush.msrb.mxu1 %v2140_v23  ;;  %v2165_v21 = vld [vmem:[%s5655_s8 + $0x798] sm:$0xff]  ;;  %v2610_v22 = vpop.eup %2609  ;;  %v2148_v23 = vld [vmem:[%s5655_s8 + $0x710] sm:$0xff]  ;;  %2615 = vpow2.f32 %v1920_v18 }
 0x2ea   :  { %2464 = vmatpush.msrb.mxu2 %v2159_v26  ;;  %2484 = vmatpush.msrb.mxu3 %v2175_v27  ;;  %v2612_v26 = vpop.eup %2611  ;;  %v2147_v27 = vld [vmem:[%s5655_s8 + $0x708] sm:$0xff] }
 0x2eb   :  { %2428 = vmatpush.msrb.mxu0 %v2123_v29  ;;  %2448 = vmatpush.msrb.mxu1 %v2139_v30  ;;  %v2146_v29 = vld [vmem:[%s5655_s8 + $0x700] sm:$0xff] }
 0x2ec   :  { %2465 = vmatpush.msrb.mxu2 %v2158_v32  ;;  %2485 = vmatpush.msrb.mxu3 %v2174_v33  ;;  %v2162_v30 = vld [vmem:[%s5655_s8 + $0x780] sm:$0xff] }
 0x2ed   :  { %2429 = vmatpush.msrb.mxu0 %v2122_v36  ;;  %2449 = vmatpush.msrb.mxu1 %v2138_v37  ;;  %v2552_v33 = vld [vmem:[%s5656_s9] ss:$0 sm:$0xff] }
 0x2ee   :  { %2466 = vmatpush.msrb.mxu2 %v2157_v40  ;;  %2486 = vmatpush.msrb.mxu3 %v2173_v35  ;;  %v2614_v31 = vpop.eup %2613 }
 0x2ef   :  { %2430 = vmatpush.msrb.mxu0 %v2121_v42  ;;  %2450 = vmatpush.msrb.mxu1 %v2137_v43  ;;  %v2616_v32 = vpop.eup %2615 }
 0x2f0   :  { %2467 = vmatpush.msrb.mxu2 %v2156_v46  ;;  %2487 = vmatpush.msrb.mxu3 %v2172_v47 }
 0x2f1   :  { %2431 = vmatpush.msrb.mxu0 %v2120_v49  ;;  %2451 = vmatpush.msrb.mxu1 %v2136_v50 }
 0x2f2   :  { %2468 = vmatpush.msrb.mxu2 %v2155_v52  ;;  %2488 = vmatpush.msrb.mxu3 %v2171_v53 }
 0x2f3   :  { %2432 = vmatpush.msrb.mxu0 %v2119_v54  ;;  %2452 = vmatpush.msrb.mxu1 %v2135_v55 }
 0x2f4   :  { %2469 = vmatpush.msrb.mxu2 %v2154_v57  ;;  %2489 = vmatpush.msrb.mxu3 %v2170_v58 }
 0x2f5   :  { %2433 = vmatpush.msrb.mxu0 %v2118_v60  ;;  %2453 = vmatpush.msrb.mxu1 %v2134_v61 }
 0x2f6   :  { %2470 = vmatpush.msrb.mxu2 %v2153_v63  ;;  %2490 = vmatpush.msrb.mxu3 %v2169_v0 }
 0x2f7   :  { %2434 = vmatpush.msrb.mxu0 %v2117_v2  ;;  %2454 = vmatpush.msrb.mxu1 %v2133_v3 }
 0x2f8   :  { %2471 = vmatpush.msrb.mxu2 %v2152_v5  ;;  %2491 = vmatpush.msrb.mxu3 %v2168_v6 }
 0x2f9   :  { %2435 = vmatpush.msrb.mxu0 %v2116_v8  ;;  %2455 = vmatpush.msrb.mxu1 %v2132_v9 }
 0x2fa   :  { %2472 = vmatpush.msrb.mxu2 %v2151_v10  ;;  %2492 = vmatpush.msrb.mxu3 %v2167_v11 }
 0x2fb   :  { %2436 = vmatpush.msrb.mxu0 %v2115_v12  ;;  %2456 = vmatpush.msrb.mxu1 %v2131_v13 }
 0x2fc   :  { %2473 = vmatpush.msrb.mxu2 %v2150_v16  ;;  %2493 = vmatpush.msrb.mxu3 %v2166_v17 }
 0x2fd   :  { %2437 = vmatpush.msrb.mxu0 %v2114_v19  ;;  %2457 = vmatpush.msrb.mxu1 %v2130_v20 }
 0x2fe   :  { %2474 = vmatpush.msrb.mxu2 %v2149_v15  ;;  %2494 = vmatpush.msrb.mxu3 %v2165_v21 }
 0x2ff   :  { %2438 = vmatmul.f32.vlgmr.msrb.gmra.mxu0 %v2610_v22  ;;  %2458 = vmatmul.f32.vlgmr.msrb.gmra.mxu1 %v2612_v26 }
 0x300   :  { %2475 = vmatpush.msrb.mxu2 %v2148_v23  ;;  %2495 = vmatpush.msrb.mxu3 %v2164_v25 }
 0x302   :  { %2476 = vmatpush.msrb.mxu2 %v2147_v27  ;;  %2496 = vmatpush.msrb.mxu3 %v2163_v28 }
 0x304   :  { %2477 = vmatpush.msrb.mxu2 %v2146_v29  ;;  %2497 = vmatpush.msrb.mxu3 %v2162_v30 }
 0x305   :  { %2478 = vmatmul.f32.vlgmr.msrb.gmra.mxu2 %v2614_v31  ;;  %2498 = vmatmul.f32.vlgmr.msrb.gmra.mxu3 %v2616_v32 }
 0x336   :  { %v2199_v24 = vpop.f32.mrf.mxu0 }
 0x337   :  { %v2200_v34 = vadd.f32 %v2552_v33, %v2199_v24  ;;  %v2219_v36 = vpop.f32.mrf.mxu1 }
 0x339   :  { %v2220_v38 = vadd.f32 %v2219_v36, %v2200_v34 }
 0x340   :  { %v2279_v41 = vpop.f32.mrf.mxu0 }
 0x341   :  { %v2299_v43 = vpop.f32.mrf.mxu1 }
 0x343   :  { %v2239_v37 = vpop.f32.mrf.mxu2 }
 0x344   :  { %v2240_v39 = vadd.f32 %v2239_v37, %v2220_v38  ;;  %v2259_v40 = vpop.f32.mrf.mxu3 }
 0x346   :  { %v2260_v35 = vadd.f32 %v2259_v40, %v2240_v39 }
 0x348   :  { %v2280_v42 = vadd.f32 %v2279_v41, %v2260_v35 }
 0x34a   :  { %v2300_v45 = vadd.f32 %v2299_v43, %v2280_v42 }
 0x34d   :  { %v2319_v46 = vpop.f32.mrf.mxu2 }
 0x34e   :  { %v2320_v47 = vadd.f32 %v2319_v46, %v2300_v45  ;;  %v2339_v48 = vpop.f32.mrf.mxu3 }
 0x350   :  { %v2340_v50 = vadd.f32 %v2339_v48, %v2320_v47 }
 0x35a   :  { %v2359_v49 = vpop.f32.mrf.mxu0  ;;  %v2379_v52 = vpop.f32.mrf.mxu1 }
 0x35b   :  { %v2360_v51 = vadd.f32 %v2359_v49, %v2340_v50 }
 0x35d   :  { %v2380_v44 = vadd.f32 %v2379_v52, %v2360_v51 }
 0x367   :  { %v2399_v53 = vpop.f32.mrf.mxu2  ;;  %v2419_v55 = vpop.f32.mrf.mxu3 }
 0x368   :  { %v2400_v54 = vadd.f32 %v2399_v53, %v2380_v44 }
 0x36a   :  { %v2420_v57 = vadd.f32 %v2419_v55, %v2400_v54 }
 0x37c   :  { %v2439_v56 = vpop.f32.mrf.mxu0  ;;  %v2459_v59 = vpop.f32.mrf.mxu1 }
 0x37d   :  { %v2440_v58 = vadd.f32 %v2439_v56, %v2420_v57 }
 0x37f   :  { %v2460_v60 = vadd.f32 %v2459_v59, %v2440_v58 }
 0x388   :  { %v2479_v61 = vpop.f32.mrf.mxu2  ;;  %v2499_v63 = vpop.f32.mrf.mxu3 }
 0x389   :  { %v2480_v62 = vadd.f32 %v2479_v61, %v2460_v60 }
 0x38b   :  { %v2500_v0 = vadd.f32 %v2499_v63, %v2480_v62 }
 0x38d   :  { %2502 = vmax.xlane.f32.xlu0 %v2500_v0 }
 0x400   :  { %v2503_v1 = vpop.xlane.xlu0 %2502 }
 0x401   :  { %v2504_v2 = vsub.f32 %v2500_v0, %v2503_v1 }
 0x403   :  { %v2505_v3 = vmul.f32 1.442695, %v2504_v2 }
 0x405   :  { %2617 = vpow2.f32 %v2505_v3 }
 0x40b   :  { %v2618_v4 = vpop.eup %2617 }
 0x40c   :  { %2507 = vadd.xlane.f32.xlu0 %v2618_v4 }
 0x47f   :  { %v2508_v5 = vpop.xlane.xlu0 %2507 }
 0x480   :  { %2619 = vlog2.f32 %v2508_v5 }
 0x486   :  { %v2620_v6 = vpop.eup %2619 }
 0x487   :  { %v2510_v7 = vmul.f32 0.6931472, %v2620_v6 }
 0x489   :  { %v2511_v8 = vadd.f32 %v2510_v7, %v2503_v1 }
 0x48b   :  { %v2512_v9 = vsub.f32 %v2500_v0, %v2511_v8 }
 0x48d   :  { %2513 = vst [vmem:[%s5658_s10] sm:$0xff] %v2512_v9 }

</bundles_post_ra>
